<compile_context>
chip_gen: v6e
topology: v6e:2x2x1
jax: 0.10.0
libtpu: 0.0.40
codegen_flags: <defaults>
</compile_context>

<pallas_src>
import math
import functools

import jax
import jax.numpy as jnp
from jax.experimental import pallas as pl
from jax.experimental.pallas import tpu as pltpu


def _layernorm(v, a, b, *, eps=1e-6):
    # Matches the module's *custom* LayerNorm (NOT torch.nn.LayerNorm):
    # mean over last dim, unbiased std (n-1 divisor), eps added to std.
    # Reciprocal kept exact (review: keep LN normalization exact).
    n = v.shape[-1]
    mean = jnp.mean(v, axis=-1, keepdims=True)
    var = jnp.sum((v - mean) ** 2, axis=-1, keepdims=True) * (1.0 / (n - 1))
    inv = pl.reciprocal(jnp.sqrt(var) + eps, approx=False)
    return a * (v - mean) * inv + b


def attn_block_kernel(
    x_ref, m_ref, mT_ref,
    ln0_a, ln0_b,
    wq_t, bq,              # 1/sqrt(dk) already folded in
    wk, bk_col,            # un-transposed Wk, column bias -> K^T directly
    wv_t, bv,
    wo_hm, bo,             # Wo^T split head-major: (H, dk, D)
    ln1_a, ln1_b,
    w1_t, b1, w2_t, b2,
    o_ref,
    kT_scr, v_scr,
    *, n_head, dk, km_tile, approx_recip,
):
    cdt = wq_t.dtype                      # MXU operand dtype (bf16 or f32)
    f32 = jnp.float32
    Sm = v_scr.shape[0]

    # ---- K/V projections of the memory `m`: once per batch element ----
    # The q-tile axis is "arbitrary" (sequential, innermost), so qi == 0 runs
    # first for every batch index and fills the lane-dense VMEM caches.
    # No per-head loop, no transpose: K^T = Wk @ m^T (m^T comes pre-transposed
    # from the wrapper), V = m @ Wv^T.  Single full-block stores.
    @pl.when(pl.program_id(1) == 0)
    def _():
        kT = jnp.dot(wk[...], mT_ref[0], preferred_element_type=f32) + bk_col[...]
        kT_scr[...] = kT.astype(cdt)                                   # (D, Sm)
        v = jnp.dot(m_ref[0], wv_t[...], preferred_element_type=f32) + bv[...]
        v_scr[...] = v.astype(cdt)                                     # (Sm, D)

    x = x_ref[0].astype(f32)                                           # (TQ, D)
    tq = x.shape[0]

    # ---- sublayer 0: x + MHA(LN(x), m, m) ----
    xn = _layernorm(x, ln0_a[...], ln0_b[...])
    q = (jnp.dot(xn.astype(cdt), wq_t[...], preferred_element_type=f32)
         + bq[...]).astype(cdt)                                        # (TQ, D)

    # Residual + output-projection bias; per-head context is folded into the
    # residual through Wo_h (no (TQ, D) concat of per-head contexts).
    x1 = x + bo[...]

    for h in range(n_head):                        # static, unrolled (H small)
        lo = h * dk
        q_h = q[:, lo:lo + dk]                                         # (TQ, dk)

        # Chunked online softmax over Sm: bounded f32 intermediates.
        m_run = jnp.full((tq, 1), -jnp.inf, f32)
        l_run = jnp.zeros((tq, 1), f32)
        acc = jnp.zeros((tq, dk), f32)
        for c0 in range(0, Sm, km_tile):
            c1 = min(c0 + km_tile, Sm)
            # K^T cached pre-transposed -> plain NN contraction on the MXU.
            s = jnp.dot(q_h, kT_scr[lo:lo + dk, c0:c1],
                        preferred_element_type=f32)                    # (TQ, c)
            m_new = jnp.maximum(m_run, jnp.max(s, axis=-1, keepdims=True))
            alpha = jnp.exp(m_run - m_new)
            p = jnp.exp(s - m_new)
            l_run = alpha * l_run + jnp.sum(p, axis=-1, keepdims=True)
            acc = alpha * acc + jnp.dot(p.astype(cdt),
                                        v_scr[c0:c1, lo:lo + dk],
                                        preferred_element_type=f32)    # (TQ, dk)
            m_run = m_new

        ctx_h = acc * pl.reciprocal(l_run, approx=approx_recip)        # (TQ, dk)
        x1 = x1 + jnp.dot(ctx_h.astype(cdt), wo_hm[h],
                          preferred_element_type=f32)                  # (TQ, D)

    # ---- sublayer 1: x1 + FFN(LN(x1)) ----
    xn1 = _layernorm(x1, ln1_a[...], ln1_b[...])
    h1 = jnp.maximum(
        jnp.dot(xn1.astype(cdt), w1_t[...], preferred_element_type=f32)
        + b1[...], 0.0)
    ff = jnp.dot(h1.astype(cdt), w2_t[...], preferred_element_type=f32) + b2[...]

    o_ref[0] = (x1 + ff).astype(o_ref.dtype)


def _pick_q_tile(S):
    # Prefer multiples of 256 (v6e/v7x 2x256^2 MXU), then 128, then smaller.
    for t in (1024, 512, 256, 128, 64, 32, 16, 8):
        if S % t == 0:
            return t
    return S  # block == full dim is always legal


def _pick_vmem_limit_bytes():
    mib = 1024 * 1024
    try:
        cap = int(pltpu.get_tpu_info().vmem_capacity_bytes)
    except Exception:
        cap = 64 * mib               # conservative (v7x per-TC physical VMEM)
    cap = min(cap, 128 * mib)
    return max(32 * mib, cap - 16 * mib)   # ~112 MiB v5e/v6e, ~48 MiB v7x


def attn_block(x, m, params, n_head, *, q_tile=None, km_tile=None,
               compute_dtype=jnp.bfloat16):
    B, S, D = x.shape
    Bm, Sm, Dm = m.shape
    assert B == Bm and D == Dm and D % n_head == 0
    dk = D // n_head
    dff = params["w1"].shape[0]

    if q_tile is None:
        q_tile = _pick_q_tile(S)
    assert S % q_tile == 0 or q_tile == S
    n_qt = S // q_tile if S % q_tile == 0 else 1
    if km_tile is None:
        km_tile = min(Sm, 512)

    cdt = jnp.dtype(compute_dtype)
    approx = cdt != jnp.dtype(jnp.float32)
    f32 = jnp.float32
    scale = 1.0 / math.sqrt(dk)

    # Host-side weight prep (free): pre-transposed / head-major / scale-folded.
    wq_t = (params["wq"].T * scale).astype(cdt)          # (D, D), scale folded
    bq = (params["bq"] * scale).astype(f32)              # (1, D)
    wk = params["wk"].astype(cdt)                        # (D, D) un-transposed
    bk_col = params["bk"].reshape(D, 1).astype(f32)      # column bias for K^T
    wv_t = params["wv"].T.astype(cdt)                    # (D, D)
    bv = params["bv"].astype(f32)
    wo_hm = params["wo"].T.reshape(n_head, dk, D).astype(cdt)   # (H, dk, D)
    bo = params["bo"].astype(f32)
    w1_t = params["w1"].T.astype(cdt)                    # (D, dff)
    b1 = params["b1"].astype(f32)
    w2_t = params["w2"].T.astype(cdt)                    # (dff, D)
    b2 = params["b2"].astype(f32)
    ln0_a = params["ln0_a"].astype(f32)
    ln0_b = params["ln0_b"].astype(f32)
    ln1_a = params["ln1_a"].astype(f32)
    ln1_b = params["ln1_b"].astype(f32)

    # x kept f32 for exact residuals / LN stats; m in compute dtype; m^T is
    # wrapper-side layout plumbing so the kernel never transposes anything.
    x_in = x.astype(f32)
    m_in = m.astype(cdt)
    mT_in = jnp.swapaxes(m, 1, 2).astype(cdt)            # (B, D, Sm)

    kernel = functools.partial(attn_block_kernel, n_head=n_head, dk=dk,
                               km_tile=km_tile, approx_recip=approx)

    def _const_spec(shape, single_buffer):
        nd = len(shape)
        index_map = lambda b, qi, _n=nd: (0,) * _n
        if single_buffer:
            # Grid-invariant input: a single VMEM buffer is enough.
            return pl.BlockSpec(shape, index_map, pipeline_mode=pl.Buffered(1))
        return pl.BlockSpec(shape, index_map)

    def _run(single_buffer):
        sb = single_buffer
        in_specs = [
            pl.BlockSpec((1, q_tile, D), lambda b, qi: (b, qi, 0)),   # x tile
            pl.BlockSpec((1, Sm, D), lambda b, qi: (b, 0, 0)),        # m
            pl.BlockSpec((1, D, Sm), lambda b, qi: (b, 0, 0)),        # m^T
            _const_spec((1, D), sb), _const_spec((1, D), sb),          # ln0 a,b
            _const_spec((D, D), sb), _const_spec((1, D), sb),          # Wq^T,bq
            _const_spec((D, D), sb), _const_spec((D, 1), sb),          # Wk, bk
            _const_spec((D, D), sb), _const_spec((1, D), sb),          # Wv^T,bv
            _const_spec((n_head, dk, D), sb), _const_spec((1, D), sb), # Wo,bo
            _const_spec((1, D), sb), _const_spec((1, D), sb),          # ln1 a,b
            _const_spec((D, dff), sb), _const_spec((1, dff), sb),      # W1^T,b1
            _const_spec((dff, D), sb), _const_spec((1, D), sb),        # W2^T,b2
        ]
        out = pl.pallas_call(
            kernel,
            out_shape=jax.ShapeDtypeStruct((B, S, D), x.dtype),
            grid_spec=pltpu.PrefetchScalarGridSpec(
                num_scalar_prefetch=0,
                grid=(B, n_qt),
                in_specs=in_specs,
                out_specs=pl.BlockSpec((1, q_tile, D), lambda b, qi: (b, qi, 0)),
                scratch_shapes=[
                    pltpu.VMEM((D, Sm), cdt),    # K^T cache (lane-dense)
                    pltpu.VMEM((Sm, D), cdt),    # V cache  (lane-dense)
                ],
            ),
            compiler_params=pltpu.CompilerParams(
                # Batch axis feeds megacore; the q-tile axis MUST stay
                # "arbitrary" (sequential, innermost) so the K/V scratch filled
                # at qi == 0 is valid for later tiles of the same batch.
                # (For B < num_cores on v7x, flip to parallel q-tiles and
                # recompute K/V per tile instead.)
                dimension_semantics=("parallel", "arbitrary"),
                vmem_limit_bytes=_pick_vmem_limit_bytes(),
            ),
        )(
            x_in, m_in, mT_in,
            ln0_a, ln0_b,
            wq_t, bq, wk, bk_col, wv_t, bv, wo_hm, bo,
            ln1_a, ln1_b,
            w1_t, b1, w2_t, b2,
        )
        return jax.block_until_ready(out)

    try:
        return _run(True)            # single-buffered grid-invariant weights
    except Exception:
        return _run(False)           # fallback: default double buffering


def reference_attn_block(x, m, params, n_head):
    """Plain-JAX f32 reference matching the PyTorch AttnBlock forward (eval)."""
    def ln(v, a, b, eps=1e-6):
        n = v.shape[-1]
        mean = jnp.mean(v, axis=-1, keepdims=True)
        var = jnp.sum((v - mean) ** 2, axis=-1, keepdims=True) / (n - 1)
        return a * (v - mean) / (jnp.sqrt(var) + eps) + b

    B, S, D = x.shape
    dk = D // n_head
    xn = ln(x, params["ln0_a"], params["ln0_b"])
    q = xn @ params["wq"].T + params["bq"]
    k = m @ params["wk"].T + params["bk"]
    v = m @ params["wv"].T + params["bv"]
    qh = q.reshape(B, S, n_head, dk).transpose(0, 2, 1, 3)
    kh = k.reshape(B, -1, n_head, dk).transpose(0, 2, 1, 3)
    vh = v.reshape(B, -1, n_head, dk).transpose(0, 2, 1, 3)
    s = jnp.einsum("bhqd,bhkd->bhqk", qh, kh) / math.sqrt(dk)
    p = jax.nn.softmax(s, axis=-1)
    ctx = jnp.einsum("bhqk,bhkd->bhqd", p, vh).transpose(0, 2, 1, 3).reshape(B, S, D)
    x1 = x + (ctx @ params["wo"].T + params["bo"])
    xn1 = ln(x1, params["ln1_a"], params["ln1_b"])
    h1 = jax.nn.relu(xn1 @ params["w1"].T + params["b1"])
    return x1 + (h1 @ params["w2"].T + params["b2"])


def init_params(key, dim, dim_ff):
    ks = jax.random.split(key, 16)
    sd = 1.0 / math.sqrt(dim)
    sf = 1.0 / math.sqrt(dim_ff)

    def nrm(k, shape, s):
        return jax.random.normal(k, shape, jnp.float32) * s

    return {
        "ln0_a": 1.0 + 0.1 * jax.random.normal(ks[0], (1, dim), jnp.float32),
        "ln0_b": 0.1 * jax.random.normal(ks[1], (1, dim), jnp.float32),
        "ln1_a": 1.0 + 0.1 * jax.random.normal(ks[2], (1, dim), jnp.float32),
        "ln1_b": 0.1 * jax.random.normal(ks[3], (1, dim), jnp.float32),
        "wq": nrm(ks[4], (dim, dim), sd),      "bq": nrm(ks[5], (1, dim), 0.1),
        "wk": nrm(ks[6], (dim, dim), sd),      "bk": nrm(ks[7], (1, dim), 0.1),
        "wv": nrm(ks[8], (dim, dim), sd),      "bv": nrm(ks[9], (1, dim), 0.1),
        "wo": nrm(ks[10], (dim, dim), sd),     "bo": nrm(ks[11], (1, dim), 0.1),
        "w1": nrm(ks[12], (dim_ff, dim), sd),  "b1": nrm(ks[13], (1, dim_ff), 0.1),
        "w2": nrm(ks[14], (dim, dim_ff), sf),  "b2": nrm(ks[15], (1, dim), 0.1),
    }


if __name__ == "__main__":
    # Small but lane-dense shapes (D and dim_ff multiples of 128).
    B, S, Sm = 2, 16, 24
    dim, dim_ff, n_head = 128, 256, 4

    key = jax.random.PRNGKey(0)
    kx, km, kp = jax.random.split(key, 3)
    x = jax.random.normal(kx, (B, S, dim), jnp.float32)
    m = jax.random.normal(km, (B, Sm, dim), jnp.float32)
    params = init_params(kp, dim, dim_ff)

    ref = reference_attn_block(x, m, params, n_head)

    # Exact-precision path: q_tile=8 -> grid (2, 2) exercises the once-per-batch
    # K/V cache reuse; km_tile=16 -> chunks (16, 8) exercise the online softmax
    # (including a ragged last chunk).  Must match the reference tightly.
    out_f32 = attn_block(x, m, params, n_head, q_tile=8, km_tile=16,
                         compute_dtype=jnp.float32)
    out_f32 = jax.block_until_ready(out_f32)
    assert out_f32.shape == (B, S, dim)
    assert jnp.allclose(out_f32, ref, atol=1e-4, rtol=1e-4), \
        "f32 kernel mismatch vs reference"

    # Fast path: bf16 MXU operands, f32 accumulation / statistics; default
    # q_tile / km_tile pickers.
    out_bf16 = attn_block(x, m, params, n_head, compute_dtype=jnp.bfloat16)
    out_bf16 = jax.block_until_ready(out_bf16)
    rel = jnp.linalg.norm((out_bf16 - ref).astype(jnp.float32)) / jnp.linalg.norm(ref)
    assert float(rel) < 5e-2, f"bf16 kernel relative error too large: {float(rel)}"

    print("KERNEL_OK")
</pallas_src>

<mosaic_0001>
module attributes {stable_mosaic.version = 11 : i64} {
  func.func @attn_block_kernel(%arg0: i32, %arg1: i32, %arg2: memref<1x8x128xf32, #tpu.memory_space<vmem>>, %arg3: memref<1x24x128xf32, #tpu.memory_space<vmem>>, %arg4: memref<1x128x24xf32, #tpu.memory_space<vmem>>, %arg5: memref<1x128xf32, #tpu.memory_space<vmem>>, %arg6: memref<1x128xf32, #tpu.memory_space<vmem>>, %arg7: memref<128x128xf32, #tpu.memory_space<vmem>>, %arg8: memref<1x128xf32, #tpu.memory_space<vmem>>, %arg9: memref<128x128xf32, #tpu.memory_space<vmem>>, %arg10: memref<128x1xf32, #tpu.memory_space<vmem>>, %arg11: memref<128x128xf32, #tpu.memory_space<vmem>>, %arg12: memref<1x128xf32, #tpu.memory_space<vmem>>, %arg13: memref<4x32x128xf32, #tpu.memory_space<vmem>>, %arg14: memref<1x128xf32, #tpu.memory_space<vmem>>, %arg15: memref<1x128xf32, #tpu.memory_space<vmem>>, %arg16: memref<1x128xf32, #tpu.memory_space<vmem>>, %arg17: memref<128x256xf32, #tpu.memory_space<vmem>>, %arg18: memref<1x256xf32, #tpu.memory_space<vmem>>, %arg19: memref<256x128xf32, #tpu.memory_space<vmem>>, %arg20: memref<1x128xf32, #tpu.memory_space<vmem>>, %arg21: memref<1x8x128xf32, #tpu.memory_space<vmem>>, %arg22: memref<128x24xf32, #tpu.memory_space<vmem>>, %arg23: memref<24x128xf32, #tpu.memory_space<vmem>>) attributes {dimension_semantics = [#tpu.dimension_semantics<parallel>, #tpu.dimension_semantics<arbitrary>], iteration_bounds = array<i64: 2, 2>, scalar_prefetch = 0 : i64, scratch_operands = 2 : i64, tpu.core_type = #tpu.core_type<tc>, window_params = [{transform_indices = @transform_0, window_bounds = array<i64: 1, 8, 128>}, {transform_indices = @transform_1, window_bounds = array<i64: 1, 24, 128>}, {transform_indices = @transform_2, window_bounds = array<i64: 1, 128, 24>}, {pipeline_mode = #tpu.pipeline_mode<synchronous>, transform_indices = @transform_3, window_bounds = array<i64: 1, 128>}, {pipeline_mode = #tpu.pipeline_mode<synchronous>, transform_indices = @transform_4, window_bounds = array<i64: 1, 128>}, {pipeline_mode = #tpu.pipeline_mode<synchronous>, transform_indices = @transform_5, window_bounds = array<i64: 128, 128>}, {pipeline_mode = #tpu.pipeline_mode<synchronous>, transform_indices = @transform_6, window_bounds = array<i64: 1, 128>}, {pipeline_mode = #tpu.pipeline_mode<synchronous>, transform_indices = @transform_7, window_bounds = array<i64: 128, 128>}, {pipeline_mode = #tpu.pipeline_mode<synchronous>, transform_indices = @transform_8, window_bounds = array<i64: 128, 1>}, {pipeline_mode = #tpu.pipeline_mode<synchronous>, transform_indices = @transform_9, window_bounds = array<i64: 128, 128>}, {pipeline_mode = #tpu.pipeline_mode<synchronous>, transform_indices = @transform_10, window_bounds = array<i64: 1, 128>}, {pipeline_mode = #tpu.pipeline_mode<synchronous>, transform_indices = @transform_11, window_bounds = array<i64: 4, 32, 128>}, {pipeline_mode = #tpu.pipeline_mode<synchronous>, transform_indices = @transform_12, window_bounds = array<i64: 1, 128>}, {pipeline_mode = #tpu.pipeline_mode<synchronous>, transform_indices = @transform_13, window_bounds = array<i64: 1, 128>}, {pipeline_mode = #tpu.pipeline_mode<synchronous>, transform_indices = @transform_14, window_bounds = array<i64: 1, 128>}, {pipeline_mode = #tpu.pipeline_mode<synchronous>, transform_indices = @transform_15, window_bounds = array<i64: 128, 256>}, {pipeline_mode = #tpu.pipeline_mode<synchronous>, transform_indices = @transform_16, window_bounds = array<i64: 1, 256>}, {pipeline_mode = #tpu.pipeline_mode<synchronous>, transform_indices = @transform_17, window_bounds = array<i64: 256, 128>}, {pipeline_mode = #tpu.pipeline_mode<synchronous>, transform_indices = @transform_18, window_bounds = array<i64: 1, 128>}, {transform_indices = @transform_19, window_bounds = array<i64: 1, 8, 128>}]} {
    %c0_i32 = arith.constant 0 : i32
    %0 = arith.cmpi eq, %arg1, %c0_i32 : i32
    %1 = arith.extui %0 : i1 to i32
    %c0_i32_0 = arith.constant 0 : i32
    %2 = arith.cmpi ne, %1, %c0_i32_0 : i32
    scf.if %2 {
      %c0_126 = arith.constant 0 : index
      %c0_127 = arith.constant 0 : index
      %275 = vector.load %arg9[%c0_126, %c0_127] : memref<128x128xf32, #tpu.memory_space<vmem>>, vector<128x128xf32>
      %c0_128 = arith.constant 0 : index
      %c0_129 = arith.constant 0 : index
      %c0_130 = arith.constant 0 : index
      %276 = vector.load %arg4[%c0_128, %c0_129, %c0_130] : memref<1x128x24xf32, #tpu.memory_space<vmem>>, vector<1x128x24xf32>
      %277 = vector.shape_cast %276 : vector<1x128x24xf32> to vector<128x24xf32>
      %cst_131 = arith.constant dense<0.000000e+00> : vector<128x24xf32>
      %278 = tpu.matmul %275, %277, %cst_131 {dimension_numbers = #tpu.dot_dimension_numbers<[1], [0], [0], [1], [0, 0, 1, 1], [], []>} : vector<128x128xf32>, vector<128x24xf32>, vector<128x24xf32> -> vector<128x24xf32>
      %c0_132 = arith.constant 0 : index
      %c0_133 = arith.constant 0 : index
      %279 = vector.load %arg10[%c0_132, %c0_133] : memref<128x1xf32, #tpu.memory_space<vmem>>, vector<128x1xf32>
      %280 = vector.broadcast %279 : vector<128x1xf32> to vector<128x24xf32>
      %281 = arith.addf %278, %280 : vector<128x24xf32>
      %c0_134 = arith.constant 0 : index
      %c0_135 = arith.constant 0 : index
      %282 = vector.load %arg22[%c0_134, %c0_135] : memref<128x24xf32, #tpu.memory_space<vmem>>, vector<128x24xf32>
      tpu.vector_store %arg22[%c0_134, %c0_135], %281 {strides = array<i32>} : memref<128x24xf32, #tpu.memory_space<vmem>>, vector<128x24xf32>,
      %c0_136 = arith.constant 0 : index
      %c0_137 = arith.constant 0 : index
      %c0_138 = arith.constant 0 : index
      %283 = vector.load %arg3[%c0_136, %c0_137, %c0_138] : memref<1x24x128xf32, #tpu.memory_space<vmem>>, vector<1x24x128xf32>
      %284 = vector.shape_cast %283 : vector<1x24x128xf32> to vector<24x128xf32>
      %c0_139 = arith.constant 0 : index
      %c0_140 = arith.constant 0 : index
      %285 = vector.load %arg11[%c0_139, %c0_140] : memref<128x128xf32, #tpu.memory_space<vmem>>, vector<128x128xf32>
      %cst_141 = arith.constant dense<0.000000e+00> : vector<24x128xf32>
      %286 = tpu.matmul %284, %285, %cst_141 {dimension_numbers = #tpu.dot_dimension_numbers<[1], [0], [0], [1], [0, 0, 1, 1], [], []>} : vector<24x128xf32>, vector<128x128xf32>, vector<24x128xf32> -> vector<24x128xf32>
      %c0_142 = arith.constant 0 : index
      %c0_143 = arith.constant 0 : index
      %287 = vector.load %arg12[%c0_142, %c0_143] : memref<1x128xf32, #tpu.memory_space<vmem>>, vector<1x128xf32>
      %288 = vector.broadcast %287 : vector<1x128xf32> to vector<24x128xf32>
      %289 = arith.addf %286, %288 : vector<24x128xf32>
      %c0_144 = arith.constant 0 : index
      %c0_145 = arith.constant 0 : index
      %290 = vector.load %arg23[%c0_144, %c0_145] : memref<24x128xf32, #tpu.memory_space<vmem>>, vector<24x128xf32>
      tpu.vector_store %arg23[%c0_144, %c0_145], %289 {strides = array<i32>} : memref<24x128xf32, #tpu.memory_space<vmem>>, vector<24x128xf32>,
    } else {
    }
    %c0 = arith.constant 0 : index
    %c0_1 = arith.constant 0 : index
    %c0_2 = arith.constant 0 : index
    %3 = vector.load %arg2[%c0, %c0_1, %c0_2] : memref<1x8x128xf32, #tpu.memory_space<vmem>>, vector<1x8x128xf32>
    %4 = vector.shape_cast %3 : vector<1x8x128xf32> to vector<8x128xf32>
    %c0_3 = arith.constant 0 : index
    %c0_4 = arith.constant 0 : index
    %5 = vector.load %arg5[%c0_3, %c0_4] : memref<1x128xf32, #tpu.memory_space<vmem>>, vector<1x128xf32>
    %c0_5 = arith.constant 0 : index
    %c0_6 = arith.constant 0 : index
    %6 = vector.load %arg6[%c0_5, %c0_6] : memref<1x128xf32, #tpu.memory_space<vmem>>, vector<1x128xf32>
    %cst = arith.constant dense<0.000000e+00> : vector<8xf32>
    %7 = vector.multi_reduction <add>, %4, %cst [1] : vector<8x128xf32> to vector<8xf32>
    %8 = vector.shape_cast %7 : vector<8xf32> to vector<8x1xf32>
    %cst_7 = arith.constant 1.280000e+02 : f32
    %9 = vector.broadcast %cst_7 : f32 to vector<8x1xf32>
    %10 = arith.divf %8, %9 : vector<8x1xf32>
    %11 = vector.broadcast %10 : vector<8x1xf32> to vector<8x128xf32>
    %12 = arith.subf %4, %11 : vector<8x128xf32>
    %13 = arith.mulf %12, %12 : vector<8x128xf32>
    %cst_8 = arith.constant dense<0.000000e+00> : vector<8xf32>
    %14 = vector.multi_reduction <add>, %13, %cst_8 [1] : vector<8x128xf32> to vector<8xf32>
    %15 = vector.shape_cast %14 : vector<8xf32> to vector<8x1xf32>
    %cst_9 = arith.constant 0.00787401571 : f32
    %16 = vector.broadcast %cst_9 : f32 to vector<8x1xf32>
    %17 = arith.mulf %15, %16 : vector<8x1xf32>
    %18 = math.sqrt %17 : vector<8x1xf32>
    %cst_10 = arith.constant 9.99999997E-7 : f32
    %19 = vector.broadcast %cst_10 : f32 to vector<8x1xf32>
    %20 = arith.addf %18, %19 : vector<8x1xf32>
    %21 = tpu.reciprocal %20 : vector<8x1xf32> -> vector<8x1xf32>
    %22 = vector.broadcast %10 : vector<8x1xf32> to vector<8x128xf32>
    %23 = arith.subf %4, %22 : vector<8x128xf32>
    %24 = vector.broadcast %5 : vector<1x128xf32> to vector<8x128xf32>
    %25 = arith.mulf %24, %23 : vector<8x128xf32>
    %26 = vector.broadcast %21 : vector<8x1xf32> to vector<8x128xf32>
    %27 = arith.mulf %25, %26 : vector<8x128xf32>
    %28 = vector.broadcast %6 : vector<1x128xf32> to vector<8x128xf32>
    %29 = arith.addf %27, %28 : vector<8x128xf32>
    %c0_11 = arith.constant 0 : index
    %c0_12 = arith.constant 0 : index
    %30 = vector.load %arg7[%c0_11, %c0_12] : memref<128x128xf32, #tpu.memory_space<vmem>>, vector<128x128xf32>
    %cst_13 = arith.constant dense<0.000000e+00> : vector<8x128xf32>
    %31 = tpu.matmul %29, %30, %cst_13 {dimension_numbers = #tpu.dot_dimension_numbers<[1], [0], [0], [1], [0, 0, 1, 1], [], []>} : vector<8x128xf32>, vector<128x128xf32>, vector<8x128xf32> -> vector<8x128xf32>
    %c0_14 = arith.constant 0 : index
    %c0_15 = arith.constant 0 : index
    %32 = vector.load %arg8[%c0_14, %c0_15] : memref<1x128xf32, #tpu.memory_space<vmem>>, vector<1x128xf32>
    %33 = vector.broadcast %32 : vector<1x128xf32> to vector<8x128xf32>
    %34 = arith.addf %31, %33 : vector<8x128xf32>
    %c0_16 = arith.constant 0 : index
    %c0_17 = arith.constant 0 : index
    %35 = vector.load %arg14[%c0_16, %c0_17] : memref<1x128xf32, #tpu.memory_space<vmem>>, vector<1x128xf32>
    %36 = vector.broadcast %35 : vector<1x128xf32> to vector<8x128xf32>
    %37 = arith.addf %4, %36 : vector<8x128xf32>
    %38 = vector.extract_strided_slice %34 {offsets = [0, 0], sizes = [8, 32], strides = [1, 1]} : vector<8x128xf32> to vector<8x32xf32>
    %cst_18 = arith.constant 0xFF800000 : f32
    %39 = vector.broadcast %cst_18 : f32 to vector<8x1xf32>
    %cst_19 = arith.constant 0.000000e+00 : f32
    %40 = vector.broadcast %cst_19 : f32 to vector<8x1xf32>
    %cst_20 = arith.constant 0.000000e+00 : f32
    %41 = vector.broadcast %cst_20 : f32 to vector<8x32xf32>
    %c0_21 = arith.constant 0 : index
    %c0_22 = arith.constant 0 : index
    %42 = vector.load %arg22[%c0_21, %c0_22] : memref<128x24xf32, #tpu.memory_space<vmem>>, vector<32x16xf32>
    %cst_23 = arith.constant dense<0.000000e+00> : vector<8x16xf32>
    %43 = tpu.matmul %38, %42, %cst_23 {dimension_numbers = #tpu.dot_dimension_numbers<[1], [0], [0], [1], [0, 0, 1, 1], [], []>} : vector<8x32xf32>, vector<32x16xf32>, vector<8x16xf32> -> vector<8x16xf32>
    %cst_24 = arith.constant dense<0xFF800000> : vector<8xf32>
    %44 = vector.multi_reduction <maximumf>, %43, %cst_24 [1] : vector<8x16xf32> to vector<8xf32>
    %45 = vector.shape_cast %44 : vector<8xf32> to vector<8x1xf32>
    %46 = arith.maximumf %39, %45 : vector<8x1xf32>
    %47 = arith.subf %39, %46 : vector<8x1xf32>
    %48 = math.exp %47 : vector<8x1xf32>
    %49 = vector.broadcast %46 : vector<8x1xf32> to vector<8x16xf32>
    %50 = arith.subf %43, %49 : vector<8x16xf32>
    %51 = math.exp %50 : vector<8x16xf32>
    %52 = arith.mulf %48, %40 : vector<8x1xf32>
    %cst_25 = arith.constant dense<0.000000e+00> : vector<8xf32>
    %53 = vector.multi_reduction <add>, %51, %cst_25 [1] : vector<8x16xf32> to vector<8xf32>
    %54 = vector.shape_cast %53 : vector<8xf32> to vector<8x1xf32>
    %55 = arith.addf %52, %54 : vector<8x1xf32>
    %56 = vector.broadcast %48 : vector<8x1xf32> to vector<8x32xf32>
    %57 = arith.mulf %56, %41 : vector<8x32xf32>
    %c0_26 = arith.constant 0 : index
    %c0_27 = arith.constant 0 : index
    %58 = vector.load %arg23[%c0_26, %c0_27] : memref<24x128xf32, #tpu.memory_space<vmem>>, vector<16x32xf32>
    %cst_28 = arith.constant dense<0.000000e+00> : vector<8x32xf32>
    %59 = tpu.matmul %51, %58, %cst_28 {dimension_numbers = #tpu.dot_dimension_numbers<[1], [0], [0], [1], [0, 0, 1, 1], [], []>} : vector<8x16xf32>, vector<16x32xf32>, vector<8x32xf32> -> vector<8x32xf32>
    %60 = arith.addf %57, %59 : vector<8x32xf32>
    %c0_29 = arith.constant 0 : index
    %c16 = arith.constant 16 : index
    %61 = vector.load %arg22[%c0_29, %c16] : memref<128x24xf32, #tpu.memory_space<vmem>>, vector<32x8xf32>
    %cst_30 = arith.constant dense<0.000000e+00> : vector<8x8xf32>
    %62 = tpu.matmul %38, %61, %cst_30 {dimension_numbers = #tpu.dot_dimension_numbers<[1], [0], [0], [1], [0, 0, 1, 1], [], []>} : vector<8x32xf32>, vector<32x8xf32>, vector<8x8xf32> -> vector<8x8xf32>
    %cst_31 = arith.constant dense<0xFF800000> : vector<8xf32>
    %63 = vector.multi_reduction <maximumf>, %62, %cst_31 [1] : vector<8x8xf32> to vector<8xf32>
    %64 = vector.shape_cast %63 : vector<8xf32> to vector<8x1xf32>
    %65 = arith.maximumf %46, %64 : vector<8x1xf32>
    %66 = arith.subf %46, %65 : vector<8x1xf32>
    %67 = math.exp %66 : vector<8x1xf32>
    %68 = vector.broadcast %65 : vector<8x1xf32> to vector<8x8xf32>
    %69 = arith.subf %62, %68 : vector<8x8xf32>
    %70 = math.exp %69 : vector<8x8xf32>
    %71 = arith.mulf %67, %55 : vector<8x1xf32>
    %cst_32 = arith.constant dense<0.000000e+00> : vector<8xf32>
    %72 = vector.multi_reduction <add>, %70, %cst_32 [1] : vector<8x8xf32> to vector<8xf32>
    %73 = vector.shape_cast %72 : vector<8xf32> to vector<8x1xf32>
    %74 = arith.addf %71, %73 : vector<8x1xf32>
    %75 = vector.broadcast %67 : vector<8x1xf32> to vector<8x32xf32>
    %76 = arith.mulf %75, %60 : vector<8x32xf32>
    %c16_33 = arith.constant 16 : index
    %c0_34 = arith.constant 0 : index
    %77 = vector.load %arg23[%c16_33, %c0_34] : memref<24x128xf32, #tpu.memory_space<vmem>>, vector<8x32xf32>
    %cst_35 = arith.constant dense<0.000000e+00> : vector<8x32xf32>
    %78 = tpu.matmul %70, %77, %cst_35 {dimension_numbers = #tpu.dot_dimension_numbers<[1], [0], [0], [1], [0, 0, 1, 1], [], []>} : vector<8x8xf32>, vector<8x32xf32>, vector<8x32xf32> -> vector<8x32xf32>
    %79 = arith.addf %76, %78 : vector<8x32xf32>
    %80 = tpu.reciprocal %74 : vector<8x1xf32> -> vector<8x1xf32>
    %81 = vector.broadcast %80 : vector<8x1xf32> to vector<8x32xf32>
    %82 = arith.mulf %79, %81 : vector<8x32xf32>
    %c0_36 = arith.constant 0 : index
    %c0_37 = arith.constant 0 : index
    %c0_38 = arith.constant 0 : index
    %83 = vector.load %arg13[%c0_36, %c0_37, %c0_38] : memref<4x32x128xf32, #tpu.memory_space<vmem>>, vector<1x32x128xf32>
    %84 = vector.shape_cast %83 : vector<1x32x128xf32> to vector<32x128xf32>
    %cst_39 = arith.constant dense<0.000000e+00> : vector<8x128xf32>
    %85 = tpu.matmul %82, %84, %cst_39 {dimension_numbers = #tpu.dot_dimension_numbers<[1], [0], [0], [1], [0, 0, 1, 1], [], []>} : vector<8x32xf32>, vector<32x128xf32>, vector<8x128xf32> -> vector<8x128xf32>
    %86 = arith.addf %37, %85 : vector<8x128xf32>
    %87 = vector.extract_strided_slice %34 {offsets = [0, 32], sizes = [8, 32], strides = [1, 1]} : vector<8x128xf32> to vector<8x32xf32>
    %cst_40 = arith.constant 0xFF800000 : f32
    %88 = vector.broadcast %cst_40 : f32 to vector<8x1xf32>
    %cst_41 = arith.constant 0.000000e+00 : f32
    %89 = vector.broadcast %cst_41 : f32 to vector<8x1xf32>
    %cst_42 = arith.constant 0.000000e+00 : f32
    %90 = vector.broadcast %cst_42 : f32 to vector<8x32xf32>
    %c32 = arith.constant 32 : index
    %c0_43 = arith.constant 0 : index
    %91 = vector.load %arg22[%c32, %c0_43] : memref<128x24xf32, #tpu.memory_space<vmem>>, vector<32x16xf32>
    %cst_44 = arith.constant dense<0.000000e+00> : vector<8x16xf32>
    %92 = tpu.matmul %87, %91, %cst_44 {dimension_numbers = #tpu.dot_dimension_numbers<[1], [0], [0], [1], [0, 0, 1, 1], [], []>} : vector<8x32xf32>, vector<32x16xf32>, vector<8x16xf32> -> vector<8x16xf32>
    %cst_45 = arith.constant dense<0xFF800000> : vector<8xf32>
    %93 = vector.multi_reduction <maximumf>, %92, %cst_45 [1] : vector<8x16xf32> to vector<8xf32>
    %94 = vector.shape_cast %93 : vector<8xf32> to vector<8x1xf32>
    %95 = arith.maximumf %88, %94 : vector<8x1xf32>
    %96 = arith.subf %88, %95 : vector<8x1xf32>
    %97 = math.exp %96 : vector<8x1xf32>
    %98 = vector.broadcast %95 : vector<8x1xf32> to vector<8x16xf32>
    %99 = arith.subf %92, %98 : vector<8x16xf32>
    %100 = math.exp %99 : vector<8x16xf32>
    %101 = arith.mulf %97, %89 : vector<8x1xf32>
    %cst_46 = arith.constant dense<0.000000e+00> : vector<8xf32>
    %102 = vector.multi_reduction <add>, %100, %cst_46 [1] : vector<8x16xf32> to vector<8xf32>
    %103 = vector.shape_cast %102 : vector<8xf32> to vector<8x1xf32>
    %104 = arith.addf %101, %103 : vector<8x1xf32>
    %105 = vector.broadcast %97 : vector<8x1xf32> to vector<8x32xf32>
    %106 = arith.mulf %105, %90 : vector<8x32xf32>
    %c0_47 = arith.constant 0 : index
    %c32_48 = arith.constant 32 : index
    %107 = vector.load %arg23[%c0_47, %c32_48] : memref<24x128xf32, #tpu.memory_space<vmem>>, vector<16x32xf32>
    %cst_49 = arith.constant dense<0.000000e+00> : vector<8x32xf32>
    %108 = tpu.matmul %100, %107, %cst_49 {dimension_numbers = #tpu.dot_dimension_numbers<[1], [0], [0], [1], [0, 0, 1, 1], [], []>} : vector<8x16xf32>, vector<16x32xf32>, vector<8x32xf32> -> vector<8x32xf32>
    %109 = arith.addf %106, %108 : vector<8x32xf32>
    %c32_50 = arith.constant 32 : index
    %c16_51 = arith.constant 16 : index
    %110 = vector.load %arg22[%c32_50, %c16_51] : memref<128x24xf32, #tpu.memory_space<vmem>>, vector<32x8xf32>
    %cst_52 = arith.constant dense<0.000000e+00> : vector<8x8xf32>
    %111 = tpu.matmul %87, %110, %cst_52 {dimension_numbers = #tpu.dot_dimension_numbers<[1], [0], [0], [1], [0, 0, 1, 1], [], []>} : vector<8x32xf32>, vector<32x8xf32>, vector<8x8xf32> -> vector<8x8xf32>
    %cst_53 = arith.constant dense<0xFF800000> : vector<8xf32>
    %112 = vector.multi_reduction <maximumf>, %111, %cst_53 [1] : vector<8x8xf32> to vector<8xf32>
    %113 = vector.shape_cast %112 : vector<8xf32> to vector<8x1xf32>
    %114 = arith.maximumf %95, %113 : vector<8x1xf32>
    %115 = arith.subf %95, %114 : vector<8x1xf32>
    %116 = math.exp %115 : vector<8x1xf32>
    %117 = vector.broadcast %114 : vector<8x1xf32> to vector<8x8xf32>
    %118 = arith.subf %111, %117 : vector<8x8xf32>
    %119 = math.exp %118 : vector<8x8xf32>
    %120 = arith.mulf %116, %104 : vector<8x1xf32>
    %cst_54 = arith.constant dense<0.000000e+00> : vector<8xf32>
    %121 = vector.multi_reduction <add>, %119, %cst_54 [1] : vector<8x8xf32> to vector<8xf32>
    %122 = vector.shape_cast %121 : vector<8xf32> to vector<8x1xf32>
    %123 = arith.addf %120, %122 : vector<8x1xf32>
    %124 = vector.broadcast %116 : vector<8x1xf32> to vector<8x32xf32>
    %125 = arith.mulf %124, %109 : vector<8x32xf32>
    %c16_55 = arith.constant 16 : index
    %c32_56 = arith.constant 32 : index
    %126 = vector.load %arg23[%c16_55, %c32_56] : memref<24x128xf32, #tpu.memory_space<vmem>>, vector<8x32xf32>
    %cst_57 = arith.constant dense<0.000000e+00> : vector<8x32xf32>
    %127 = tpu.matmul %119, %126, %cst_57 {dimension_numbers = #tpu.dot_dimension_numbers<[1], [0], [0], [1], [0, 0, 1, 1], [], []>} : vector<8x8xf32>, vector<8x32xf32>, vector<8x32xf32> -> vector<8x32xf32>
    %128 = arith.addf %125, %127 : vector<8x32xf32>
    %129 = tpu.reciprocal %123 : vector<8x1xf32> -> vector<8x1xf32>
    %130 = vector.broadcast %129 : vector<8x1xf32> to vector<8x32xf32>
    %131 = arith.mulf %128, %130 : vector<8x32xf32>
    %c1 = arith.constant 1 : index
    %c0_58 = arith.constant 0 : index
    %c0_59 = arith.constant 0 : index
    %132 = vector.load %arg13[%c1, %c0_58, %c0_59] : memref<4x32x128xf32, #tpu.memory_space<vmem>>, vector<1x32x128xf32>
    %133 = vector.shape_cast %132 : vector<1x32x128xf32> to vector<32x128xf32>
    %cst_60 = arith.constant dense<0.000000e+00> : vector<8x128xf32>
    %134 = tpu.matmul %131, %133, %cst_60 {dimension_numbers = #tpu.dot_dimension_numbers<[1], [0], [0], [1], [0, 0, 1, 1], [], []>} : vector<8x32xf32>, vector<32x128xf32>, vector<8x128xf32> -> vector<8x128xf32>
    %135 = arith.addf %86, %134 : vector<8x128xf32>
    %136 = vector.extract_strided_slice %34 {offsets = [0, 64], sizes = [8, 32], strides = [1, 1]} : vector<8x128xf32> to vector<8x32xf32>
    %cst_61 = arith.constant 0xFF800000 : f32
    %137 = vector.broadcast %cst_61 : f32 to vector<8x1xf32>
    %cst_62 = arith.constant 0.000000e+00 : f32
    %138 = vector.broadcast %cst_62 : f32 to vector<8x1xf32>
    %cst_63 = arith.constant 0.000000e+00 : f32
    %139 = vector.broadcast %cst_63 : f32 to vector<8x32xf32>
    %c64 = arith.constant 64 : index
    %c0_64 = arith.constant 0 : index
    %140 = vector.load %arg22[%c64, %c0_64] : memref<128x24xf32, #tpu.memory_space<vmem>>, vector<32x16xf32>
    %cst_65 = arith.constant dense<0.000000e+00> : vector<8x16xf32>
    %141 = tpu.matmul %136, %140, %cst_65 {dimension_numbers = #tpu.dot_dimension_numbers<[1], [0], [0], [1], [0, 0, 1, 1], [], []>} : vector<8x32xf32>, vector<32x16xf32>, vector<8x16xf32> -> vector<8x16xf32>
    %cst_66 = arith.constant dense<0xFF800000> : vector<8xf32>
    %142 = vector.multi_reduction <maximumf>, %141, %cst_66 [1] : vector<8x16xf32> to vector<8xf32>
    %143 = vector.shape_cast %142 : vector<8xf32> to vector<8x1xf32>
    %144 = arith.maximumf %137, %143 : vector<8x1xf32>
    %145 = arith.subf %137, %144 : vector<8x1xf32>
    %146 = math.exp %145 : vector<8x1xf32>
    %147 = vector.broadcast %144 : vector<8x1xf32> to vector<8x16xf32>
    %148 = arith.subf %141, %147 : vector<8x16xf32>
    %149 = math.exp %148 : vector<8x16xf32>
    %150 = arith.mulf %146, %138 : vector<8x1xf32>
    %cst_67 = arith.constant dense<0.000000e+00> : vector<8xf32>
    %151 = vector.multi_reduction <add>, %149, %cst_67 [1] : vector<8x16xf32> to vector<8xf32>
    %152 = vector.shape_cast %151 : vector<8xf32> to vector<8x1xf32>
    %153 = arith.addf %150, %152 : vector<8x1xf32>
    %154 = vector.broadcast %146 : vector<8x1xf32> to vector<8x32xf32>
    %155 = arith.mulf %154, %139 : vector<8x32xf32>
    %c0_68 = arith.constant 0 : index
    %c64_69 = arith.constant 64 : index
    %156 = vector.load %arg23[%c0_68, %c64_69] : memref<24x128xf32, #tpu.memory_space<vmem>>, vector<16x32xf32>
    %cst_70 = arith.constant dense<0.000000e+00> : vector<8x32xf32>
    %157 = tpu.matmul %149, %156, %cst_70 {dimension_numbers = #tpu.dot_dimension_numbers<[1], [0], [0], [1], [0, 0, 1, 1], [], []>} : vector<8x16xf32>, vector<16x32xf32>, vector<8x32xf32> -> vector<8x32xf32>
    %158 = arith.addf %155, %157 : vector<8x32xf32>
    %c64_71 = arith.constant 64 : index
    %c16_72 = arith.constant 16 : index
    %159 = vector.load %arg22[%c64_71, %c16_72] : memref<128x24xf32, #tpu.memory_space<vmem>>, vector<32x8xf32>
    %cst_73 = arith.constant dense<0.000000e+00> : vector<8x8xf32>
    %160 = tpu.matmul %136, %159, %cst_73 {dimension_numbers = #tpu.dot_dimension_numbers<[1], [0], [0], [1], [0, 0, 1, 1], [], []>} : vector<8x32xf32>, vector<32x8xf32>, vector<8x8xf32> -> vector<8x8xf32>
    %cst_74 = arith.constant dense<0xFF800000> : vector<8xf32>
    %161 = vector.multi_reduction <maximumf>, %160, %cst_74 [1] : vector<8x8xf32> to vector<8xf32>
    %162 = vector.shape_cast %161 : vector<8xf32> to vector<8x1xf32>
    %163 = arith.maximumf %144, %162 : vector<8x1xf32>
    %164 = arith.subf %144, %163 : vector<8x1xf32>
    %165 = math.exp %164 : vector<8x1xf32>
    %166 = vector.broadcast %163 : vector<8x1xf32> to vector<8x8xf32>
    %167 = arith.subf %160, %166 : vector<8x8xf32>
    %168 = math.exp %167 : vector<8x8xf32>
    %169 = arith.mulf %165, %153 : vector<8x1xf32>
    %cst_75 = arith.constant dense<0.000000e+00> : vector<8xf32>
    %170 = vector.multi_reduction <add>, %168, %cst_75 [1] : vector<8x8xf32> to vector<8xf32>
    %171 = vector.shape_cast %170 : vector<8xf32> to vector<8x1xf32>
    %172 = arith.addf %169, %171 : vector<8x1xf32>
    %173 = vector.broadcast %165 : vector<8x1xf32> to vector<8x32xf32>
    %174 = arith.mulf %173, %158 : vector<8x32xf32>
    %c16_76 = arith.constant 16 : index
    %c64_77 = arith.constant 64 : index
    %175 = vector.load %arg23[%c16_76, %c64_77] : memref<24x128xf32, #tpu.memory_space<vmem>>, vector<8x32xf32>
    %cst_78 = arith.constant dense<0.000000e+00> : vector<8x32xf32>
    %176 = tpu.matmul %168, %175, %cst_78 {dimension_numbers = #tpu.dot_dimension_numbers<[1], [0], [0], [1], [0, 0, 1, 1], [], []>} : vector<8x8xf32>, vector<8x32xf32>, vector<8x32xf32> -> vector<8x32xf32>
    %177 = arith.addf %174, %176 : vector<8x32xf32>
    %178 = tpu.reciprocal %172 : vector<8x1xf32> -> vector<8x1xf32>
    %179 = vector.broadcast %178 : vector<8x1xf32> to vector<8x32xf32>
    %180 = arith.mulf %177, %179 : vector<8x32xf32>
    %c2 = arith.constant 2 : index
    %c0_79 = arith.constant 0 : index
    %c0_80 = arith.constant 0 : index
    %181 = vector.load %arg13[%c2, %c0_79, %c0_80] : memref<4x32x128xf32, #tpu.memory_space<vmem>>, vector<1x32x128xf32>
    %182 = vector.shape_cast %181 : vector<1x32x128xf32> to vector<32x128xf32>
    %cst_81 = arith.constant dense<0.000000e+00> : vector<8x128xf32>
    %183 = tpu.matmul %180, %182, %cst_81 {dimension_numbers = #tpu.dot_dimension_numbers<[1], [0], [0], [1], [0, 0, 1, 1], [], []>} : vector<8x32xf32>, vector<32x128xf32>, vector<8x128xf32> -> vector<8x128xf32>
    %184 = arith.addf %135, %183 : vector<8x128xf32>
    %185 = vector.extract_strided_slice %34 {offsets = [0, 96], sizes = [8, 32], strides = [1, 1]} : vector<8x128xf32> to vector<8x32xf32>
    %cst_82 = arith.constant 0xFF800000 : f32
    %186 = vector.broadcast %cst_82 : f32 to vector<8x1xf32>
    %cst_83 = arith.constant 0.000000e+00 : f32
    %187 = vector.broadcast %cst_83 : f32 to vector<8x1xf32>
    %cst_84 = arith.constant 0.000000e+00 : f32
    %188 = vector.broadcast %cst_84 : f32 to vector<8x32xf32>
    %c96 = arith.constant 96 : index
    %c0_85 = arith.constant 0 : index
    %189 = vector.load %arg22[%c96, %c0_85] : memref<128x24xf32, #tpu.memory_space<vmem>>, vector<32x16xf32>
    %cst_86 = arith.constant dense<0.000000e+00> : vector<8x16xf32>
    %190 = tpu.matmul %185, %189, %cst_86 {dimension_numbers = #tpu.dot_dimension_numbers<[1], [0], [0], [1], [0, 0, 1, 1], [], []>} : vector<8x32xf32>, vector<32x16xf32>, vector<8x16xf32> -> vector<8x16xf32>
    %cst_87 = arith.constant dense<0xFF800000> : vector<8xf32>
    %191 = vector.multi_reduction <maximumf>, %190, %cst_87 [1] : vector<8x16xf32> to vector<8xf32>
    %192 = vector.shape_cast %191 : vector<8xf32> to vector<8x1xf32>
    %193 = arith.maximumf %186, %192 : vector<8x1xf32>
    %194 = arith.subf %186, %193 : vector<8x1xf32>
    %195 = math.exp %194 : vector<8x1xf32>
    %196 = vector.broadcast %193 : vector<8x1xf32> to vector<8x16xf32>
    %197 = arith.subf %190, %196 : vector<8x16xf32>
    %198 = math.exp %197 : vector<8x16xf32>
    %199 = arith.mulf %195, %187 : vector<8x1xf32>
    %cst_88 = arith.constant dense<0.000000e+00> : vector<8xf32>
    %200 = vector.multi_reduction <add>, %198, %cst_88 [1] : vector<8x16xf32> to vector<8xf32>
    %201 = vector.shape_cast %200 : vector<8xf32> to vector<8x1xf32>
    %202 = arith.addf %199, %201 : vector<8x1xf32>
    %203 = vector.broadcast %195 : vector<8x1xf32> to vector<8x32xf32>
    %204 = arith.mulf %203, %188 : vector<8x32xf32>
    %c0_89 = arith.constant 0 : index
    %c96_90 = arith.constant 96 : index
    %205 = vector.load %arg23[%c0_89, %c96_90] : memref<24x128xf32, #tpu.memory_space<vmem>>, vector<16x32xf32>
    %cst_91 = arith.constant dense<0.000000e+00> : vector<8x32xf32>
    %206 = tpu.matmul %198, %205, %cst_91 {dimension_numbers = #tpu.dot_dimension_numbers<[1], [0], [0], [1], [0, 0, 1, 1], [], []>} : vector<8x16xf32>, vector<16x32xf32>, vector<8x32xf32> -> vector<8x32xf32>
    %207 = arith.addf %204, %206 : vector<8x32xf32>
    %c96_92 = arith.constant 96 : index
    %c16_93 = arith.constant 16 : index
    %208 = vector.load %arg22[%c96_92, %c16_93] : memref<128x24xf32, #tpu.memory_space<vmem>>, vector<32x8xf32>
    %cst_94 = arith.constant dense<0.000000e+00> : vector<8x8xf32>
    %209 = tpu.matmul %185, %208, %cst_94 {dimension_numbers = #tpu.dot_dimension_numbers<[1], [0], [0], [1], [0, 0, 1, 1], [], []>} : vector<8x32xf32>, vector<32x8xf32>, vector<8x8xf32> -> vector<8x8xf32>
    %cst_95 = arith.constant dense<0xFF800000> : vector<8xf32>
    %210 = vector.multi_reduction <maximumf>, %209, %cst_95 [1] : vector<8x8xf32> to vector<8xf32>
    %211 = vector.shape_cast %210 : vector<8xf32> to vector<8x1xf32>
    %212 = arith.maximumf %193, %211 : vector<8x1xf32>
    %213 = arith.subf %193, %212 : vector<8x1xf32>
    %214 = math.exp %213 : vector<8x1xf32>
    %215 = vector.broadcast %212 : vector<8x1xf32> to vector<8x8xf32>
    %216 = arith.subf %209, %215 : vector<8x8xf32>
    %217 = math.exp %216 : vector<8x8xf32>
    %218 = arith.mulf %214, %202 : vector<8x1xf32>
    %cst_96 = arith.constant dense<0.000000e+00> : vector<8xf32>
    %219 = vector.multi_reduction <add>, %217, %cst_96 [1] : vector<8x8xf32> to vector<8xf32>
    %220 = vector.shape_cast %219 : vector<8xf32> to vector<8x1xf32>
    %221 = arith.addf %218, %220 : vector<8x1xf32>
    %222 = vector.broadcast %214 : vector<8x1xf32> to vector<8x32xf32>
    %223 = arith.mulf %222, %207 : vector<8x32xf32>
    %c16_97 = arith.constant 16 : index
    %c96_98 = arith.constant 96 : index
    %224 = vector.load %arg23[%c16_97, %c96_98] : memref<24x128xf32, #tpu.memory_space<vmem>>, vector<8x32xf32>
    %cst_99 = arith.constant dense<0.000000e+00> : vector<8x32xf32>
    %225 = tpu.matmul %217, %224, %cst_99 {dimension_numbers = #tpu.dot_dimension_numbers<[1], [0], [0], [1], [0, 0, 1, 1], [], []>} : vector<8x8xf32>, vector<8x32xf32>, vector<8x32xf32> -> vector<8x32xf32>
    %226 = arith.addf %223, %225 : vector<8x32xf32>
    %227 = tpu.reciprocal %221 : vector<8x1xf32> -> vector<8x1xf32>
    %228 = vector.broadcast %227 : vector<8x1xf32> to vector<8x32xf32>
    %229 = arith.mulf %226, %228 : vector<8x32xf32>
    %c3 = arith.constant 3 : index
    %c0_100 = arith.constant 0 : index
    %c0_101 = arith.constant 0 : index
    %230 = vector.load %arg13[%c3, %c0_100, %c0_101] : memref<4x32x128xf32, #tpu.memory_space<vmem>>, vector<1x32x128xf32>
    %231 = vector.shape_cast %230 : vector<1x32x128xf32> to vector<32x128xf32>
    %cst_102 = arith.constant dense<0.000000e+00> : vector<8x128xf32>
    %232 = tpu.matmul %229, %231, %cst_102 {dimension_numbers = #tpu.dot_dimension_numbers<[1], [0], [0], [1], [0, 0, 1, 1], [], []>} : vector<8x32xf32>, vector<32x128xf32>, vector<8x128xf32> -> vector<8x128xf32>
    %233 = arith.addf %184, %232 : vector<8x128xf32>
    %c0_103 = arith.constant 0 : index
    %c0_104 = arith.constant 0 : index
    %234 = vector.load %arg15[%c0_103, %c0_104] : memref<1x128xf32, #tpu.memory_space<vmem>>, vector<1x128xf32>
    %c0_105 = arith.constant 0 : index
    %c0_106 = arith.constant 0 : index
    %235 = vector.load %arg16[%c0_105, %c0_106] : memref<1x128xf32, #tpu.memory_space<vmem>>, vector<1x128xf32>
    %cst_107 = arith.constant dense<0.000000e+00> : vector<8xf32>
    %236 = vector.multi_reduction <add>, %233, %cst_107 [1] : vector<8x128xf32> to vector<8xf32>
    %237 = vector.shape_cast %236 : vector<8xf32> to vector<8x1xf32>
    %cst_108 = arith.constant 1.280000e+02 : f32
    %238 = vector.broadcast %cst_108 : f32 to vector<8x1xf32>
    %239 = arith.divf %237, %238 : vector<8x1xf32>
    %240 = vector.broadcast %239 : vector<8x1xf32> to vector<8x128xf32>
    %241 = arith.subf %233, %240 : vector<8x128xf32>
    %242 = arith.mulf %241, %241 : vector<8x128xf32>
    %cst_109 = arith.constant dense<0.000000e+00> : vector<8xf32>
    %243 = vector.multi_reduction <add>, %242, %cst_109 [1] : vector<8x128xf32> to vector<8xf32>
    %244 = vector.shape_cast %243 : vector<8xf32> to vector<8x1xf32>
    %cst_110 = arith.constant 0.00787401571 : f32
    %245 = vector.broadcast %cst_110 : f32 to vector<8x1xf32>
    %246 = arith.mulf %244, %245 : vector<8x1xf32>
    %247 = math.sqrt %246 : vector<8x1xf32>
    %cst_111 = arith.constant 9.99999997E-7 : f32
    %248 = vector.broadcast %cst_111 : f32 to vector<8x1xf32>
    %249 = arith.addf %247, %248 : vector<8x1xf32>
    %250 = tpu.reciprocal %249 : vector<8x1xf32> -> vector<8x1xf32>
    %251 = vector.broadcast %239 : vector<8x1xf32> to vector<8x128xf32>
    %252 = arith.subf %233, %251 : vector<8x128xf32>
    %253 = vector.broadcast %234 : vector<1x128xf32> to vector<8x128xf32>
    %254 = arith.mulf %253, %252 : vector<8x128xf32>
    %255 = vector.broadcast %250 : vector<8x1xf32> to vector<8x128xf32>
    %256 = arith.mulf %254, %255 : vector<8x128xf32>
    %257 = vector.broadcast %235 : vector<1x128xf32> to vector<8x128xf32>
    %258 = arith.addf %256, %257 : vector<8x128xf32>
    %c0_112 = arith.constant 0 : index
    %c0_113 = arith.constant 0 : index
    %259 = vector.load %arg17[%c0_112, %c0_113] : memref<128x256xf32, #tpu.memory_space<vmem>>, vector<128x256xf32>
    %cst_114 = arith.constant dense<0.000000e+00> : vector<8x256xf32>
    %260 = tpu.matmul %258, %259, %cst_114 {dimension_numbers = #tpu.dot_dimension_numbers<[1], [0], [0], [1], [0, 0, 1, 1], [], []>} : vector<8x128xf32>, vector<128x256xf32>, vector<8x256xf32> -> vector<8x256xf32>
    %c0_115 = arith.constant 0 : index
    %c0_116 = arith.constant 0 : index
    %261 = vector.load %arg18[%c0_115, %c0_116] : memref<1x256xf32, #tpu.memory_space<vmem>>, vector<1x256xf32>
    %262 = vector.broadcast %261 : vector<1x256xf32> to vector<8x256xf32>
    %263 = arith.addf %260, %262 : vector<8x256xf32>
    %cst_117 = arith.constant 0.000000e+00 : f32
    %264 = vector.broadcast %cst_117 : f32 to vector<8x256xf32>
    %265 = arith.maximumf %263, %264 : vector<8x256xf32>
    %c0_118 = arith.constant 0 : index
    %c0_119 = arith.constant 0 : index
    %266 = vector.load %arg19[%c0_118, %c0_119] : memref<256x128xf32, #tpu.memory_space<vmem>>, vector<256x128xf32>
    %cst_120 = arith.constant dense<0.000000e+00> : vector<8x128xf32>
    %267 = tpu.matmul %265, %266, %cst_120 {dimension_numbers = #tpu.dot_dimension_numbers<[1], [0], [0], [1], [0, 0, 1, 1], [], []>} : vector<8x256xf32>, vector<256x128xf32>, vector<8x128xf32> -> vector<8x128xf32>
    %c0_121 = arith.constant 0 : index
    %c0_122 = arith.constant 0 : index
    %268 = vector.load %arg20[%c0_121, %c0_122] : memref<1x128xf32, #tpu.memory_space<vmem>>, vector<1x128xf32>
    %269 = vector.broadcast %268 : vector<1x128xf32> to vector<8x128xf32>
    %270 = arith.addf %267, %269 : vector<8x128xf32>
    %271 = arith.addf %233, %270 : vector<8x128xf32>
    %c0_123 = arith.constant 0 : index
    %c0_124 = arith.constant 0 : index
    %c0_125 = arith.constant 0 : index
    %272 = vector.load %arg21[%c0_123, %c0_124, %c0_125] : memref<1x8x128xf32, #tpu.memory_space<vmem>>, vector<1x8x128xf32>
    %273 = vector.shape_cast %272 : vector<1x8x128xf32> to vector<8x128xf32>
    %274 = vector.shape_cast %271 : vector<8x128xf32> to vector<1x8x128xf32>
    tpu.vector_store %arg21[%c0_123, %c0_124, %c0_125], %274 {strides = array<i32>} : memref<1x8x128xf32, #tpu.memory_space<vmem>>, vector<1x8x128xf32>,
    return
  }
  func.func @transform_0(%arg0: i32, %arg1: i32) -> (i32, i32, i32) {
    %c0_i32 = arith.constant 0 : i32
    %c0_i32_0 = arith.constant 0 : i32
    return %arg0, %arg1, %c0_i32 : i32, i32, i32
  }
  func.func @transform_1(%arg0: i32, %arg1: i32) -> (i32, i32, i32) {
    %c0_i32 = arith.constant 0 : i32
    %c0_i32_0 = arith.constant 0 : i32
    %c0_i32_1 = arith.constant 0 : i32
    return %arg0, %c0_i32, %c0_i32_0 : i32, i32, i32
  }
  func.func @transform_2(%arg0: i32, %arg1: i32) -> (i32, i32, i32) {
    %c0_i32 = arith.constant 0 : i32
    %c0_i32_0 = arith.constant 0 : i32
    %c0_i32_1 = arith.constant 0 : i32
    return %arg0, %c0_i32, %c0_i32_0 : i32, i32, i32
  }
  func.func @transform_3(%arg0: i32, %arg1: i32) -> (i32, i32) {
    %c0_i32 = arith.constant 0 : i32
    %c0_i32_0 = arith.constant 0 : i32
    %c0_i32_1 = arith.constant 0 : i32
    return %c0_i32, %c0_i32_0 : i32, i32
  }
  func.func @transform_4(%arg0: i32, %arg1: i32) -> (i32, i32) {
    %c0_i32 = arith.constant 0 : i32
    %c0_i32_0 = arith.constant 0 : i32
    %c0_i32_1 = arith.constant 0 : i32
    return %c0_i32, %c0_i32_0 : i32, i32
  }
  func.func @transform_5(%arg0: i32, %arg1: i32) -> (i32, i32) {
    %c0_i32 = arith.constant 0 : i32
    %c0_i32_0 = arith.constant 0 : i32
    %c0_i32_1 = arith.constant 0 : i32
    return %c0_i32, %c0_i32_0 : i32, i32
  }
  func.func @transform_6(%arg0: i32, %arg1: i32) -> (i32, i32) {
    %c0_i32 = arith.constant 0 : i32
    %c0_i32_0 = arith.constant 0 : i32
    %c0_i32_1 = arith.constant 0 : i32
    return %c0_i32, %c0_i32_0 : i32, i32
  }
  func.func @transform_7(%arg0: i32, %arg1: i32) -> (i32, i32) {
    %c0_i32 = arith.constant 0 : i32
    %c0_i32_0 = arith.constant 0 : i32
    %c0_i32_1 = arith.constant 0 : i32
    return %c0_i32, %c0_i32_0 : i32, i32
  }
  func.func @transform_8(%arg0: i32, %arg1: i32) -> (i32, i32) {
    %c0_i32 = arith.constant 0 : i32
    %c0_i32_0 = arith.constant 0 : i32
    %c0_i32_1 = arith.constant 0 : i32
    return %c0_i32, %c0_i32_0 : i32, i32
  }
  func.func @transform_9(%arg0: i32, %arg1: i32) -> (i32, i32) {
    %c0_i32 = arith.constant 0 : i32
    %c0_i32_0 = arith.constant 0 : i32
    %c0_i32_1 = arith.constant 0 : i32
    return %c0_i32, %c0_i32_0 : i32, i32
  }
  func.func @transform_10(%arg0: i32, %arg1: i32) -> (i32, i32) {
    %c0_i32 = arith.constant 0 : i32
    %c0_i32_0 = arith.constant 0 : i32
    %c0_i32_1 = arith.constant 0 : i32
    return %c0_i32, %c0_i32_0 : i32, i32
  }
  func.func @transform_11(%arg0: i32, %arg1: i32) -> (i32, i32, i32) {
    %c0_i32 = arith.constant 0 : i32
    %c0_i32_0 = arith.constant 0 : i32
    %c0_i32_1 = arith.constant 0 : i32
    %c0_i32_2 = arith.constant 0 : i32
    return %c0_i32, %c0_i32_0, %c0_i32_1 : i32, i32, i32
  }
  func.func @transform_12(%arg0: i32, %arg1: i32) -> (i32, i32) {
    %c0_i32 = arith.constant 0 : i32
    %c0_i32_0 = arith.constant 0 : i32
    %c0_i32_1 = arith.constant 0 : i32
    return %c0_i32, %c0_i32_0 : i32, i32
  }
  func.func @transform_13(%arg0: i32, %arg1: i32) -> (i32, i32) {
    %c0_i32 = arith.constant 0 : i32
    %c0_i32_0 = arith.constant 0 : i32
    %c0_i32_1 = arith.constant 0 : i32
    return %c0_i32, %c0_i32_0 : i32, i32
  }
  func.func @transform_14(%arg0: i32, %arg1: i32) -> (i32, i32) {
    %c0_i32 = arith.constant 0 : i32
    %c0_i32_0 = arith.constant 0 : i32
    %c0_i32_1 = arith.constant 0 : i32
    return %c0_i32, %c0_i32_0 : i32, i32
  }
  func.func @transform_15(%arg0: i32, %arg1: i32) -> (i32, i32) {
    %c0_i32 = arith.constant 0 : i32
    %c0_i32_0 = arith.constant 0 : i32
    %c0_i32_1 = arith.constant 0 : i32
    return %c0_i32, %c0_i32_0 : i32, i32
  }
  func.func @transform_16(%arg0: i32, %arg1: i32) -> (i32, i32) {
    %c0_i32 = arith.constant 0 : i32
    %c0_i32_0 = arith.constant 0 : i32
    %c0_i32_1 = arith.constant 0 : i32
    return %c0_i32, %c0_i32_0 : i32, i32
  }
  func.func @transform_17(%arg0: i32, %arg1: i32) -> (i32, i32) {
    %c0_i32 = arith.constant 0 : i32
    %c0_i32_0 = arith.constant 0 : i32
    %c0_i32_1 = arith.constant 0 : i32
    return %c0_i32, %c0_i32_0 : i32, i32
  }
  func.func @transform_18(%arg0: i32, %arg1: i32) -> (i32, i32) {
    %c0_i32 = arith.constant 0 : i32
    %c0_i32_0 = arith.constant 0 : i32
    %c0_i32_1 = arith.constant 0 : i32
    return %c0_i32, %c0_i32_0 : i32, i32
  }
  func.func @transform_19(%arg0: i32, %arg1: i32) -> (i32, i32, i32) {
    %c0_i32 = arith.constant 0 : i32
    %c0_i32_0 = arith.constant 0 : i32
    return %arg0, %arg1, %c0_i32 : i32, i32, i32
  }
}

module attributes {stable_mosaic.version = 11 : i64} {
  func.func @attn_block_kernel(%arg0: i32, %arg1: i32, %arg2: memref<1x8x128xf32, #tpu.memory_space<vmem>>, %arg3: memref<1x24x128xf32, #tpu.memory_space<vmem>>, %arg4: memref<1x128x24xf32, #tpu.memory_space<vmem>>, %arg5: memref<1x128xf32, #tpu.memory_space<vmem>>, %arg6: memref<1x128xf32, #tpu.memory_space<vmem>>, %arg7: memref<128x128xf32, #tpu.memory_space<vmem>>, %arg8: memref<1x128xf32, #tpu.memory_space<vmem>>, %arg9: memref<128x128xf32, #tpu.memory_space<vmem>>, %arg10: memref<128x1xf32, #tpu.memory_space<vmem>>, %arg11: memref<128x128xf32, #tpu.memory_space<vmem>>, %arg12: memref<1x128xf32, #tpu.memory_space<vmem>>, %arg13: memref<4x32x128xf32, #tpu.memory_space<vmem>>, %arg14: memref<1x128xf32, #tpu.memory_space<vmem>>, %arg15: memref<1x128xf32, #tpu.memory_space<vmem>>, %arg16: memref<1x128xf32, #tpu.memory_space<vmem>>, %arg17: memref<128x256xf32, #tpu.memory_space<vmem>>, %arg18: memref<1x256xf32, #tpu.memory_space<vmem>>, %arg19: memref<256x128xf32, #tpu.memory_space<vmem>>, %arg20: memref<1x128xf32, #tpu.memory_space<vmem>>, %arg21: memref<1x8x128xf32, #tpu.memory_space<vmem>>, %arg22: memref<128x24xf32, #tpu.memory_space<vmem>>, %arg23: memref<24x128xf32, #tpu.memory_space<vmem>>) attributes {dimension_semantics = [#tpu.dimension_semantics<parallel>, #tpu.dimension_semantics<arbitrary>], iteration_bounds = array<i64: 2, 2>, scalar_prefetch = 0 : i64, scratch_operands = 2 : i64, tpu.core_type = #tpu.core_type<tc>, window_params = [{transform_indices = @transform_0, window_bounds = array<i64: 1, 8, 128>}, {transform_indices = @transform_1, window_bounds = array<i64: 1, 24, 128>}, {transform_indices = @transform_2, window_bounds = array<i64: 1, 128, 24>}, {pipeline_mode = #tpu.pipeline_mode<synchronous>, transform_indices = @transform_3, window_bounds = array<i64: 1, 128>}, {pipeline_mode = #tpu.pipeline_mode<synchronous>, transform_indices = @transform_4, window_bounds = array<i64: 1, 128>}, {pipeline_mode = #tpu.pipeline_mode<synchronous>, transform_indices = @transform_5, window_bounds = array<i64: 128, 128>}, {pipeline_mode = #tpu.pipeline_mode<synchronous>, transform_indices = @transform_6, window_bounds = array<i64: 1, 128>}, {pipeline_mode = #tpu.pipeline_mode<synchronous>, transform_indices = @transform_7, window_bounds = array<i64: 128, 128>}, {pipeline_mode = #tpu.pipeline_mode<synchronous>, transform_indices = @transform_8, window_bounds = array<i64: 128, 1>}, {pipeline_mode = #tpu.pipeline_mode<synchronous>, transform_indices = @transform_9, window_bounds = array<i64: 128, 128>}, {pipeline_mode = #tpu.pipeline_mode<synchronous>, transform_indices = @transform_10, window_bounds = array<i64: 1, 128>}, {pipeline_mode = #tpu.pipeline_mode<synchronous>, transform_indices = @transform_11, window_bounds = array<i64: 4, 32, 128>}, {pipeline_mode = #tpu.pipeline_mode<synchronous>, transform_indices = @transform_12, window_bounds = array<i64: 1, 128>}, {pipeline_mode = #tpu.pipeline_mode<synchronous>, transform_indices = @transform_13, window_bounds = array<i64: 1, 128>}, {pipeline_mode = #tpu.pipeline_mode<synchronous>, transform_indices = @transform_14, window_bounds = array<i64: 1, 128>}, {pipeline_mode = #tpu.pipeline_mode<synchronous>, transform_indices = @transform_15, window_bounds = array<i64: 128, 256>}, {pipeline_mode = #tpu.pipeline_mode<synchronous>, transform_indices = @transform_16, window_bounds = array<i64: 1, 256>}, {pipeline_mode = #tpu.pipeline_mode<synchronous>, transform_indices = @transform_17, window_bounds = array<i64: 256, 128>}, {pipeline_mode = #tpu.pipeline_mode<synchronous>, transform_indices = @transform_18, window_bounds = array<i64: 1, 128>}, {transform_indices = @transform_19, window_bounds = array<i64: 1, 8, 128>}]} {
    %c0_i32 = arith.constant 0 : i32
    %0 = arith.cmpi eq, %arg1, %c0_i32 : i32
    %1 = arith.extui %0 : i1 to i32
    %c0_i32_0 = arith.constant 0 : i32
    %2 = arith.cmpi ne, %1, %c0_i32_0 : i32
    scf.if %2 {
      %c0_126 = arith.constant 0 : index
      %c0_127 = arith.constant 0 : index
      %275 = vector.load %arg9[%c0_126, %c0_127] : memref<128x128xf32, #tpu.memory_space<vmem>>, vector<128x128xf32>
      %c0_128 = arith.constant 0 : index
      %c0_129 = arith.constant 0 : index
      %c0_130 = arith.constant 0 : index
      %276 = vector.load %arg4[%c0_128, %c0_129, %c0_130] : memref<1x128x24xf32, #tpu.memory_space<vmem>>, vector<1x128x24xf32>
      %277 = vector.shape_cast %276 : vector<1x128x24xf32> to vector<128x24xf32>
      %cst_131 = arith.constant dense<0.000000e+00> : vector<128x24xf32>
      %278 = tpu.matmul %275, %277, %cst_131 {dimension_numbers = #tpu.dot_dimension_numbers<[1], [0], [0], [1], [0, 0, 1, 1], [], []>} : vector<128x128xf32>, vector<128x24xf32>, vector<128x24xf32> -> vector<128x24xf32>
      %c0_132 = arith.constant 0 : index
      %c0_133 = arith.constant 0 : index
      %279 = vector.load %arg10[%c0_132, %c0_133] : memref<128x1xf32, #tpu.memory_space<vmem>>, vector<128x1xf32>
      %280 = vector.broadcast %279 : vector<128x1xf32> to vector<128x24xf32>
      %281 = arith.addf %278, %280 : vector<128x24xf32>
      %c0_134 = arith.constant 0 : index
      %c0_135 = arith.constant 0 : index
      %282 = vector.load %arg22[%c0_134, %c0_135] : memref<128x24xf32, #tpu.memory_space<vmem>>, vector<128x24xf32>
      tpu.vector_store %arg22[%c0_134, %c0_135], %281 {strides = array<i32>} : memref<128x24xf32, #tpu.memory_space<vmem>>, vector<128x24xf32>,
      %c0_136 = arith.constant 0 : index
      %c0_137 = arith.constant 0 : index
      %c0_138 = arith.constant 0 : index
      %283 = vector.load %arg3[%c0_136, %c0_137, %c0_138] : memref<1x24x128xf32, #tpu.memory_space<vmem>>, vector<1x24x128xf32>
      %284 = vector.shape_cast %283 : vector<1x24x128xf32> to vector<24x128xf32>
      %c0_139 = arith.constant 0 : index
      %c0_140 = arith.constant 0 : index
      %285 = vector.load %arg11[%c0_139, %c0_140] : memref<128x128xf32, #tpu.memory_space<vmem>>, vector<128x128xf32>
      %cst_141 = arith.constant dense<0.000000e+00> : vector<24x128xf32>
      %286 = tpu.matmul %284, %285, %cst_141 {dimension_numbers = #tpu.dot_dimension_numbers<[1], [0], [0], [1], [0, 0, 1, 1], [], []>} : vector<24x128xf32>, vector<128x128xf32>, vector<24x128xf32> -> vector<24x128xf32>
      %c0_142 = arith.constant 0 : index
      %c0_143 = arith.constant 0 : index
      %287 = vector.load %arg12[%c0_142, %c0_143] : memref<1x128xf32, #tpu.memory_space<vmem>>, vector<1x128xf32>
      %288 = vector.broadcast %287 : vector<1x128xf32> to vector<24x128xf32>
      %289 = arith.addf %286, %288 : vector<24x128xf32>
      %c0_144 = arith.constant 0 : index
      %c0_145 = arith.constant 0 : index
      %290 = vector.load %arg23[%c0_144, %c0_145] : memref<24x128xf32, #tpu.memory_space<vmem>>, vector<24x128xf32>
      tpu.vector_store %arg23[%c0_144, %c0_145], %289 {strides = array<i32>} : memref<24x128xf32, #tpu.memory_space<vmem>>, vector<24x128xf32>,
    } else {
    }
    %c0 = arith.constant 0 : index
    %c0_1 = arith.constant 0 : index
    %c0_2 = arith.constant 0 : index
    %3 = vector.load %arg2[%c0, %c0_1, %c0_2] : memref<1x8x128xf32, #tpu.memory_space<vmem>>, vector<1x8x128xf32>
    %4 = vector.shape_cast %3 : vector<1x8x128xf32> to vector<8x128xf32>
    %c0_3 = arith.constant 0 : index
    %c0_4 = arith.constant 0 : index
    %5 = vector.load %arg5[%c0_3, %c0_4] : memref<1x128xf32, #tpu.memory_space<vmem>>, vector<1x128xf32>
    %c0_5 = arith.constant 0 : index
    %c0_6 = arith.constant 0 : index
    %6 = vector.load %arg6[%c0_5, %c0_6] : memref<1x128xf32, #tpu.memory_space<vmem>>, vector<1x128xf32>
    %cst = arith.constant dense<0.000000e+00> : vector<8xf32>
    %7 = vector.multi_reduction <add>, %4, %cst [1] : vector<8x128xf32> to vector<8xf32>
    %8 = vector.shape_cast %7 : vector<8xf32> to vector<8x1xf32>
    %cst_7 = arith.constant 1.280000e+02 : f32
    %9 = vector.broadcast %cst_7 : f32 to vector<8x1xf32>
    %10 = arith.divf %8, %9 : vector<8x1xf32>
    %11 = vector.broadcast %10 : vector<8x1xf32> to vector<8x128xf32>
    %12 = arith.subf %4, %11 : vector<8x128xf32>
    %13 = arith.mulf %12, %12 : vector<8x128xf32>
    %cst_8 = arith.constant dense<0.000000e+00> : vector<8xf32>
    %14 = vector.multi_reduction <add>, %13, %cst_8 [1] : vector<8x128xf32> to vector<8xf32>
    %15 = vector.shape_cast %14 : vector<8xf32> to vector<8x1xf32>
    %cst_9 = arith.constant 0.00787401571 : f32
    %16 = vector.broadcast %cst_9 : f32 to vector<8x1xf32>
    %17 = arith.mulf %15, %16 : vector<8x1xf32>
    %18 = math.sqrt %17 : vector<8x1xf32>
    %cst_10 = arith.constant 9.99999997E-7 : f32
    %19 = vector.broadcast %cst_10 : f32 to vector<8x1xf32>
    %20 = arith.addf %18, %19 : vector<8x1xf32>
    %21 = tpu.reciprocal %20 : vector<8x1xf32> -> vector<8x1xf32>
    %22 = vector.broadcast %10 : vector<8x1xf32> to vector<8x128xf32>
    %23 = arith.subf %4, %22 : vector<8x128xf32>
    %24 = vector.broadcast %5 : vector<1x128xf32> to vector<8x128xf32>
    %25 = arith.mulf %24, %23 : vector<8x128xf32>
    %26 = vector.broadcast %21 : vector<8x1xf32> to vector<8x128xf32>
    %27 = arith.mulf %25, %26 : vector<8x128xf32>
    %28 = vector.broadcast %6 : vector<1x128xf32> to vector<8x128xf32>
    %29 = arith.addf %27, %28 : vector<8x128xf32>
    %c0_11 = arith.constant 0 : index
    %c0_12 = arith.constant 0 : index
    %30 = vector.load %arg7[%c0_11, %c0_12] : memref<128x128xf32, #tpu.memory_space<vmem>>, vector<128x128xf32>
    %cst_13 = arith.constant dense<0.000000e+00> : vector<8x128xf32>
    %31 = tpu.matmul %29, %30, %cst_13 {dimension_numbers = #tpu.dot_dimension_numbers<[1], [0], [0], [1], [0, 0, 1, 1], [], []>} : vector<8x128xf32>, vector<128x128xf32>, vector<8x128xf32> -> vector<8x128xf32>
    %c0_14 = arith.constant 0 : index
    %c0_15 = arith.constant 0 : index
    %32 = vector.load %arg8[%c0_14, %c0_15] : memref<1x128xf32, #tpu.memory_space<vmem>>, vector<1x128xf32>
    %33 = vector.broadcast %32 : vector<1x128xf32> to vector<8x128xf32>
    %34 = arith.addf %31, %33 : vector<8x128xf32>
    %c0_16 = arith.constant 0 : index
    %c0_17 = arith.constant 0 : index
    %35 = vector.load %arg14[%c0_16, %c0_17] : memref<1x128xf32, #tpu.memory_space<vmem>>, vector<1x128xf32>
    %36 = vector.broadcast %35 : vector<1x128xf32> to vector<8x128xf32>
    %37 = arith.addf %4, %36 : vector<8x128xf32>
    %38 = vector.extract_strided_slice %34 {offsets = [0, 0], sizes = [8, 32], strides = [1, 1]} : vector<8x128xf32> to vector<8x32xf32>
    %cst_18 = arith.constant 0xFF800000 : f32
    %39 = vector.broadcast %cst_18 : f32 to vector<8x1xf32>
    %cst_19 = arith.constant 0.000000e+00 : f32
    %40 = vector.broadcast %cst_19 : f32 to vector<8x1xf32>
    %cst_20 = arith.constant 0.000000e+00 : f32
    %41 = vector.broadcast %cst_20 : f32 to vector<8x32xf32>
    %c0_21 = arith.constant 0 : index
    %c0_22 = arith.constant 0 : index
    %42 = vector.load %arg22[%c0_21, %c0_22] : memref<128x24xf32, #tpu.memory_space<vmem>>, vector<32x16xf32>
    %cst_23 = arith.constant dense<0.000000e+00> : vector<8x16xf32>
    %43 = tpu.matmul %38, %42, %cst_23 {dimension_numbers = #tpu.dot_dimension_numbers<[1], [0], [0], [1], [0, 0, 1, 1], [], []>} : vector<8x32xf32>, vector<32x16xf32>, vector<8x16xf32> -> vector<8x16xf32>
    %cst_24 = arith.constant dense<0xFF800000> : vector<8xf32>
    %44 = vector.multi_reduction <maximumf>, %43, %cst_24 [1] : vector<8x16xf32> to vector<8xf32>
    %45 = vector.shape_cast %44 : vector<8xf32> to vector<8x1xf32>
    %46 = arith.maximumf %39, %45 : vector<8x1xf32>
    %47 = arith.subf %39, %46 : vector<8x1xf32>
    %48 = math.exp %47 : vector<8x1xf32>
    %49 = vector.broadcast %46 : vector<8x1xf32> to vector<8x16xf32>
    %50 = arith.subf %43, %49 : vector<8x16xf32>
    %51 = math.exp %50 : vector<8x16xf32>
    %52 = arith.mulf %48, %40 : vector<8x1xf32>
    %cst_25 = arith.constant dense<0.000000e+00> : vector<8xf32>
    %53 = vector.multi_reduction <add>, %51, %cst_25 [1] : vector<8x16xf32> to vector<8xf32>
    %54 = vector.shape_cast %53 : vector<8xf32> to vector<8x1xf32>
    %55 = arith.addf %52, %54 : vector<8x1xf32>
    %56 = vector.broadcast %48 : vector<8x1xf32> to vector<8x32xf32>
    %57 = arith.mulf %56, %41 : vector<8x32xf32>
    %c0_26 = arith.constant 0 : index
    %c0_27 = arith.constant 0 : index
    %58 = vector.load %arg23[%c0_26, %c0_27] : memref<24x128xf32, #tpu.memory_space<vmem>>, vector<16x32xf32>
    %cst_28 = arith.constant dense<0.000000e+00> : vector<8x32xf32>
    %59 = tpu.matmul %51, %58, %cst_28 {dimension_numbers = #tpu.dot_dimension_numbers<[1], [0], [0], [1], [0, 0, 1, 1], [], []>} : vector<8x16xf32>, vector<16x32xf32>, vector<8x32xf32> -> vector<8x32xf32>
    %60 = arith.addf %57, %59 : vector<8x32xf32>
    %c0_29 = arith.constant 0 : index
    %c16 = arith.constant 16 : index
    %61 = vector.load %arg22[%c0_29, %c16] : memref<128x24xf32, #tpu.memory_space<vmem>>, vector<32x8xf32>
    %cst_30 = arith.constant dense<0.000000e+00> : vector<8x8xf32>
    %62 = tpu.matmul %38, %61, %cst_30 {dimension_numbers = #tpu.dot_dimension_numbers<[1], [0], [0], [1], [0, 0, 1, 1], [], []>} : vector<8x32xf32>, vector<32x8xf32>, vector<8x8xf32> -> vector<8x8xf32>
    %cst_31 = arith.constant dense<0xFF800000> : vector<8xf32>
    %63 = vector.multi_reduction <maximumf>, %62, %cst_31 [1] : vector<8x8xf32> to vector<8xf32>
    %64 = vector.shape_cast %63 : vector<8xf32> to vector<8x1xf32>
    %65 = arith.maximumf %46, %64 : vector<8x1xf32>
    %66 = arith.subf %46, %65 : vector<8x1xf32>
    %67 = math.exp %66 : vector<8x1xf32>
    %68 = vector.broadcast %65 : vector<8x1xf32> to vector<8x8xf32>
    %69 = arith.subf %62, %68 : vector<8x8xf32>
    %70 = math.exp %69 : vector<8x8xf32>
    %71 = arith.mulf %67, %55 : vector<8x1xf32>
    %cst_32 = arith.constant dense<0.000000e+00> : vector<8xf32>
    %72 = vector.multi_reduction <add>, %70, %cst_32 [1] : vector<8x8xf32> to vector<8xf32>
    %73 = vector.shape_cast %72 : vector<8xf32> to vector<8x1xf32>
    %74 = arith.addf %71, %73 : vector<8x1xf32>
    %75 = vector.broadcast %67 : vector<8x1xf32> to vector<8x32xf32>
    %76 = arith.mulf %75, %60 : vector<8x32xf32>
    %c16_33 = arith.constant 16 : index
    %c0_34 = arith.constant 0 : index
    %77 = vector.load %arg23[%c16_33, %c0_34] : memref<24x128xf32, #tpu.memory_space<vmem>>, vector<8x32xf32>
    %cst_35 = arith.constant dense<0.000000e+00> : vector<8x32xf32>
    %78 = tpu.matmul %70, %77, %cst_35 {dimension_numbers = #tpu.dot_dimension_numbers<[1], [0], [0], [1], [0, 0, 1, 1], [], []>} : vector<8x8xf32>, vector<8x32xf32>, vector<8x32xf32> -> vector<8x32xf32>
    %79 = arith.addf %76, %78 : vector<8x32xf32>
    %80 = tpu.reciprocal %74 : vector<8x1xf32> -> vector<8x1xf32>
    %81 = vector.broadcast %80 : vector<8x1xf32> to vector<8x32xf32>
    %82 = arith.mulf %79, %81 : vector<8x32xf32>
    %c0_36 = arith.constant 0 : index
    %c0_37 = arith.constant 0 : index
    %c0_38 = arith.constant 0 : index
    %83 = vector.load %arg13[%c0_36, %c0_37, %c0_38] : memref<4x32x128xf32, #tpu.memory_space<vmem>>, vector<1x32x128xf32>
    %84 = vector.shape_cast %83 : vector<1x32x128xf32> to vector<32x128xf32>
    %cst_39 = arith.constant dense<0.000000e+00> : vector<8x128xf32>
    %85 = tpu.matmul %82, %84, %cst_39 {dimension_numbers = #tpu.dot_dimension_numbers<[1], [0], [0], [1], [0, 0, 1, 1], [], []>} : vector<8x32xf32>, vector<32x128xf32>, vector<8x128xf32> -> vector<8x128xf32>
    %86 = arith.addf %37, %85 : vector<8x128xf32>
    %87 = vector.extract_strided_slice %34 {offsets = [0, 32], sizes = [8, 32], strides = [1, 1]} : vector<8x128xf32> to vector<8x32xf32>
    %cst_40 = arith.constant 0xFF800000 : f32
    %88 = vector.broadcast %cst_40 : f32 to vector<8x1xf32>
    %cst_41 = arith.constant 0.000000e+00 : f32
    %89 = vector.broadcast %cst_41 : f32 to vector<8x1xf32>
    %cst_42 = arith.constant 0.000000e+00 : f32
    %90 = vector.broadcast %cst_42 : f32 to vector<8x32xf32>
    %c32 = arith.constant 32 : index
    %c0_43 = arith.constant 0 : index
    %91 = vector.load %arg22[%c32, %c0_43] : memref<128x24xf32, #tpu.memory_space<vmem>>, vector<32x16xf32>
    %cst_44 = arith.constant dense<0.000000e+00> : vector<8x16xf32>
    %92 = tpu.matmul %87, %91, %cst_44 {dimension_numbers = #tpu.dot_dimension_numbers<[1], [0], [0], [1], [0, 0, 1, 1], [], []>} : vector<8x32xf32>, vector<32x16xf32>, vector<8x16xf32> -> vector<8x16xf32>
    %cst_45 = arith.constant dense<0xFF800000> : vector<8xf32>
    %93 = vector.multi_reduction <maximumf>, %92, %cst_45 [1] : vector<8x16xf32> to vector<8xf32>
    %94 = vector.shape_cast %93 : vector<8xf32> to vector<8x1xf32>
    %95 = arith.maximumf %88, %94 : vector<8x1xf32>
    %96 = arith.subf %88, %95 : vector<8x1xf32>
    %97 = math.exp %96 : vector<8x1xf32>
    %98 = vector.broadcast %95 : vector<8x1xf32> to vector<8x16xf32>
    %99 = arith.subf %92, %98 : vector<8x16xf32>
    %100 = math.exp %99 : vector<8x16xf32>
    %101 = arith.mulf %97, %89 : vector<8x1xf32>
    %cst_46 = arith.constant dense<0.000000e+00> : vector<8xf32>
    %102 = vector.multi_reduction <add>, %100, %cst_46 [1] : vector<8x16xf32> to vector<8xf32>
    %103 = vector.shape_cast %102 : vector<8xf32> to vector<8x1xf32>
    %104 = arith.addf %101, %103 : vector<8x1xf32>
    %105 = vector.broadcast %97 : vector<8x1xf32> to vector<8x32xf32>
    %106 = arith.mulf %105, %90 : vector<8x32xf32>
    %c0_47 = arith.constant 0 : index
    %c32_48 = arith.constant 32 : index
    %107 = vector.load %arg23[%c0_47, %c32_48] : memref<24x128xf32, #tpu.memory_space<vmem>>, vector<16x32xf32>
    %cst_49 = arith.constant dense<0.000000e+00> : vector<8x32xf32>
    %108 = tpu.matmul %100, %107, %cst_49 {dimension_numbers = #tpu.dot_dimension_numbers<[1], [0], [0], [1], [0, 0, 1, 1], [], []>} : vector<8x16xf32>, vector<16x32xf32>, vector<8x32xf32> -> vector<8x32xf32>
    %109 = arith.addf %106, %108 : vector<8x32xf32>
    %c32_50 = arith.constant 32 : index
    %c16_51 = arith.constant 16 : index
    %110 = vector.load %arg22[%c32_50, %c16_51] : memref<128x24xf32, #tpu.memory_space<vmem>>, vector<32x8xf32>
    %cst_52 = arith.constant dense<0.000000e+00> : vector<8x8xf32>
    %111 = tpu.matmul %87, %110, %cst_52 {dimension_numbers = #tpu.dot_dimension_numbers<[1], [0], [0], [1], [0, 0, 1, 1], [], []>} : vector<8x32xf32>, vector<32x8xf32>, vector<8x8xf32> -> vector<8x8xf32>
    %cst_53 = arith.constant dense<0xFF800000> : vector<8xf32>
    %112 = vector.multi_reduction <maximumf>, %111, %cst_53 [1] : vector<8x8xf32> to vector<8xf32>
    %113 = vector.shape_cast %112 : vector<8xf32> to vector<8x1xf32>
    %114 = arith.maximumf %95, %113 : vector<8x1xf32>
    %115 = arith.subf %95, %114 : vector<8x1xf32>
    %116 = math.exp %115 : vector<8x1xf32>
    %117 = vector.broadcast %114 : vector<8x1xf32> to vector<8x8xf32>
    %118 = arith.subf %111, %117 : vector<8x8xf32>
    %119 = math.exp %118 : vector<8x8xf32>
    %120 = arith.mulf %116, %104 : vector<8x1xf32>
    %cst_54 = arith.constant dense<0.000000e+00> : vector<8xf32>
    %121 = vector.multi_reduction <add>, %119, %cst_54 [1] : vector<8x8xf32> to vector<8xf32>
    %122 = vector.shape_cast %121 : vector<8xf32> to vector<8x1xf32>
    %123 = arith.addf %120, %122 : vector<8x1xf32>
    %124 = vector.broadcast %116 : vector<8x1xf32> to vector<8x32xf32>
    %125 = arith.mulf %124, %109 : vector<8x32xf32>
    %c16_55 = arith.constant 16 : index
    %c32_56 = arith.constant 32 : index
    %126 = vector.load %arg23[%c16_55, %c32_56] : memref<24x128xf32, #tpu.memory_space<vmem>>, vector<8x32xf32>
    %cst_57 = arith.constant dense<0.000000e+00> : vector<8x32xf32>
    %127 = tpu.matmul %119, %126, %cst_57 {dimension_numbers = #tpu.dot_dimension_numbers<[1], [0], [0], [1], [0, 0, 1, 1], [], []>} : vector<8x8xf32>, vector<8x32xf32>, vector<8x32xf32> -> vector<8x32xf32>
    %128 = arith.addf %125, %127 : vector<8x32xf32>
    %129 = tpu.reciprocal %123 : vector<8x1xf32> -> vector<8x1xf32>
    %130 = vector.broadcast %129 : vector<8x1xf32> to vector<8x32xf32>
    %131 = arith.mulf %128, %130 : vector<8x32xf32>
    %c1 = arith.constant 1 : index
    %c0_58 = arith.constant 0 : index
    %c0_59 = arith.constant 0 : index
    %132 = vector.load %arg13[%c1, %c0_58, %c0_59] : memref<4x32x128xf32, #tpu.memory_space<vmem>>, vector<1x32x128xf32>
    %133 = vector.shape_cast %132 : vector<1x32x128xf32> to vector<32x128xf32>
    %cst_60 = arith.constant dense<0.000000e+00> : vector<8x128xf32>
    %134 = tpu.matmul %131, %133, %cst_60 {dimension_numbers = #tpu.dot_dimension_numbers<[1], [0], [0], [1], [0, 0, 1, 1], [], []>} : vector<8x32xf32>, vector<32x128xf32>, vector<8x128xf32> -> vector<8x128xf32>
    %135 = arith.addf %86, %134 : vector<8x128xf32>
    %136 = vector.extract_strided_slice %34 {offsets = [0, 64], sizes = [8, 32], strides = [1, 1]} : vector<8x128xf32> to vector<8x32xf32>
    %cst_61 = arith.constant 0xFF800000 : f32
    %137 = vector.broadcast %cst_61 : f32 to vector<8x1xf32>
    %cst_62 = arith.constant 0.000000e+00 : f32
    %138 = vector.broadcast %cst_62 : f32 to vector<8x1xf32>
    %cst_63 = arith.constant 0.000000e+00 : f32
    %139 = vector.broadcast %cst_63 : f32 to vector<8x32xf32>
    %c64 = arith.constant 64 : index
    %c0_64 = arith.constant 0 : index
    %140 = vector.load %arg22[%c64, %c0_64] : memref<128x24xf32, #tpu.memory_space<vmem>>, vector<32x16xf32>
    %cst_65 = arith.constant dense<0.000000e+00> : vector<8x16xf32>
    %141 = tpu.matmul %136, %140, %cst_65 {dimension_numbers = #tpu.dot_dimension_numbers<[1], [0], [0], [1], [0, 0, 1, 1], [], []>} : vector<8x32xf32>, vector<32x16xf32>, vector<8x16xf32> -> vector<8x16xf32>
    %cst_66 = arith.constant dense<0xFF800000> : vector<8xf32>
    %142 = vector.multi_reduction <maximumf>, %141, %cst_66 [1] : vector<8x16xf32> to vector<8xf32>
    %143 = vector.shape_cast %142 : vector<8xf32> to vector<8x1xf32>
    %144 = arith.maximumf %137, %143 : vector<8x1xf32>
    %145 = arith.subf %137, %144 : vector<8x1xf32>
    %146 = math.exp %145 : vector<8x1xf32>
    %147 = vector.broadcast %144 : vector<8x1xf32> to vector<8x16xf32>
    %148 = arith.subf %141, %147 : vector<8x16xf32>
    %149 = math.exp %148 : vector<8x16xf32>
    %150 = arith.mulf %146, %138 : vector<8x1xf32>
    %cst_67 = arith.constant dense<0.000000e+00> : vector<8xf32>
    %151 = vector.multi_reduction <add>, %149, %cst_67 [1] : vector<8x16xf32> to vector<8xf32>
    %152 = vector.shape_cast %151 : vector<8xf32> to vector<8x1xf32>
    %153 = arith.addf %150, %152 : vector<8x1xf32>
    %154 = vector.broadcast %146 : vector<8x1xf32> to vector<8x32xf32>
    %155 = arith.mulf %154, %139 : vector<8x32xf32>
    %c0_68 = arith.constant 0 : index
    %c64_69 = arith.constant 64 : index
    %156 = vector.load %arg23[%c0_68, %c64_69] : memref<24x128xf32, #tpu.memory_space<vmem>>, vector<16x32xf32>
    %cst_70 = arith.constant dense<0.000000e+00> : vector<8x32xf32>
    %157 = tpu.matmul %149, %156, %cst_70 {dimension_numbers = #tpu.dot_dimension_numbers<[1], [0], [0], [1], [0, 0, 1, 1], [], []>} : vector<8x16xf32>, vector<16x32xf32>, vector<8x32xf32> -> vector<8x32xf32>
    %158 = arith.addf %155, %157 : vector<8x32xf32>
    %c64_71 = arith.constant 64 : index
    %c16_72 = arith.constant 16 : index
    %159 = vector.load %arg22[%c64_71, %c16_72] : memref<128x24xf32, #tpu.memory_space<vmem>>, vector<32x8xf32>
    %cst_73 = arith.constant dense<0.000000e+00> : vector<8x8xf32>
    %160 = tpu.matmul %136, %159, %cst_73 {dimension_numbers = #tpu.dot_dimension_numbers<[1], [0], [0], [1], [0, 0, 1, 1], [], []>} : vector<8x32xf32>, vector<32x8xf32>, vector<8x8xf32> -> vector<8x8xf32>
    %cst_74 = arith.constant dense<0xFF800000> : vector<8xf32>
    %161 = vector.multi_reduction <maximumf>, %160, %cst_74 [1] : vector<8x8xf32> to vector<8xf32>
    %162 = vector.shape_cast %161 : vector<8xf32> to vector<8x1xf32>
    %163 = arith.maximumf %144, %162 : vector<8x1xf32>
    %164 = arith.subf %144, %163 : vector<8x1xf32>
    %165 = math.exp %164 : vector<8x1xf32>
    %166 = vector.broadcast %163 : vector<8x1xf32> to vector<8x8xf32>
    %167 = arith.subf %160, %166 : vector<8x8xf32>
    %168 = math.exp %167 : vector<8x8xf32>
    %169 = arith.mulf %165, %153 : vector<8x1xf32>
    %cst_75 = arith.constant dense<0.000000e+00> : vector<8xf32>
    %170 = vector.multi_reduction <add>, %168, %cst_75 [1] : vector<8x8xf32> to vector<8xf32>
    %171 = vector.shape_cast %170 : vector<8xf32> to vector<8x1xf32>
    %172 = arith.addf %169, %171 : vector<8x1xf32>
    %173 = vector.broadcast %165 : vector<8x1xf32> to vector<8x32xf32>
    %174 = arith.mulf %173, %158 : vector<8x32xf32>
    %c16_76 = arith.constant 16 : index
    %c64_77 = arith.constant 64 : index
    %175 = vector.load %arg23[%c16_76, %c64_77] : memref<24x128xf32, #tpu.memory_space<vmem>>, vector<8x32xf32>
    %cst_78 = arith.constant dense<0.000000e+00> : vector<8x32xf32>
    %176 = tpu.matmul %168, %175, %cst_78 {dimension_numbers = #tpu.dot_dimension_numbers<[1], [0], [0], [1], [0, 0, 1, 1], [], []>} : vector<8x8xf32>, vector<8x32xf32>, vector<8x32xf32> -> vector<8x32xf32>
    %177 = arith.addf %174, %176 : vector<8x32xf32>
    %178 = tpu.reciprocal %172 : vector<8x1xf32> -> vector<8x1xf32>
    %179 = vector.broadcast %178 : vector<8x1xf32> to vector<8x32xf32>
    %180 = arith.mulf %177, %179 : vector<8x32xf32>
    %c2 = arith.constant 2 : index
    %c0_79 = arith.constant 0 : index
    %c0_80 = arith.constant 0 : index
    %181 = vector.load %arg13[%c2, %c0_79, %c0_80] : memref<4x32x128xf32, #tpu.memory_space<vmem>>, vector<1x32x128xf32>
    %182 = vector.shape_cast %181 : vector<1x32x128xf32> to vector<32x128xf32>
    %cst_81 = arith.constant dense<0.000000e+00> : vector<8x128xf32>
    %183 = tpu.matmul %180, %182, %cst_81 {dimension_numbers = #tpu.dot_dimension_numbers<[1], [0], [0], [1], [0, 0, 1, 1], [], []>} : vector<8x32xf32>, vector<32x128xf32>, vector<8x128xf32> -> vector<8x128xf32>
    %184 = arith.addf %135, %183 : vector<8x128xf32>
    %185 = vector.extract_strided_slice %34 {offsets = [0, 96], sizes = [8, 32], strides = [1, 1]} : vector<8x128xf32> to vector<8x32xf32>
    %cst_82 = arith.constant 0xFF800000 : f32
    %186 = vector.broadcast %cst_82 : f32 to vector<8x1xf32>
    %cst_83 = arith.constant 0.000000e+00 : f32
    %187 = vector.broadcast %cst_83 : f32 to vector<8x1xf32>
    %cst_84 = arith.constant 0.000000e+00 : f32
    %188 = vector.broadcast %cst_84 : f32 to vector<8x32xf32>
    %c96 = arith.constant 96 : index
    %c0_85 = arith.constant 0 : index
    %189 = vector.load %arg22[%c96, %c0_85] : memref<128x24xf32, #tpu.memory_space<vmem>>, vector<32x16xf32>
    %cst_86 = arith.constant dense<0.000000e+00> : vector<8x16xf32>
    %190 = tpu.matmul %185, %189, %cst_86 {dimension_numbers = #tpu.dot_dimension_numbers<[1], [0], [0], [1], [0, 0, 1, 1], [], []>} : vector<8x32xf32>, vector<32x16xf32>, vector<8x16xf32> -> vector<8x16xf32>
    %cst_87 = arith.constant dense<0xFF800000> : vector<8xf32>
    %191 = vector.multi_reduction <maximumf>, %190, %cst_87 [1] : vector<8x16xf32> to vector<8xf32>
    %192 = vector.shape_cast %191 : vector<8xf32> to vector<8x1xf32>
    %193 = arith.maximumf %186, %192 : vector<8x1xf32>
    %194 = arith.subf %186, %193 : vector<8x1xf32>
    %195 = math.exp %194 : vector<8x1xf32>
    %196 = vector.broadcast %193 : vector<8x1xf32> to vector<8x16xf32>
    %197 = arith.subf %190, %196 : vector<8x16xf32>
    %198 = math.exp %197 : vector<8x16xf32>
    %199 = arith.mulf %195, %187 : vector<8x1xf32>
    %cst_88 = arith.constant dense<0.000000e+00> : vector<8xf32>
    %200 = vector.multi_reduction <add>, %198, %cst_88 [1] : vector<8x16xf32> to vector<8xf32>
    %201 = vector.shape_cast %200 : vector<8xf32> to vector<8x1xf32>
    %202 = arith.addf %199, %201 : vector<8x1xf32>
    %203 = vector.broadcast %195 : vector<8x1xf32> to vector<8x32xf32>
    %204 = arith.mulf %203, %188 : vector<8x32xf32>
    %c0_89 = arith.constant 0 : index
    %c96_90 = arith.constant 96 : index
    %205 = vector.load %arg23[%c0_89, %c96_90] : memref<24x128xf32, #tpu.memory_space<vmem>>, vector<16x32xf32>
    %cst_91 = arith.constant dense<0.000000e+00> : vector<8x32xf32>
    %206 = tpu.matmul %198, %205, %cst_91 {dimension_numbers = #tpu.dot_dimension_numbers<[1], [0], [0], [1], [0, 0, 1, 1], [], []>} : vector<8x16xf32>, vector<16x32xf32>, vector<8x32xf32> -> vector<8x32xf32>
    %207 = arith.addf %204, %206 : vector<8x32xf32>
    %c96_92 = arith.constant 96 : index
    %c16_93 = arith.constant 16 : index
    %208 = vector.load %arg22[%c96_92, %c16_93] : memref<128x24xf32, #tpu.memory_space<vmem>>, vector<32x8xf32>
    %cst_94 = arith.constant dense<0.000000e+00> : vector<8x8xf32>
    %209 = tpu.matmul %185, %208, %cst_94 {dimension_numbers = #tpu.dot_dimension_numbers<[1], [0], [0], [1], [0, 0, 1, 1], [], []>} : vector<8x32xf32>, vector<32x8xf32>, vector<8x8xf32> -> vector<8x8xf32>
    %cst_95 = arith.constant dense<0xFF800000> : vector<8xf32>
    %210 = vector.multi_reduction <maximumf>, %209, %cst_95 [1] : vector<8x8xf32> to vector<8xf32>
    %211 = vector.shape_cast %210 : vector<8xf32> to vector<8x1xf32>
    %212 = arith.maximumf %193, %211 : vector<8x1xf32>
    %213 = arith.subf %193, %212 : vector<8x1xf32>
    %214 = math.exp %213 : vector<8x1xf32>
    %215 = vector.broadcast %212 : vector<8x1xf32> to vector<8x8xf32>
    %216 = arith.subf %209, %215 : vector<8x8xf32>
    %217 = math.exp %216 : vector<8x8xf32>
    %218 = arith.mulf %214, %202 : vector<8x1xf32>
    %cst_96 = arith.constant dense<0.000000e+00> : vector<8xf32>
    %219 = vector.multi_reduction <add>, %217, %cst_96 [1] : vector<8x8xf32> to vector<8xf32>
    %220 = vector.shape_cast %219 : vector<8xf32> to vector<8x1xf32>
    %221 = arith.addf %218, %220 : vector<8x1xf32>
    %222 = vector.broadcast %214 : vector<8x1xf32> to vector<8x32xf32>
    %223 = arith.mulf %222, %207 : vector<8x32xf32>
    %c16_97 = arith.constant 16 : index
    %c96_98 = arith.constant 96 : index
    %224 = vector.load %arg23[%c16_97, %c96_98] : memref<24x128xf32, #tpu.memory_space<vmem>>, vector<8x32xf32>
    %cst_99 = arith.constant dense<0.000000e+00> : vector<8x32xf32>
    %225 = tpu.matmul %217, %224, %cst_99 {dimension_numbers = #tpu.dot_dimension_numbers<[1], [0], [0], [1], [0, 0, 1, 1], [], []>} : vector<8x8xf32>, vector<8x32xf32>, vector<8x32xf32> -> vector<8x32xf32>
    %226 = arith.addf %223, %225 : vector<8x32xf32>
    %227 = tpu.reciprocal %221 : vector<8x1xf32> -> vector<8x1xf32>
    %228 = vector.broadcast %227 : vector<8x1xf32> to vector<8x32xf32>
    %229 = arith.mulf %226, %228 : vector<8x32xf32>
    %c3 = arith.constant 3 : index
    %c0_100 = arith.constant 0 : index
    %c0_101 = arith.constant 0 : index
    %230 = vector.load %arg13[%c3, %c0_100, %c0_101] : memref<4x32x128xf32, #tpu.memory_space<vmem>>, vector<1x32x128xf32>
    %231 = vector.shape_cast %230 : vector<1x32x128xf32> to vector<32x128xf32>
    %cst_102 = arith.constant dense<0.000000e+00> : vector<8x128xf32>
    %232 = tpu.matmul %229, %231, %cst_102 {dimension_numbers = #tpu.dot_dimension_numbers<[1], [0], [0], [1], [0, 0, 1, 1], [], []>} : vector<8x32xf32>, vector<32x128xf32>, vector<8x128xf32> -> vector<8x128xf32>
    %233 = arith.addf %184, %232 : vector<8x128xf32>
    %c0_103 = arith.constant 0 : index
    %c0_104 = arith.constant 0 : index
    %234 = vector.load %arg15[%c0_103, %c0_104] : memref<1x128xf32, #tpu.memory_space<vmem>>, vector<1x128xf32>
    %c0_105 = arith.constant 0 : index
    %c0_106 = arith.constant 0 : index
    %235 = vector.load %arg16[%c0_105, %c0_106] : memref<1x128xf32, #tpu.memory_space<vmem>>, vector<1x128xf32>
    %cst_107 = arith.constant dense<0.000000e+00> : vector<8xf32>
    %236 = vector.multi_reduction <add>, %233, %cst_107 [1] : vector<8x128xf32> to vector<8xf32>
    %237 = vector.shape_cast %236 : vector<8xf32> to vector<8x1xf32>
    %cst_108 = arith.constant 1.280000e+02 : f32
    %238 = vector.broadcast %cst_108 : f32 to vector<8x1xf32>
    %239 = arith.divf %237, %238 : vector<8x1xf32>
    %240 = vector.broadcast %239 : vector<8x1xf32> to vector<8x128xf32>
    %241 = arith.subf %233, %240 : vector<8x128xf32>
    %242 = arith.mulf %241, %241 : vector<8x128xf32>
    %cst_109 = arith.constant dense<0.000000e+00> : vector<8xf32>
    %243 = vector.multi_reduction <add>, %242, %cst_109 [1] : vector<8x128xf32> to vector<8xf32>
    %244 = vector.shape_cast %243 : vector<8xf32> to vector<8x1xf32>
    %cst_110 = arith.constant 0.00787401571 : f32
    %245 = vector.broadcast %cst_110 : f32 to vector<8x1xf32>
    %246 = arith.mulf %244, %245 : vector<8x1xf32>
    %247 = math.sqrt %246 : vector<8x1xf32>
    %cst_111 = arith.constant 9.99999997E-7 : f32
    %248 = vector.broadcast %cst_111 : f32 to vector<8x1xf32>
    %249 = arith.addf %247, %248 : vector<8x1xf32>
    %250 = tpu.reciprocal %249 : vector<8x1xf32> -> vector<8x1xf32>
    %251 = vector.broadcast %239 : vector<8x1xf32> to vector<8x128xf32>
    %252 = arith.subf %233, %251 : vector<8x128xf32>
    %253 = vector.broadcast %234 : vector<1x128xf32> to vector<8x128xf32>
    %254 = arith.mulf %253, %252 : vector<8x128xf32>
    %255 = vector.broadcast %250 : vector<8x1xf32> to vector<8x128xf32>
    %256 = arith.mulf %254, %255 : vector<8x128xf32>
    %257 = vector.broadcast %235 : vector<1x128xf32> to vector<8x128xf32>
    %258 = arith.addf %256, %257 : vector<8x128xf32>
    %c0_112 = arith.constant 0 : index
    %c0_113 = arith.constant 0 : index
    %259 = vector.load %arg17[%c0_112, %c0_113] : memref<128x256xf32, #tpu.memory_space<vmem>>, vector<128x256xf32>
    %cst_114 = arith.constant dense<0.000000e+00> : vector<8x256xf32>
    %260 = tpu.matmul %258, %259, %cst_114 {dimension_numbers = #tpu.dot_dimension_numbers<[1], [0], [0], [1], [0, 0, 1, 1], [], []>} : vector<8x128xf32>, vector<128x256xf32>, vector<8x256xf32> -> vector<8x256xf32>
    %c0_115 = arith.constant 0 : index
    %c0_116 = arith.constant 0 : index
    %261 = vector.load %arg18[%c0_115, %c0_116] : memref<1x256xf32, #tpu.memory_space<vmem>>, vector<1x256xf32>
    %262 = vector.broadcast %261 : vector<1x256xf32> to vector<8x256xf32>
    %263 = arith.addf %260, %262 : vector<8x256xf32>
    %cst_117 = arith.constant 0.000000e+00 : f32
    %264 = vector.broadcast %cst_117 : f32 to vector<8x256xf32>
    %265 = arith.maximumf %263, %264 : vector<8x256xf32>
    %c0_118 = arith.constant 0 : index
    %c0_119 = arith.constant 0 : index
    %266 = vector.load %arg19[%c0_118, %c0_119] : memref<256x128xf32, #tpu.memory_space<vmem>>, vector<256x128xf32>
    %cst_120 = arith.constant dense<0.000000e+00> : vector<8x128xf32>
    %267 = tpu.matmul %265, %266, %cst_120 {dimension_numbers = #tpu.dot_dimension_numbers<[1], [0], [0], [1], [0, 0, 1, 1], [], []>} : vector<8x256xf32>, vector<256x128xf32>, vector<8x128xf32> -> vector<8x128xf32>
    %c0_121 = arith.constant 0 : index
    %c0_122 = arith.constant 0 : index
    %268 = vector.load %arg20[%c0_121, %c0_122] : memref<1x128xf32, #tpu.memory_space<vmem>>, vector<1x128xf32>
    %269 = vector.broadcast %268 : vector<1x128xf32> to vector<8x128xf32>
    %270 = arith.addf %267, %269 : vector<8x128xf32>
    %271 = arith.addf %233, %270 : vector<8x128xf32>
    %c0_123 = arith.constant 0 : index
    %c0_124 = arith.constant 0 : index
    %c0_125 = arith.constant 0 : index
    %272 = vector.load %arg21[%c0_123, %c0_124, %c0_125] : memref<1x8x128xf32, #tpu.memory_space<vmem>>, vector<1x8x128xf32>
    %273 = vector.shape_cast %272 : vector<1x8x128xf32> to vector<8x128xf32>
    %274 = vector.shape_cast %271 : vector<8x128xf32> to vector<1x8x128xf32>
    tpu.vector_store %arg21[%c0_123, %c0_124, %c0_125], %274 {strides = array<i32>} : memref<1x8x128xf32, #tpu.memory_space<vmem>>, vector<1x8x128xf32>,
    return
  }
  func.func @transform_0(%arg0: i32, %arg1: i32) -> (i32, i32, i32) {
    %c0_i32 = arith.constant 0 : i32
    %c0_i32_0 = arith.constant 0 : i32
    return %arg0, %arg1, %c0_i32 : i32, i32, i32
  }
  func.func @transform_1(%arg0: i32, %arg1: i32) -> (i32, i32, i32) {
    %c0_i32 = arith.constant 0 : i32
    %c0_i32_0 = arith.constant 0 : i32
    %c0_i32_1 = arith.constant 0 : i32
    return %arg0, %c0_i32, %c0_i32_0 : i32, i32, i32
  }
  func.func @transform_2(%arg0: i32, %arg1: i32) -> (i32, i32, i32) {
    %c0_i32 = arith.constant 0 : i32
    %c0_i32_0 = arith.constant 0 : i32
    %c0_i32_1 = arith.constant 0 : i32
    return %arg0, %c0_i32, %c0_i32_0 : i32, i32, i32
  }
  func.func @transform_3(%arg0: i32, %arg1: i32) -> (i32, i32) {
    %c0_i32 = arith.constant 0 : i32
    %c0_i32_0 = arith.constant 0 : i32
    %c0_i32_1 = arith.constant 0 : i32
    return %c0_i32, %c0_i32_0 : i32, i32
  }
  func.func @transform_4(%arg0: i32, %arg1: i32) -> (i32, i32) {
    %c0_i32 = arith.constant 0 : i32
    %c0_i32_0 = arith.constant 0 : i32
    %c0_i32_1 = arith.constant 0 : i32
    return %c0_i32, %c0_i32_0 : i32, i32
  }
  func.func @transform_5(%arg0: i32, %arg1: i32) -> (i32, i32) {
    %c0_i32 = arith.constant 0 : i32
    %c0_i32_0 = arith.constant 0 : i32
    %c0_i32_1 = arith.constant 0 : i32
    return %c0_i32, %c0_i32_0 : i32, i32
  }
  func.func @transform_6(%arg0: i32, %arg1: i32) -> (i32, i32) {
    %c0_i32 = arith.constant 0 : i32
    %c0_i32_0 = arith.constant 0 : i32
    %c0_i32_1 = arith.constant 0 : i32
    return %c0_i32, %c0_i32_0 : i32, i32
  }
  func.func @transform_7(%arg0: i32, %arg1: i32) -> (i32, i32) {
    %c0_i32 = arith.constant 0 : i32
    %c0_i32_0 = arith.constant 0 : i32
    %c0_i32_1 = arith.constant 0 : i32
    return %c0_i32, %c0_i32_0 : i32, i32
  }
  func.func @transform_8(%arg0: i32, %arg1: i32) -> (i32, i32) {
    %c0_i32 = arith.constant 0 : i32
    %c0_i32_0 = arith.constant 0 : i32
    %c0_i32_1 = arith.constant 0 : i32
    return %c0_i32, %c0_i32_0 : i32, i32
  }
  func.func @transform_9(%arg0: i32, %arg1: i32) -> (i32, i32) {
    %c0_i32 = arith.constant 0 : i32
    %c0_i32_0 = arith.constant 0 : i32
    %c0_i32_1 = arith.constant 0 : i32
    return %c0_i32, %c0_i32_0 : i32, i32
  }
  func.func @transform_10(%arg0: i32, %arg1: i32) -> (i32, i32) {
    %c0_i32 = arith.constant 0 : i32
    %c0_i32_0 = arith.constant 0 : i32
    %c0_i32_1 = arith.constant 0 : i32
    return %c0_i32, %c0_i32_0 : i32, i32
  }
  func.func @transform_11(%arg0: i32, %arg1: i32) -> (i32, i32, i32) {
    %c0_i32 = arith.constant 0 : i32
    %c0_i32_0 = arith.constant 0 : i32
    %c0_i32_1 = arith.constant 0 : i32
    %c0_i32_2 = arith.constant 0 : i32
    return %c0_i32, %c0_i32_0, %c0_i32_1 : i32, i32, i32
  }
  func.func @transform_12(%arg0: i32, %arg1: i32) -> (i32, i32) {
    %c0_i32 = arith.constant 0 : i32
    %c0_i32_0 = arith.constant 0 : i32
    %c0_i32_1 = arith.constant 0 : i32
    return %c0_i32, %c0_i32_0 : i32, i32
  }
  func.func @transform_13(%arg0: i32, %arg1: i32) -> (i32, i32) {
    %c0_i32 = arith.constant 0 : i32
    %c0_i32_0 = arith.constant 0 : i32
    %c0_i32_1 = arith.constant 0 : i32
    return %c0_i32, %c0_i32_0 : i32, i32
  }
  func.func @transform_14(%arg0: i32, %arg1: i32) -> (i32, i32) {
    %c0_i32 = arith.constant 0 : i32
    %c0_i32_0 = arith.constant 0 : i32
    %c0_i32_1 = arith.constant 0 : i32
    return %c0_i32, %c0_i32_0 : i32, i32
  }
  func.func @transform_15(%arg0: i32, %arg1: i32) -> (i32, i32) {
    %c0_i32 = arith.constant 0 : i32
    %c0_i32_0 = arith.constant 0 : i32
    %c0_i32_1 = arith.constant 0 : i32
    return %c0_i32, %c0_i32_0 : i32, i32
  }
  func.func @transform_16(%arg0: i32, %arg1: i32) -> (i32, i32) {
    %c0_i32 = arith.constant 0 : i32
    %c0_i32_0 = arith.constant 0 : i32
    %c0_i32_1 = arith.constant 0 : i32
    return %c0_i32, %c0_i32_0 : i32, i32
  }
  func.func @transform_17(%arg0: i32, %arg1: i32) -> (i32, i32) {
    %c0_i32 = arith.constant 0 : i32
    %c0_i32_0 = arith.constant 0 : i32
    %c0_i32_1 = arith.constant 0 : i32
    return %c0_i32, %c0_i32_0 : i32, i32
  }
  func.func @transform_18(%arg0: i32, %arg1: i32) -> (i32, i32) {
    %c0_i32 = arith.constant 0 : i32
    %c0_i32_0 = arith.constant 0 : i32
    %c0_i32_1 = arith.constant 0 : i32
    return %c0_i32, %c0_i32_0 : i32, i32
  }
  func.func @transform_19(%arg0: i32, %arg1: i32) -> (i32, i32, i32) {
    %c0_i32 = arith.constant 0 : i32
    %c0_i32_0 = arith.constant 0 : i32
    return %arg0, %arg1, %c0_i32 : i32, i32, i32
  }
}

</mosaic_0001>

<bundles_post_ra>
// kernel: tpu_custom_call.1
= control target key start
LH: loop header
LB: loop body
LE: loop exit
PB: predicated region body
PF: predicated region fallthrough
CT: control target
= control target key end

     0   :  { %s5341_s0 = inlined_call_operand.hbm [shape: f32[2,16,128], index: 0, kind: input, shape index: {}]   ;;  %s5342_s1 = inlined_call_operand.vmem [shape: f32[2,24,128], index: 1, kind: input, shape index: {}]   ;;  %s5343_s2 = inlined_call_operand.vmem [shape: f32[2,128,24], index: 2, kind: input, shape index: {}]   ;;  %s5344_s3 = inlined_call_operand.vmem [shape: f32[1,128], index: 3, kind: input, shape index: {}]   ;;  %s5345_s4 = inlined_call_operand.vmem [shape: f32[1,128], index: 4, kind: input, shape index: {}]   ;;  %s5346_s5 = inlined_call_operand.vmem [shape: f32[128,128], index: 5, kind: input, shape index: {}]   ;;  %s5347_s6 = inlined_call_operand.vmem [shape: f32[1,128], index: 6, kind: input, shape index: {}]   ;;  %s5348_s7 = inlined_call_operand.hbm [shape: f32[128,128], index: 7, kind: input, shape index: {}]   ;;  %s5349_s8 = inlined_call_operand.vmem [shape: f32[128,1], index: 8, kind: input, shape index: {}]   ;;  %s5350_s9 = inlined_call_operand.hbm [shape: f32[128,128], index: 9, kind: input, shape index: {}]   ;;  %s5351_s10 = inlined_call_operand.vmem [shape: f32[1,128], index: 10, kind: input, shape index: {}]   ;;  %s5352_s11 = inlined_call_operand.hbm [shape: f32[4,32,128], index: 11, kind: input, shape index: {}]   ;;  %s5353_s12 = inlined_call_operand.vmem [shape: f32[1,128], index: 12, kind: input, shape index: {}]   ;;  %s5354_s13 = inlined_call_operand.vmem [shape: f32[1,128], index: 13, kind: input, shape index: {}]   ;;  %s5355_s14 = inlined_call_operand.vmem [shape: f32[1,128], index: 14, kind: input, shape index: {}]   ;;  %s5356_s15 = inlined_call_operand.vmem [shape: f32[128,256], index: 15, kind: input, shape index: {}]   ;;  %s5357_s16 = inlined_call_operand.vmem [shape: f32[1,256], index: 16, kind: input, shape index: {}]   ;;  %s5358_s17 = inlined_call_operand.hbm [shape: f32[256,128], index: 17, kind: input, shape index: {}]   ;;  %s5359_s18 = inlined_call_operand.vmem [shape: f32[1,128], index: 18, kind: input, shape index: {}]   ;;  %s5360_s19 = inlined_call_operand.hbm [shape: f32[2,16,128], index: 19, kind: output, shape index: {}]  }
   0x1   :  { %5371 = sst [smem:[#allocation23_spill]] %s5341_s0 }
   0x2   :  { %5372 = sst [smem:[#allocation24_spill]] %s5342_s1 }
   0x3   :  { %5373 = sst [smem:[#allocation25_spill]] %s5343_s2 }
   0x4   :  { %5374 = sst [smem:[#allocation26_spill]] %s5344_s3 }
   0x5   :  { %5375 = sst [smem:[#allocation27_spill]] %s5348_s7 }
   0x6   :  { %5376 = sst [smem:[#allocation28_spill]] %s5350_s9 }
   0x7   :  { %5377 = sst [smem:[#allocation29_spill]] %s5352_s11 }
   0x8   :  { %5378 = sst [smem:[#allocation30_spill]] %s5353_s12 }
   0x9   :  { %5379 = sst [smem:[#allocation31_spill]] %s5354_s13 }
   0xa   :  { %5380 = sst [smem:[#allocation32_spill]] %s5355_s14 }
   0xb   :  { %5381 = sst [smem:[#allocation33_spill]] %s5356_s15 }
   0xc   :  { %5382 = sst [smem:[#allocation34_spill]] %s5357_s16 }
   0xd   :  { %5383 = sst [smem:[#allocation35_spill]] %s5358_s17 }
   0xe   :  { %5384 = sst [smem:[#allocation36_spill]] %s5359_s18 }
   0xf   :  { %5385 = sst [smem:[#allocation37_spill]] %s5360_s19 }
  0x10   :  { %24 = vsyncpa [#allocation5], 0 }
  0x11   :  { %26 = vsyncpa [#allocation5 + $0x1], 0 }
  0x12   :  { %27 = vsyncpa [#allocation8], 0 }
  0x13   :  { %28 = vsyncpa [#allocation11], 0 }
  0x14   :  { %29 = vsyncpa [#allocation6], 0 }
  0x15   :  { %31 = vsyncpa [#allocation6 + $0x1], 0  ;;  %s4512_s0 = smov 0   ;;  %s4514_s30 = smov 0  }
  0x16   :  { %s4516_s20 = smov 0   ;;  %s4518_s21 = smov 0  }
  0x17   :  { %s4520_s1 = smov 0   ;;  %s4522_s22 = smov 0  }
  0x18   :  { %s4524_s2 = smov 0   ;;  %s4526_s23 = smov 0  }
  0x19 LB: > { %5386 = sst [smem:[#allocation18_spill]] %s4365_s0  ;;  %s5361_s24 = sadd.s32 4294967295, %s4393_s23   ;;  %s4393_s23 = sphi %s4526_s23, %s37_s23   ;;  %s4389_s2 = sphi %s4524_s2, %s5421_s2   ;;  %s4385_s22 = sphi %s4522_s22, %s5426_s22   ;;  %s4381_s1 = sphi %s4520_s1, %s5419_s1   ;;  %s4377_s21 = sphi %s4518_s21, %s5425_s21   ;;  %s4373_s20 = sphi %s4516_s20, %s5424_s20   ;;  %s4369_s30 = sphi %s4514_s30, %s5423_s30   ;;  %s4365_s0 = sphi %s4512_s0, %s5422_s0  }
  0x1a   : > { %5387 = sst [smem:[#allocation19_spill]] %s4389_s2  ;;  %p3427_p0 = scmp.ge.s32.totalorder %s4393_s23, 1 }
  0x1b   : > { %p4556_p1 = scmp.eq.s32.totalorder %s5361_s24, 0  ;;  %p498_p2 = scmp.lt.s32.totalorder %s4393_s23, 5 }
  0x1c   : > { %s4395_s26 = smov [#allocation7]   ;;  %s4396_s29 = smov [#allocation10]  }
  0x1d   : > { %p4561_p3 = pnand %p3427_p0, %p498_p2  ;;  %s522_s27 = sshll.u32 %s4395_s26, 4  ;;  %s523_s27 = int_to_ptr.vmem [resolvable:$true] %s522_s27 }
  0x1e   : > { %s554_s24 = sshll.u32 %s4396_s29, 4  ;;  %s4397_s19 = smov [#allocation9]   ;;  %s555_s24 = int_to_ptr.vmem [resolvable:$true] %s554_s24 }
  0x1f   : > { %p3997_p4 = pneg %p4561_p3  ;;  %s538_s18 = sshll.u32 %s4397_s19, 4  ;;  %s539_s18 = int_to_ptr.vmem [resolvable:$true] %s538_s18 }
  0x20   : > { %s4168_s16 = scalar_lea.vmem %s523_s27, 2048  ;;  %p4176_p10 = scmp.lt.s32.totalorder %s523_s27, %s523_s27 }
  0x21   : > { %p4569_p5 = pnand %p3997_p4, %p4556_p1  ;;  %p4169_p7 = scmp.ne.s32.totalorder %s523_s27, %s4168_s16 }
  0x22   : > { %p4177_p11 = scmp.lt.s32.totalorder %s4168_s16, %s4168_s16 }
  0x23   : > { %p4159_p6 = pneg %p4569_p5 }
  0x24   : > { %p4178_p12 = por %p4177_p11, %p4176_p10 }
  0x25   : > { %p4171_p8 = pnand %p4169_p7, %p4159_p6 }
  0x27   : > { %p4172_p9 = pneg %p4171_p8 }
  0x29   : > { %p4179_p13 = pnand %p4178_p12, %p4172_p9 }
  0x2b   : > { %4182 = shalt.err (!%p4179_p13)
}
  0x2c   : > { %s4398_s26 = smov 128   ;;  %s4399_s29 = smov 8  }
  0x2d   : > { %s5391_s7 = sld [smem:[#allocation27_spill]]  ;;  %s4194_s13 = scalar_lea.vmem %s555_s24, 2048 }
  0x2e   : > { %p4195_p0 = scmp.ne.s32.totalorder %s555_s24, %s4194_s13  ;;  %p4202_p7 = scmp.lt.s32.totalorder %s555_s24, %s555_s24 }
  0x2f   : > { %p4203_p8 = scmp.lt.s32.totalorder %s4194_s13, %s4194_s13 }
  0x30   : > { %p4197_p2 = pnand %p4195_p0, %p4159_p6 }
  0x31   : > { %p4204_p9 = por %p4203_p8, %p4202_p7 }
  0x32   : > { %p4198_p4 = pneg %p4197_p2 }
  0x33   : > { %4000 = dma.hbm_to_vmem [thread:$0]  (!%p4569_p5), %s5391_s7, 2048, %s523_s27, [#allocation8], %s4398_s26, %s4398_s26, %s4399_s29  }
  0x34   : > { %p4205_p10 = pnand %p4204_p9, %p4198_p4 }
  0x36   : > { %4208 = shalt.err (!%p4205_p10)
}
  0x37   : > { %s5392_s11 = sld [smem:[#allocation29_spill]]  ;;  %s4220_s14 = scalar_lea.vmem %s539_s18, 2048 }
  0x38   : > { %p4221_p11 = scmp.ne.s32.totalorder %s539_s18, %s4220_s14  ;;  %p4228_p0 = scmp.lt.s32.totalorder %s539_s18, %s539_s18 }
  0x39   : > { %p4229_p2 = scmp.lt.s32.totalorder %s4220_s14, %s4220_s14 }
  0x3a   : > { %p4223_p12 = pnand %p4221_p11, %p4159_p6 }
  0x3b   : > { %p4230_p4 = por %p4229_p2, %p4228_p0 }
  0x3c   : > { %p4224_p13 = pneg %p4223_p12 }
  0x3d   : > { %4006 = dma.hbm_to_vmem [thread:$0]  (!%p4569_p5), %s5392_s11, 2048, %s555_s24, [#allocation11], %s4398_s26, %s4398_s26, %s4399_s29  }
  0x3e   : > { %p4231_p7 = pnand %p4230_p4, %p4224_p13 }
  0x40   : > { %4234 = shalt.err (!%p4231_p7)
}
  0x41   : > { %s5393_s9 = sld [smem:[#allocation28_spill]]  ;;  %s4400_s24 = smov [#allocation12]  }
  0x42   : > { %s582_s27 = sshll.u32 %s4400_s24, 4  ;;  %s583_s27 = int_to_ptr.vmem [resolvable:$true] %s582_s27 }
  0x43   : > { %s4246_s19 = scalar_lea.vmem %s583_s27, 4096  ;;  %p4254_p11 = scmp.lt.s32.totalorder %s583_s27, %s583_s27 }
  0x44   : > { %p4247_p8 = scmp.ne.s32.totalorder %s583_s27, %s4246_s19  ;;  %p4255_p12 = scmp.lt.s32.totalorder %s4246_s19, %s4246_s19 }
  0x46   : > { %p4249_p9 = pnand %p4247_p8, %p4159_p6  ;;  %p4256_p13 = por %p4255_p12, %p4254_p11 }
  0x47   : > { %4003 = dma.hbm_to_vmem [thread:$0]  (!%p4569_p5), %s5393_s9, 2048, %s539_s18, [#allocation8], %s4398_s26, %s4398_s26, %s4399_s29  }
  0x48   : > { %p4250_p10 = pneg %p4249_p9 }
  0x4a   : > { %p4257_p0 = pnand %p4256_p13, %p4250_p10 }
  0x4c   : > { %4260 = shalt.err (!%p4257_p0)
}
  0x4d   : > { %s5394_s17 = sld [smem:[#allocation35_spill]]  ;;  %s46_s28 = sadd.s32 1, %s4385_s22 }
  0x4e   : > { %p47_p6 = scmp.ge.s32.totalorder %s46_s28, 2  ;;  %s49_s14 = sadd.s32 1, %s4389_s2 }
  0x4f   : > { %s3426_s13 = sadd.s32 4294967294, %s4393_s23   ;;  %s58_s15 = sadd.s32 1, %s4373_s20 }
  0x50   : > { %s5428_s28 = smov (%p47_p6, %s46_s28), 0  ;;  %s5430_s14 = smov (!%p47_p6, %s49_s14), %s4389_s2 }
  0x51   : > { %5395 = sst [smem:[#allocation20_spill]] %s5428_s28  ;;  %s54_s24 = ssub.s32 %s4385_s22, %s5428_s28 }
  0x52   : > { %p65_p2 = scmp.ne.s32.totalorder %s4373_s20, %s4369_s30  ;;  %p51_p4 = scmp.ge.s32.totalorder %s5430_s14, 2 }
  0x53   : > { %4009 = dma.hbm_to_vmem [thread:$0]  (!%p4569_p5), %s5394_s17, 4096, %s583_s27, [#allocation11], %s4398_s26, %s4398_s26, %s4399_s29  }
  0x54   : > { %p71_p7 = scmp.ne.s32.totalorder %s4369_s30, %s4365_s0  ;;  %p66_p8 = scmp.eq.s32.totalorder %s4393_s23, 0 }
  0x55   : > { %s5396_s26 = sadd.s32 4294967295, %s4393_s23   ;;  %s5432_s14 = smov (%p51_p4, %s5430_s14), 0 }
  0x56   : > { %p485_p5 = scmp.eq.s32.totalorder %s5396_s26, 3  ;;  %5397 = sst [smem:[#allocation21_spill]] %s5432_s14 }
  0x57   : > { %p4639_p9 = por %p4556_p1, %p71_p7  ;;  %s53_s19 = ssub.s32 %s4389_s2, %s5432_s14 }
  0x58   : > { %p4643_p10 = por %p485_p5, %p65_p2  ;;  %p491_p11 = scmp.eq.s32.totalorder %s3426_s13, 3 }
  0x59   : > { %s55_s18 = sor.u32 %s54_s24, %s53_s19  ;;  %p4649_p12 = por %p66_p8, %p65_p2 }
  0x5a   : > { %s5399_s27 = scalar_select %p4643_p10, 1, 0 }
  0x5b   : > { %p56_p13 = scmp.eq.s32.totalorder %s55_s18, 0  ;;  %p4653_p0 = por %p491_p11, %p71_p7 }
  0x5c   : > { %5400 = sst [smem:[#allocation22_spill]] %s5399_s27  ;;  %s599_s7 = sand.u32 1, %s4373_s20  }
  0x5d   : > { %s5402_s26 = scalar_select %p4653_p0, 1, 0 }
  0x5e   : > { %s3434_s9 = sshll.u32 %s4389_s2, 1  ;;  %p4022_p6 = scmp.lt.s32.totalorder %s4393_s23, 4 }
  0x5f   : > { %s4660_s11 = scalar_select %p56_p13, %s4373_s20, %s58_s15  }
  0x60   : > { %s3433_s17 = sshll.u32 %s599_s7, 3  ;;  %s608_s28 = sadd.s32 %s4385_s22, %s3434_s9 }
  0x61   : > { %s3435_s14 = sshll.u32 %s608_s28, 7  ;;  %s603_s13 = scalar_lea.vmem [#allocation4], %s3433_s17 }
  0x62   : > { %s612_s24 = sshll.u32 %s603_s13, 4  ;;  %s5403_s27 = sld [smem:[#allocation23_spill]]  ;;  %s613_s24 = int_to_ptr.vmem [resolvable:$true] %s612_s24 }
  0x63   : > { %p4669_p2 = pnand %p4022_p6, %p4649_p12  ;;  %s600_s2 = scalar_lea.sflag [#allocation5], %s599_s7 }
  0x64   : > { %s4274_s15 = scalar_lea.vmem %s613_s24, 128  ;;  %s4401_s9 = smov [#allocation4]  }
  0x65   : > { %p4263_p4 = pneg %p4669_p2  ;;  %p4275_p7 = scmp.ne.s32.totalorder %s613_s24, %s4274_s15 }
  0x66   : > { %s4279_s17 = sshll.u32 %s4401_s9, 4  ;;  %s4280_s17 = int_to_ptr.vmem [resolvable:$false] %s4279_s17 }
  0x67   : > { %p4277_p8 = pnand %p4275_p7, %p4263_p4  ;;  %s4281_s28 = scalar_lea.vmem %s4280_s17, 256 }
  0x68   : > { %s610_s12 = scalar_lea.hbm %s5403_s27, %s3435_s14  ;;  %p4282_p11 = scmp.lt.s32.totalorder %s613_s24, %s4280_s17 }
  0x69   : > { %p4278_p5 = pneg %p4277_p8  ;;  %p4283_p13 = scmp.lt.s32.totalorder %s4281_s28, %s4274_s15 }
  0x6b   : > { %p4284_p0 = por %p4283_p13, %p4282_p11 }
  0x6d   : > { %p4285_p10 = pnand %p4284_p0, %p4278_p5 }
  0x6f   : > { %4288 = shalt.err (!%p4285_p10)
}
  0x70   : > { %4013 = dma.hbm_to_vmem [thread:$0]  (!%p4669_p2), %s610_s12, 128, %s613_s24, %s600_s2  }
  0x71   : > { %637 = sbr.rel (%p4561_p3) target bundleno = 3884 (0xf2c), region = 96  ;;  %s4680_s7 = sand.u32 (!%p4561_p3), 1, %s4369_s30  }
  0x72   : > { %s3437_s0 = sshll.u32 (!%p4561_p3), %s4680_s7, 3  ;;  %s640_s14 = scalar_lea.sflag (!%p4561_p3), [#allocation5], %s4680_s7 }
  0x73   : > { %s4684_s27 = scalar_lea.vmem (!%p4561_p3), [#allocation4], %s3437_s0 }
  0x76   : > { %4348 = dma.done.wait (%p4639_p9), %s640_s14, 128  }
  0x77   : > { %4350 = vsyncadd (%p4639_p9), %s640_s14, 4294967168 }
  0x78   : > { %4352 = dma.done.wait (%p4556_p1), [#allocation8], 4096  }
  0x79   : > { %4354 = vsyncadd (%p4556_p1), [#allocation8], 4294963200 }
  0x7a   : > { %4356 = dma.done.wait (%p4556_p1), [#allocation11], 6144  }
  0x7b   : > { %4358 = vsyncadd (%p4556_p1), [#allocation11], 4294961152  ;;  %p724_p3 = scmp.lt.s32.totalorder %s4381_s1, 1  ;;  %s5405_s13 = sld [smem:[#allocation25_spill]] }
  0x7c   : > { %s5406_s15 = sld [smem:[#allocation24_spill]]  ;;  %s4710_s17 = scalar_lea.vmem [#allocation13], %s3437_s0 }
  0x7d   : > { %s725_s12 = scalar_select %p724_p3, %s4381_s1, 1 }
  0x7e   : > { %p3446_p1 = scmp.ne.s32.totalorder %s4377_s21, 0 }
  0x7f   : > { %s3976_s2 = smul.u32 24, %s725_s12  ;;  %s3480_s3 = sshll.u32 %s725_s12, 7 }
  0x80   : > { %737 = sbr.rel (%p3446_p1) target bundleno = 392 (0x188), region = 120 }
  0x81   : > { %s4703_s24 = scalar_lea.vmem %s5405_s13, %s3480_s3 }
  0x82   : > { %s4708_s9 = scalar_lea.vmem %s5406_s15, %s3976_s2 }
  0x85   : > { %v769_v0 = vld [vmem:[%s4703_s24 + $0x78] sm:$0xff]  ;;  %v768_v1 = vld [vmem:[%s4703_s24 + $0x70] sm:$0xff]  ;;  %v4402_v2 = vmov 0.0   ;;  %v767_v3 = vld [vmem:[%s4703_s24 + $0x68] sm:$0xff]  ;;  %vm4403_vm0 = vmmov 0   ;;  %v4404_v5 = vmov 0  }
  0x86   : > { %3664 = vmatprep.subr.mxu0 %v769_v0  ;;  %3720 = vmatprep.subr.mxu1 %v4402_v2  ;;  %v1046_v4 = vld [vmem:[#allocation9 + $0x78] sm:$0xff]  ;;  %v1045_v7 = vld [vmem:[#allocation9 + $0x70] sm:$0xff]  ;;  %v1044_v8 = vld [vmem:[#allocation9 + $0x68] sm:$0xff]  ;;  %vm1011_vm1 = vcmask 195584  }
  0x87   : > { %3665 = vmatpush3.msra.mxu0 %v769_v0  ;;  %3752 = vmatprep.mubr.msk.f32.mxu1 %vm4403_vm0, %v4402_v2  ;;  %v766_v6 = vld [vmem:[%s4703_s24 + $0x60] sm:$0xff]  ;;  %v765_v9 = vld [vmem:[%s4703_s24 + $0x58] sm:$0xff]  ;;  %v1043_v10 = vld [vmem:[#allocation9 + $0x60] sm:$0xff] }
  0x88   : > { %3666 = vmatprep.subr.mxu0 %v768_v1  ;;  %4108 = vset.pattern.permute.xlu1 %v4404_v5  ;;  %v764_v11 = vld [vmem:[%s4703_s24 + $0x50] sm:$0xff]  ;;  %v1042_v12 = vld [vmem:[#allocation9 + $0x58] sm:$0xff]  ;;  %v763_v13 = vld [vmem:[%s4703_s24 + $0x48] sm:$0xff] }
  0x89   : > { %3667 = vmatpush3.msra.mxu0 %v768_v1  ;;  %3721 = vmatpush3.msra.mxu1 %v1046_v4  ;;  %v738_v14 = vld [vmem:[#allocation7] sm:$0xff]  ;;  %v762_v15 = vld [vmem:[%s4703_s24 + $0x40] sm:$0xff]  ;;  %v1041_v16 = vld [vmem:[#allocation9 + $0x50] sm:$0xff] }
  0x8a   : > { %3668 = vmatprep.subr.mxu0 %v767_v3  ;;  %3722 = vmatprep.subr.mxu1 %v4402_v2  ;;  %v761_v17 = vld [vmem:[%s4703_s24 + $0x38] sm:$0xff]  ;;  %v1040_v18 = vld [vmem:[#allocation9 + $0x48] sm:$0xff]  ;;  %v1039_v20 = vld [vmem:[#allocation9 + $0x40] sm:$0xff] }
  0x8b   : > { %3669 = vmatpush3.msra.mxu0 %v767_v3  ;;  %3723 = vmatpush3.msra.mxu1 %v1045_v7  ;;  %v760_v19 = vld [vmem:[%s4703_s24 + $0x30] sm:$0xff]  ;;  %v759_v21 = vld [vmem:[%s4703_s24 + $0x28] sm:$0xff]  ;;  %v1038_v22 = vld [vmem:[#allocation9 + $0x38] sm:$0xff] }
  0x8c   : > { %3670 = vmatprep.subr.mxu0 %v766_v6  ;;  %3724 = vmatprep.subr.mxu1 %v4402_v2  ;;  %v758_v23 = vld [vmem:[%s4703_s24 + $0x20] sm:$0xff]  ;;  %v1037_v24 = vld [vmem:[#allocation9 + $0x30] sm:$0xff]  ;;  %v1036_v26 = vld [vmem:[#allocation9 + $0x28] sm:$0xff] }
  0x8d   : > { %3671 = vmatpush3.msra.mxu0 %v766_v6  ;;  %3725 = vmatpush3.msra.mxu1 %v1044_v8  ;;  %v757_v25 = vld [vmem:[%s4703_s24 + $0x18] sm:$0xff]  ;;  %v756_v27 = vld [vmem:[%s4703_s24 + $0x10] sm:$0xff]  ;;  %v1035_v28 = vld [vmem:[#allocation9 + $0x20] sm:$0xff] }
  0x8e   : > { %3672 = vmatprep.subr.mxu0 %v765_v9  ;;  %3726 = vmatprep.subr.mxu1 %v4402_v2  ;;  %v755_v29 = vld [vmem:[%s4703_s24 + $0x8] sm:$0xff]  ;;  %v1034_v30 = vld [vmem:[#allocation9 + $0x18] sm:$0xff]  ;;  %v1033_v32 = vld [vmem:[#allocation9 + $0x10] sm:$0xff] }
  0x8f   : > { %3673 = vmatpush3.msra.mxu0 %v765_v9  ;;  %3727 = vmatpush3.msra.mxu1 %v1043_v10  ;;  %v754_v31 = vld [vmem:[%s4703_s24] sm:$0xff]  ;;  %v739_v33 = vld [vmem:[#allocation7 + $0x8] sm:$0xff]  ;;  %v740_v35 = vld [vmem:[#allocation7 + $0x10] sm:$0xff] }
  0x90   : > { %3674 = vmatprep.subr.mxu0 %v764_v11  ;;  %3728 = vmatprep.subr.mxu1 %v4402_v2  ;;  %v1032_v34 = vld [vmem:[#allocation9 + $0x8] sm:$0xff]  ;;  %v1031_v36 = vld [vmem:[#allocation9] sm:$0xff]  ;;  %v1028_v37 = vld [vmem:[%s4708_s9] sm:$0xff] }
  0x91   : > { %3675 = vmatpush3.msra.mxu0 %v764_v11  ;;  %3729 = vmatpush3.msra.mxu1 %v1042_v12  ;;  %v772_v38 = vld [vmem:[%s5349_s8 + $0x10] sm:$0xff]  ;;  %v741_v39 = vld [vmem:[#allocation7 + $0x18] sm:$0xff]  ;;  %v742_v40 = vld [vmem:[#allocation7 + $0x20] sm:$0xff] }
  0x92   : > { %3676 = vmatprep.subr.mxu0 %v763_v13  ;;  %3730 = vmatprep.subr.mxu1 %v4402_v2  ;;  %v770_v41 = vld [vmem:[%s5349_s8] sm:$0xff]  ;;  %v1029_v42 = vld [vmem:[%s4708_s9 + $0x8] sm:$0xff]  ;;  %v773_v43 = vld [vmem:[%s5349_s8 + $0x18] sm:$0xff] }
  0x93   : > { %3677 = vmatpush3.msra.mxu0 %v763_v13  ;;  %3696 = vmatprep.mubr.f32.mxu0 %v738_v14  ;;  %v743_v44 = vld [vmem:[#allocation7 + $0x28] sm:$0xff]  ;;  %v744_v45 = vld [vmem:[#allocation7 + $0x30] sm:$0xff]  ;;  %v771_v46 = vld [vmem:[%s5349_s8 + $0x8] sm:$0xff] }
  0x94   : > { %3678 = vmatprep.subr.mxu0 %v762_v15  ;;  %3731 = vmatpush3.msra.mxu1 %v1041_v16  ;;  %v1030_v47 = vld [vmem:[%s4708_s9 + $0x10] sm:$0xff]  ;;  %v775_v48 = vld [vmem:[%s5349_s8 + $0x28] sm:$0xff]  ;;  %v745_v49 = vld [vmem:[#allocation7 + $0x38] sm:$0xff] }
  0x95   : > { %3679 = vmatpush3.msra.mxu0 %v762_v15  ;;  %3732 = vmatprep.subr.mxu1 %v4402_v2  ;;  %v746_v50 = vld [vmem:[#allocation7 + $0x40] sm:$0xff]  ;;  %v774_v51 = vld [vmem:[%s5349_s8 + $0x20] sm:$0xff]  ;;  %v777_v52 = vld [vmem:[%s5349_s8 + $0x38] sm:$0xff] }
  0x96   : > { %3680 = vmatprep.subr.mxu0 %v761_v17  ;;  %3733 = vmatpush3.msra.mxu1 %v1040_v18  ;;  %v747_v53 = vld [vmem:[#allocation7 + $0x48] sm:$0xff]  ;;  %v748_v54 = vld [vmem:[#allocation7 + $0x50] sm:$0xff]  ;;  %v779_v56 = vld [vmem:[%s5349_s8 + $0x48] sm:$0xff] }
  0x97   : > { %3681 = vmatpush3.msra.mxu0 %v761_v17  ;;  %3734 = vmatprep.subr.mxu1 %v4402_v2  ;;  %v776_v55 = vld [vmem:[%s5349_s8 + $0x30] sm:$0xff]  ;;  %v749_v57 = vld [vmem:[#allocation7 + $0x58] sm:$0xff]  ;;  %v750_v58 = vld [vmem:[#allocation7 + $0x60] sm:$0xff] }
  0x98   : > { %3682 = vmatprep.subr.mxu0 %v760_v19  ;;  %3735 = vmatpush3.msra.mxu1 %v1039_v20  ;;  %v778_v59 = vld [vmem:[%s5349_s8 + $0x40] sm:$0xff]  ;;  %v781_v60 = vld [vmem:[%s5349_s8 + $0x58] sm:$0xff]  ;;  %v751_v61 = vld [vmem:[#allocation7 + $0x68] sm:$0xff] }
  0x99   : > { %3683 = vmatpush3.msra.mxu0 %v760_v19  ;;  %3736 = vmatprep.subr.mxu1 %v4402_v2  ;;  %v752_v62 = vld [vmem:[#allocation7 + $0x70] sm:$0xff]  ;;  %v780_v63 = vld [vmem:[%s5349_s8 + $0x50] sm:$0xff]  ;;  %v783_v0 = vld [vmem:[%s5349_s8 + $0x68] sm:$0xff] }
  0x9a   : > { %3684 = vmatprep.subr.mxu0 %v759_v21  ;;  %3737 = vmatpush3.msra.mxu1 %v1038_v22  ;;  %v753_v1 = vld [vmem:[#allocation7 + $0x78] sm:$0xff]  ;;  %v785_v3 = vld [vmem:[%s5349_s8 + $0x78] sm:$0xff]  ;;  %v784_v4 = vld [vmem:[%s5349_s8 + $0x70] sm:$0xff] }
  0x9b   : > { %3685 = vmatpush3.msra.mxu0 %v759_v21  ;;  %3738 = vmatprep.subr.mxu1 %v4402_v2  ;;  %v3447_v13 = vld [vmem:[%s5351_s10] ss:$0 sm:$0xff] }
  0x9c   : > { %3686 = vmatprep.subr.mxu0 %v758_v23  ;;  %3739 = vmatpush3.msra.mxu1 %v1037_v24 }
  0x9d   : > { %3687 = vmatpush3.msra.mxu0 %v758_v23  ;;  %3740 = vmatprep.subr.mxu1 %v4402_v2 }
  0x9e   : > { %3688 = vmatprep.subr.mxu0 %v757_v25  ;;  %3741 = vmatpush3.msra.mxu1 %v1036_v26 }
  0x9f   : > { %3689 = vmatpush3.msra.mxu0 %v757_v25  ;;  %3742 = vmatprep.subr.mxu1 %v4402_v2 }
  0xa0   : > { %3690 = vmatprep.subr.mxu0 %v756_v27  ;;  %3743 = vmatpush3.msra.mxu1 %v1035_v28 }
  0xa1   : > { %3691 = vmatpush3.msra.mxu0 %v756_v27  ;;  %3744 = vmatprep.subr.mxu1 %v4402_v2 }
  0xa2   : > { %3692 = vmatprep.subr.mxu0 %v755_v29  ;;  %3745 = vmatpush3.msra.mxu1 %v1034_v30 }
  0xa3   : > { %3693 = vmatpush3.msra.mxu0 %v755_v29  ;;  %3746 = vmatprep.subr.mxu1 %v4402_v2 }
  0xa4   : > { %3694 = vmatprep.subr.mxu0 %v754_v31  ;;  %3747 = vmatpush3.msra.mxu1 %v1033_v32 }
  0xa5   : > { %3695 = vmatpush3.msra.mxu0 %v754_v31  ;;  %3748 = vmatprep.subr.mxu1 %v4402_v2 }
  0xa6   : > { %3697 = vmatmul.mubr.f32.vlgmr.msra.gmra.mxu0 %v739_v33  ;;  %3749 = vmatpush3.msra.mxu1 %v1032_v34 }
  0xa7   : > { %3699 = vmatprep.mubr.f32.mxu0 %v740_v35  ;;  %3750 = vmatprep.subr.mxu1 %v4402_v2 }
  0xa8   : > { %3751 = vmatpush3.msra.mxu1 %v1031_v36  ;;  %4107 = vset.pattern.permute.xlu0 %v4404_v5 }
  0xa9   : > { %3753 = vmatmul.mubr.f32.vlgmr.msra.gmra.mxu1 %v1028_v37  ;;  %798 = vperm.xlu1 %4108, %v772_v38  }
  0xaa   : > { %3700 = vmatmul.mubr.f32.gmra.mxu0 %v741_v39  ;;  %3755 = vmatprep.mubr.msk.f32.mxu1 %vm4403_vm0, %v4402_v2 }
  0xab   : > { %3702 = vmatprep.mubr.f32.mxu0 %v742_v40  ;;  %788 = vperm.xlu0 %4107, %v770_v41  }
  0xad   : > { %3756 = vmatmul.mubr.f32.gmra.mxu1 %v1029_v42  ;;  %803 = vperm.xlu1 %4108, %v773_v43  }
  0xae   : > { %3703 = vmatmul.mubr.f32.gmra.mxu0 %v743_v44  ;;  %3758 = vmatprep.mubr.msk.f32.mxu1 %vm4403_vm0, %v4402_v2  ;;  %v782_v2 = vld [vmem:[%s5349_s8 + $0x60] sm:$0xff] }
  0xaf   : > { %3705 = vmatprep.mubr.f32.mxu0 %v744_v45  ;;  %793 = vperm.xlu0 %4107, %v771_v46  }
  0xb1   : > { %3759 = vmatmul.mubr.f32.gmra.mxu1 %v1030_v47  ;;  %813 = vperm.xlu1 %4108, %v775_v48  }
  0xb2   : > { %3706 = vmatmul.mubr.f32.gmra.mxu0 %v745_v49 }
  0xb3   : > { %3708 = vmatprep.mubr.f32.mxu0 %v746_v50  ;;  %808 = vperm.xlu0 %4107, %v774_v51  }
  0xb5   : > { %823 = vperm.xlu1 %4108, %v777_v52  }
  0xb6   : > { %3709 = vmatmul.mubr.f32.gmra.mxu0 %v747_v53 }
  0xb7   : > { %3711 = vmatprep.mubr.f32.mxu0 %v748_v54  ;;  %818 = vperm.xlu0 %4107, %v776_v55  }
  0xb9   : > { %833 = vperm.xlu1 %4108, %v779_v56  }
  0xba   : > { %3712 = vmatmul.mubr.f32.gmra.mxu0 %v749_v57 }
  0xbb   : > { %3714 = vmatprep.mubr.f32.mxu0 %v750_v58  ;;  %828 = vperm.xlu0 %4107, %v778_v59  }
  0xbd   : > { %843 = vperm.xlu1 %4108, %v781_v60  }
  0xbe   : > { %3715 = vmatmul.mubr.f32.gmra.mxu0 %v751_v61 }
  0xbf   : > { %3717 = vmatprep.mubr.f32.mxu0 %v752_v62  ;;  %838 = vperm.xlu0 %4107, %v780_v63  }
  0xc1   : > { %853 = vperm.xlu1 %4108, %v783_v0  }
  0xc2   : > { %3718 = vmatmul.mubr.f32.gmra.mxu0 %v753_v1 }
  0xc3   : > { %848 = vperm.xlu0 %4107, %v782_v2  }
  0xc5   : > { %863 = vperm.xlu1 %4108, %v785_v3  }
  0xc7   : > { %858 = vperm.xlu0 %4107, %v784_v4  }
 0x124   : > { %v799_v5 = vpop.permute.xlu1 %798 }
 0x126   : > { %v789_v6 = vpop.permute.xlu0 %788 }
 0x128   : > { %v804_v7 = vpop.permute.xlu1 %803 }
 0x12a   : > { %v794_v8 = vpop.permute.xlu0 %793 }
 0x12c   : > { %v814_v9 = vpop.permute.xlu1 %813 }
 0x12e   : > { %v809_v10 = vpop.permute.xlu0 %808 }
 0x130   : > { %v824_v17 = vpop.permute.xlu1 %823 }
 0x132   : > { %v819_v22 = vpop.permute.xlu0 %818 }
 0x134   : > { %v834_v30 = vpop.permute.xlu1 %833 }
 0x136   : > { %v829_v34 = vpop.permute.xlu0 %828 }
 0x138   : > { %v844_v41 = vpop.permute.xlu1 %843 }
 0x13a   : > { %v839_v44 = vpop.permute.xlu0 %838 }
 0x13c   : > { %v854_v49 = vpop.permute.xlu1 %853 }
 0x13e   : > { %v849_v52 = vpop.permute.xlu0 %848 }
 0x140   : > { %v864_v57 = vpop.permute.xlu1 %863 }
 0x142   : > { %v859_v60 = vpop.permute.xlu0 %858 }
 0x166   : > { %v3698_v11 = vpop.f32.mrf.mxu0 }
 0x167   : > { %v938_v12 = vadd.f32 %v3698_v11, %v794_v8 }
 0x168   : > { %v932_v14 = vpop.f32.mrf.mxu0 }
 0x169   : > { %1013 = vst.msk [vmem:[#allocation2 + $0x8] sm:$0xff] %vm1011_vm1, %v938_v12  ;;  %v933_v15 = vadd.f32 %v932_v14, %v789_v6  ;;  %v1120_v16 = vpop.f32.mrf.mxu1 }
 0x16a   : > { %v3701_v18 = vpop.f32.mrf.mxu0  ;;  %v1121_v19 = vadd.f32 %v3447_v13, %v1120_v16 }
 0x16b   : > { %1012 = vst.msk [vmem:[#allocation2] sm:$0xff] %vm1011_vm1, %v933_v15  ;;  %v948_v20 = vadd.f32 %v3701_v18, %v804_v7  ;;  %v3754_v21 = vpop.f32.mrf.mxu1 }
 0x16c   : > { %v942_v23 = vpop.f32.mrf.mxu0  ;;  %1134 = vst [vmem:[#allocation3 + $0x10] sm:$0xff] %v1121_v19 }
 0x16d   : > { %1015 = vst.msk [vmem:[#allocation2 + $0x18] sm:$0xff] %vm1011_vm1, %v948_v20  ;;  %v943_v24 = vadd.f32 %v942_v23, %v799_v5  ;;  %v1125_v25 = vpop.f32.mrf.mxu1 }
 0x16e   : > { %v3704_v26 = vpop.f32.mrf.mxu0  ;;  %v1126_v27 = vadd.f32 %v3447_v13, %v1125_v25 }
 0x16f   : > { %1014 = vst.msk [vmem:[#allocation2 + $0x10] sm:$0xff] %vm1011_vm1, %v943_v24  ;;  %v958_v28 = vadd.f32 %v3704_v26, %v814_v9  ;;  %v3757_v29 = vpop.f32.mrf.mxu1 }
 0x170   : > { %v952_v31 = vpop.f32.mrf.mxu0  ;;  %1135 = vst [vmem:[#allocation3] sm:$0xff] %v1126_v27 }
 0x171   : > { %1017 = vst.msk [vmem:[#allocation2 + $0x28] sm:$0xff] %vm1011_vm1, %v958_v28  ;;  %v953_v32 = vadd.f32 %v952_v31, %v809_v10  ;;  %v1130_v33 = vpop.f32.mrf.mxu1 }
 0x172   : > { %v3707_v35 = vpop.f32.mrf.mxu0  ;;  %v1131_v36 = vadd.f32 %v3447_v13, %v1130_v33 }
 0x173   : > { %1016 = vst.msk [vmem:[#allocation2 + $0x20] sm:$0xff] %vm1011_vm1, %v953_v32  ;;  %v968_v37 = vadd.f32 %v3707_v35, %v824_v17  ;;  %v3760_v38 = vpop.f32.mrf.mxu1 }
 0x174   : > { %v962_v39 = vpop.f32.mrf.mxu0  ;;  %1136 = vst [vmem:[#allocation3 + $0x8] sm:$0xff] %v1131_v36 }
 0x175   : > { %1019 = vst.msk [vmem:[#allocation2 + $0x38] sm:$0xff] %vm1011_vm1, %v968_v37  ;;  %v963_v40 = vadd.f32 %v962_v39, %v819_v22 }
 0x176   : > { %v3710_v42 = vpop.f32.mrf.mxu0 }
 0x177   : > { %1018 = vst.msk [vmem:[#allocation2 + $0x30] sm:$0xff] %vm1011_vm1, %v963_v40  ;;  %v978_v43 = vadd.f32 %v3710_v42, %v834_v30 }
 0x178   : > { %v972_v45 = vpop.f32.mrf.mxu0 }
 0x179   : > { %1021 = vst.msk [vmem:[#allocation2 + $0x48] sm:$0xff] %vm1011_vm1, %v978_v43  ;;  %v973_v46 = vadd.f32 %v972_v45, %v829_v34 }
 0x17a   : > { %v3713_v47 = vpop.f32.mrf.mxu0 }
 0x17b   : > { %1020 = vst.msk [vmem:[#allocation2 + $0x40] sm:$0xff] %vm1011_vm1, %v973_v46  ;;  %v988_v48 = vadd.f32 %v3713_v47, %v844_v41 }
 0x17c   : > { %v982_v50 = vpop.f32.mrf.mxu0 }
 0x17d   : > { %1023 = vst.msk [vmem:[#allocation2 + $0x58] sm:$0xff] %vm1011_vm1, %v988_v48  ;;  %v983_v51 = vadd.f32 %v982_v50, %v839_v44 }
 0x17e   : > { %v3716_v53 = vpop.f32.mrf.mxu0 }
 0x17f   : > { %1022 = vst.msk [vmem:[#allocation2 + $0x50] sm:$0xff] %vm1011_vm1, %v983_v51  ;;  %v998_v54 = vadd.f32 %v3716_v53, %v854_v49 }
 0x180   : > { %v992_v55 = vpop.f32.mrf.mxu0 }
 0x181   : > { %1025 = vst.msk [vmem:[#allocation2 + $0x68] sm:$0xff] %vm1011_vm1, %v998_v54  ;;  %v993_v56 = vadd.f32 %v992_v55, %v849_v52 }
 0x182   : > { %v3719_v58 = vpop.f32.mrf.mxu0 }
 0x183   : > { %1024 = vst.msk [vmem:[#allocation2 + $0x60] sm:$0xff] %vm1011_vm1, %v993_v56  ;;  %v1008_v59 = vadd.f32 %v3719_v58, %v864_v57 }
 0x184   : > { %v1002_v61 = vpop.f32.mrf.mxu0 }
 0x185   : > { %1027 = vst.msk [vmem:[#allocation2 + $0x78] sm:$0xff] %vm1011_vm1, %v1008_v59  ;;  %v1003_v62 = vadd.f32 %v1002_v61, %v859_v60 }
 0x187   : > { %1026 = vst.msk [vmem:[#allocation2 + $0x70] sm:$0xff] %vm1011_vm1, %v1003_v62 }
 0x188 PF: > { %v4824_v63 = vld [vmem:[%s4684_s27] sm:$0xff]  ;;  %v4405_v4 = vmov 0.0   ;;  %v1187_v6 = vld [vmem:[%s5346_s5 + $0x70] sm:$0xff]  ;;  %v1186_v7 = vld [vmem:[%s5346_s5 + $0x68] sm:$0xff]  ;;  %vm4406_vm2 = vmmov 0   ;;  %s5407_s27 = sld [smem:[#allocation26_spill]] }
 0x189   : > { %1140 = vadd.xlane.f32.xlu0 %v4824_v63  ;;  %3761 = vmatprep.subr.mxu0 %v4405_v4  ;;  %v1188_v5 = vld [vmem:[%s5346_s5 + $0x78] sm:$0xff]  ;;  %v1185_v8 = vld [vmem:[%s5346_s5 + $0x60] sm:$0xff]  ;;  %v1183_v10 = vld [vmem:[%s5346_s5 + $0x50] sm:$0xff]  ;;  %s4407_s16 = smov 112   ;;  %vm1278_vm5 = vcmask 261120   ;;  %vm1352_vm6 = vcmask 130048  }
 0x18a   : > { %3796 = vmatprep.subr.mxu1 %v4405_v4  ;;  %3762 = vmatpush3.msra.mxu0 %v1188_v5  ;;  %v1184_v9 = vld [vmem:[%s5346_s5 + $0x58] sm:$0xff]  ;;  %v1182_v11 = vld [vmem:[%s5346_s5 + $0x48] sm:$0xff]  ;;  %v1181_v12 = vld [vmem:[%s5346_s5 + $0x40] sm:$0xff]  ;;  %s4408_s19 = smov 96   ;;  %s4409_s18 = smov 64   ;;  %vm1529_vm7 = vcmask 64512  }
 0x18b   : > { %3763 = vmatprep.subr.mxu0 %v4405_v4  ;;  %3793 = vmatprep.mubr.msk.f32.mxu0 %vm4406_vm2, %v4405_v4  ;;  %v1180_v13 = vld [vmem:[%s5346_s5 + $0x38] sm:$0xff]  ;;  %v1179_v14 = vld [vmem:[%s5346_s5 + $0x30] sm:$0xff]  ;;  %v1178_v15 = vld [vmem:[%s5346_s5 + $0x28] sm:$0xff]  ;;  %s4410_s15 = smov 32   ;;  %s5408_s28 = sld [smem:[#allocation30_spill]] }
 0x18c   : > { %3764 = vmatpush3.msra.mxu0 %v1187_v6  ;;  %3804 = vmatprep.mubr.msk.f32.mxu1 %vm4406_vm2, %v4405_v4  ;;  %v1177_v16 = vld [vmem:[%s5346_s5 + $0x20] sm:$0xff]  ;;  %v1176_v17 = vld [vmem:[%s5346_s5 + $0x18] sm:$0xff]  ;;  %v1175_v18 = vld [vmem:[%s5346_s5 + $0x10] sm:$0xff]  ;;  %s5409_s12 = sld [smem:[#allocation33_spill]]  ;;  %s3476_s25 = sshll.u32 %s4381_s1, 1 }
 0x18d   : > { %3765 = vmatprep.subr.mxu0 %v4405_v4  ;;  %v1174_v19 = vld [vmem:[%s5346_s5 + $0x8] sm:$0xff]  ;;  %v1173_v20 = vld [vmem:[%s5346_s5] sm:$0xff]  ;;  %v1277_v21 = vld [vmem:[#allocation2 + $0x18] sm:$0xff]  ;;  %s5412_s9 = sld [smem:[#allocation34_spill]]  ;;  %s3274_s0 = sadd.s32 %s4377_s21, %s3476_s25 }
 0x18e   : > { %3766 = vmatpush3.msra.mxu0 %v1186_v7  ;;  %v1276_v22 = vld [vmem:[#allocation2 + $0x10] sm:$0xff]  ;;  %3797 = vmatpush3.msra.mxu1 %v1277_v21  ;;  %v3448_v31 = vld [vmem:[%s5407_s27] ss:$0 sm:$0xff]  ;;  %v1275_v37 = vld [vmem:[#allocation2 + $0x8] sm:$0xff]  ;;  %s5414_s27 = sld [smem:[#allocation36_spill]]  ;;  %s3477_s3 = sshll.u32 %s3274_s0, 7 }
 0x18f   : > { %3767 = vmatprep.subr.mxu0 %v4405_v4  ;;  %3798 = vmatprep.subr.mxu1 %v4405_v4  ;;  %v3449_v34 = vld [vmem:[%s5345_s4] ss:$0 sm:$0xff]  ;;  %v1704_v46 = vld [vmem:[#allocation2 + $0x38] sm:$0xff]  ;;  %v1703_v47 = vld [vmem:[#allocation2 + $0x30] sm:$0xff]  ;;  %s3278_s29 = sshll.u32 %s4710_s17, 4  ;;  %s5415_s24 = sld [smem:[#allocation37_spill]]  ;;  %s3279_s29 = int_to_ptr.vmem [resolvable:$true] %s3278_s29 }
 0x190   : > { %3768 = vmatpush3.msra.mxu0 %v1185_v8  ;;  %3799 = vmatpush3.msra.mxu1 %v1276_v22  ;;  %v1274_v38 = vld [vmem:[#allocation2] sm:$0xff]  ;;  %v4930_v48 = vld [vmem:[#allocation2 + $0x28] sm:$0xff]  ;;  %v4937_v51 = vld [vmem:[#allocation3 + $0x10] sm:$0xff]  ;;  %s3263_s1 = scalar_lea.sflag [#allocation6], %s4680_s7  ;;  %s4411_s21 = smov [#allocation13]  }
 0x191   : > { %3769 = vmatprep.subr.mxu0 %v4405_v4  ;;  %3800 = vmatprep.subr.mxu1 %v4405_v4  ;;  %v3450_v39 = vld [vmem:[%s5347_s6] ss:$0 sm:$0xff]  ;;  %v4964_v62 = vld [vmem:[#allocation3 + $0x8] sm:$0xff]  ;;  %v4998_v5 = vld [vmem:[#allocation2 + $0x70] sm:$0xff] }
 0x192   : > { %3770 = vmatpush3.msra.mxu0 %v1184_v9  ;;  %3801 = vmatpush3.msra.mxu1 %v1275_v37  ;;  %v1701_v49 = vld [vmem:[#allocation2 + $0x20] sm:$0xff]  ;;  %v5002_v6 = vld [vmem:[#allocation2 + $0x68] sm:$0xff] }
 0x193   : > { %3771 = vmatprep.subr.mxu0 %v4405_v4  ;;  %3802 = vmatprep.subr.mxu1 %v4405_v4  ;;  %v4935_v50 = vld [vmem:[#allocation3] sm:$0xff] }
 0x194   : > { %3772 = vmatpush3.msra.mxu0 %v1183_v10  ;;  %3803 = vmatpush3.msra.mxu1 %v1274_v38  ;;  %v5006_v7 = vld [vmem:[#allocation2 + $0x60] sm:$0xff] }
 0x195   : > { %3773 = vmatprep.subr.mxu0 %v4405_v4  ;;  %3807 = vmatprep.subr.mxu1 %v4405_v4 }
 0x196   : > { %3774 = vmatpush3.msra.mxu0 %v1182_v11  ;;  %1453 = vrot.lane.b32.xlu1 %v1277_v21, %s4407_s16 }
 0x197   : > { %3775 = vmatprep.subr.mxu0 %v4405_v4 }
 0x198   : > { %3776 = vmatpush3.msra.mxu0 %v1181_v12 }
 0x199   : > { %3777 = vmatprep.subr.mxu0 %v4405_v4 }
 0x19a   : > { %3778 = vmatpush3.msra.mxu0 %v1180_v13  ;;  %1449 = vrot.lane.b32.xlu1 %v1275_v37, %s4407_s16  ;;  %v1625_v37 = vld [vmem:[#allocation10 + $0x10] sm:$0xff] }
 0x19b   : > { %3779 = vmatprep.subr.mxu0 %v4405_v4 }
 0x19c   : > { %3780 = vmatpush3.msra.mxu0 %v1179_v14 }
 0x19d   : > { %3781 = vmatprep.subr.mxu0 %v4405_v4 }
 0x19e   : > { %3782 = vmatpush3.msra.mxu0 %v1178_v15 }
 0x19f   : > { %3783 = vmatprep.subr.mxu0 %v4405_v4 }
 0x1a0   : > { %3784 = vmatpush3.msra.mxu0 %v1177_v16 }
 0x1a1   : > { %3785 = vmatprep.subr.mxu0 %v4405_v4 }
 0x1a2   : > { %3786 = vmatpush3.msra.mxu0 %v1176_v17 }
 0x1a3   : > { %3787 = vmatprep.subr.mxu0 %v4405_v4 }
 0x1a4   : > { %3788 = vmatpush3.msra.mxu0 %v1175_v18 }
 0x1a5   : > { %3789 = vmatprep.subr.mxu0 %v4405_v4 }
 0x1a6   : > { %3790 = vmatpush3.msra.mxu0 %v1174_v19 }
 0x1a7   : > { %3791 = vmatprep.subr.mxu0 %v4405_v4 }
 0x1a8   : > { %3792 = vmatpush3.msra.mxu0 %v1173_v20 }
 0x1a9   : > { %3841 = vmatprep.subr.mxu0 %v4405_v4 }
 0x208   : > { %v1454_v52 = vpop.permute.xlu1 %1453 }
 0x20c   : > { %v1450_v53 = vpop.permute.xlu1 %1449 }
 0x212   : > { %v1141_v0 = vpop.xlane.xlu0 %1140 }
 0x213   : > { %v1143_v1 = vmul.f32 0.0078125, %v1141_v0  ;;  %v4980_v0 = vld [vmem:[#allocation2 + $0x58] sm:$0xff] }
 0x215   : > { %v4828_v2 = vsub.f32 %v4824_v63, %v1143_v1  ;;  %v4984_v1 = vld [vmem:[#allocation2 + $0x50] sm:$0xff] }
 0x217   : > { %v1145_v3 = vmul.f32 %v4828_v2, %v4828_v2  ;;  %v1164_v32 = vmul.f32 %v3448_v31, %v4828_v2  ;;  %v4988_v2 = vld [vmem:[#allocation2 + $0x48] sm:$0xff] }
 0x219   : > { %1146 = vadd.xlane.f32.xlu0 %v1145_v3  ;;  %v4992_v3 = vld [vmem:[#allocation2 + $0x40] sm:$0xff] }
 0x22f   : > { %1451 = vrot.lane.b32.xlu0 %v1276_v22, %s4407_s16 }
 0x2a2   : > { %v1147_v23 = vpop.xlane.xlu0 %1146 }
 0x2a3   : > { %v1148_v24 = vmul.f32 0.007874016, %v1147_v23 }
 0x2a5   : > { %4109 = vrsqrt.f32 %v1148_v24  ;;  %vm1151_vm3 = vcmp.eq.f32.partialorder %v1148_v24, inf  ;;  %v1154_v27 = vand.u32 2147483648, %v1148_v24  ;;  %vm1153_vm4 = vcmp.eq.f32.partialorder %v1148_v24, 0.0 }
 0x2a6   : > { %v1452_v61 = vpop.permute.xlu0 %1451 }
 0x2b2   : > { %v4110_v25 = vpop.eup %4109 }
 0x2b3   : > { %v1150_v26 = vmul.f32 %v4110_v25, %v1148_v24 }
 0x2b5   : > { %v1152_v28 = vsel %vm1151_vm3, %v1148_v24, %v1150_v26 }
 0x2b6   : > { %v1155_v29 = vsel %vm1153_vm4, %v1154_v27, %v1152_v28 }
 0x2b7   : > { %v1156_v30 = vadd.f32 1e-06, %v1155_v29 }
 0x2b9   : > { %4111 = vrcp.f32 %v1156_v30 }
 0x2c6   : > { %v4112_v33 = vpop.eup %4111 }
 0x2c7   : > { %v1165_v35 = vmul.f32 %v4112_v33, %v1164_v32 }
 0x2c9   : > { %v1172_v36 = vadd.f32 %v3449_v34, %v1165_v35 }
 0x2cb   : > { %3794 = vmatmul.mubr.f32.vlgmr.msra.gmra.mxu0 %v1172_v36  ;;  %v1626_v36 = vld [vmem:[#allocation10 + $0x18] sm:$0xff] }
 0x2cc   : > { %3849 = vmatprep.mubr.msk.f32.mxu0 %vm4406_vm2, %v4405_v4  ;;  %3842 = vmatpush3.msra.mxu0 %v1704_v46 }
 0x2cd   : > { %3843 = vmatprep.subr.mxu0 %v4405_v4 }
 0x2ce   : > { %3844 = vmatpush3.msra.mxu0 %v1703_v47 }
 0x2cf   : > { %3845 = vmatprep.subr.mxu0 %v4405_v4 }
 0x2d0   : > { %3846 = vmatpush3.msra.mxu0 %v4930_v48 }
 0x2d1   : > { %3847 = vmatprep.subr.mxu0 %v4405_v4 }
 0x2d2   : > { %3848 = vmatpush3.msra.mxu0 %v1701_v49 }
 0x2d3   : > { %3875 = vmatprep.subr.mxu0 %v4405_v4 }
 0x38b   : > { %v1262_v40 = vpop.f32.mrf.mxu0 }
 0x38c   : > { %v4921_v41 = vadd.f32 %v3450_v39, %v1262_v40  ;;  %v1623_v39 = vld [vmem:[#allocation10] sm:$0xff] }
 0x38d   : > { %v3795_v42 = vpop.f32.mrf.mxu0 }
 0x38e   : > { %3805 = vmatmul.mubr.msk.f32.vlgmr.msra.gmra.mxu1 %vm1278_vm5, %v4921_v41 }
 0x38f   : > { %3811 = vmatprep.mubr.msk.f32.mxu1 %vm4406_vm2, %v4405_v4  ;;  %3808 = vmatpush3.msra.mxu1 %v4935_v50 }
 0x390   : > { %3809 = vmatprep.subr.mxu1 %v4405_v4 }
 0x391   : > { %3810 = vmatpush3.msra.mxu1 %v4937_v51 }
 0x392   : > { %3814 = vmatprep.subr.mxu1 %v4405_v4 }
 0x44e   : > { %v1348_v43 = vpop.f32.mrf.mxu1 }
 0x44f   : > { %v1353_v44 = vsel %vm1352_vm6, %v1348_v43, -inf }
 0x450   : > { %1354 = vmax.xlane.f32.xlu1 %v1353_v44  ;;  %v3806_v45 = vpop.f32.mrf.mxu1 }
 0x461   : > { %1447 = vrot.lane.b32.xlu1 %v1274_v38, %s4407_s16  ;;  %v1624_v38 = vld [vmem:[#allocation10 + $0x8] sm:$0xff] }
 0x465   : > { %1705 = vrot.lane.b32.xlu1 %v4921_v41, %s4408_s19 }
 0x4d9   : > { %v4946_v54 = vpop.xlane.xlu1 %1354 }
 0x4da   : > { %v1359_v55 = vsub.f32 %v1348_v43, %v4946_v54  ;;  %v1356_v16 = vsub.f32 -inf, %v4946_v54 }
 0x4dc   : > { %v1360_v56 = vmul.f32 1.442695, %v1359_v55  ;;  %v1357_v17 = vmul.f32 1.442695, %v1356_v16 }
 0x4dd   : > { %v1448_v57 = vpop.permute.xlu1 %1447 }
 0x4de   : > { %4113 = vpow2.f32 %v1360_v56 }
 0x4df   : > { %4115 = vpow2.f32 %v1357_v17 }
 0x4e1   : > { %v4949_v58 = vpop.permute.xlu1 %1705 }
 0x4e2   : > { %3850 = vmatmul.mubr.msk.f32.vlgmr.msra.gmra.mxu0 %vm1278_vm5, %v4949_v58 }
 0x4e3   : > { %3883 = vmatprep.mubr.msk.f32.mxu0 %vm4406_vm2, %v4405_v4 }
 0x4eb   : > { %v4114_v59 = vpop.eup %4113 }
 0x4ec   : > { %3812 = vmatmul.mubr.msk.f32.vlgmr.msra.gmra.mxu1 %vm1352_vm6, %v4114_v59  ;;  %v1363_v60 = vsel %vm1352_vm6, %v4114_v59, 0.0  ;;  %v4116_v27 = vpop.eup %4115 }
 0x4ed   : > { %3815 = vmatpush3.msra.mxu1 %v1454_v52  ;;  %1364 = vadd.xlane.f32.xlu1 %v1363_v60  ;;  %v1362_v28 = vmul.f32 0.0, %v4116_v27 }
 0x4ee   : > { %3816 = vmatprep.subr.mxu1 %v4405_v4  ;;  %3822 = vmatprep.mubr.msk.f32.mxu1 %vm4406_vm2, %v4405_v4 }
 0x4ef   : > { %3817 = vmatpush3.msra.mxu1 %v1452_v61 }
 0x4f0   : > { %3818 = vmatprep.subr.mxu1 %v4405_v4 }
 0x4f1   : > { %3819 = vmatpush3.msra.mxu1 %v1450_v53 }
 0x4f2   : > { %3820 = vmatprep.subr.mxu1 %v4405_v4 }
 0x4f3   : > { %3821 = vmatpush3.msra.mxu1 %v1448_v57 }
 0x4f4   : > { %3823 = vmatmul.mubr.msk.f32.vlgmr.msra.gmra.mxu1 %vm1278_vm5, %v4921_v41  ;;  %3825 = vmatprep.subr.mxu1 %v4405_v4 }
 0x4f5   : > { %3826 = vmatpush3.msra.mxu1 %v4964_v62  ;;  %3827 = vmatprep.mubr.msk.f32.mxu1 %vm4406_vm2, %v4405_v4 }
 0x4f6   : > { %3830 = vmatprep.subr.mxu1 %v4405_v4 }
 0x4fe   : > { %1795 = vrot.lane.b32.xlu1 %v4937_v51, %s4408_s19 }
 0x502   : > { %1885 = vrot.lane.b32.xlu1 %v1704_v46, %s4407_s16 }
 0x506   : > { %1883 = vrot.lane.b32.xlu1 %v1703_v47, %s4407_s16 }
 0x50a   : > { %1879 = vrot.lane.b32.xlu1 %v1701_v49, %s4407_s16 }
 0x50e   : > { %1978 = vrot.lane.b32.xlu1 %v4964_v62, %s4408_s19 }
 0x512   : > { %2140 = vrot.lane.b32.xlu1 %v4921_v41, %s4409_s18 }
 0x516   : > { %2318 = vrot.lane.b32.xlu1 %v4980_v0, %s4407_s16 }
 0x51a   : > { %2316 = vrot.lane.b32.xlu1 %v4984_v1, %s4407_s16 }
 0x51e   : > { %2314 = vrot.lane.b32.xlu1 %v4988_v2, %s4407_s16 }
 0x522   : > { %2312 = vrot.lane.b32.xlu1 %v4992_v3, %s4407_s16 }
 0x526   : > { %2572 = vrot.lane.b32.xlu1 %v4921_v41, %s4410_s15 }
 0x52a   : > { %2748 = vrot.lane.b32.xlu1 %v4998_v5, %s4407_s16 }
 0x52e   : > { %2746 = vrot.lane.b32.xlu1 %v5002_v6, %s4407_s16 }
 0x532   : > { %2744 = vrot.lane.b32.xlu1 %v5006_v7, %s4407_s16 }
 0x576   : > { %v1365_v40 = vpop.xlane.xlu1 %1364 }
 0x577   : > { %v1366_v41 = vadd.f32 %v1365_v40, %v1362_v28 }
 0x57a   : > { %v1796_v45 = vpop.permute.xlu1 %1795 }
 0x57e   : > { %v1886_v46 = vpop.permute.xlu1 %1885 }
 0x582   : > { %v1884_v55 = vpop.permute.xlu1 %1883 }
 0x586   : > { %v1880_v56 = vpop.permute.xlu1 %1879 }
 0x58a   : > { %v1979_v59 = vpop.permute.xlu1 %1978 }
 0x5a2   : > { %v1775_v8 = vpop.f32.mrf.mxu0 }
 0x5a3   : > { %v1779_v15 = vsel %vm1352_vm6, %v1775_v8, -inf }
 0x5a4   : > { %v3851_v9 = vpop.f32.mrf.mxu0 }
 0x5ac   : > { %v1438_v10 = vpop.f32.mrf.mxu1 }
 0x5ad   : > { %v1442_v29 = vadd.f32 %v1438_v10, %v1362_v28 }
 0x5ae   : > { %v3813_v11 = vpop.f32.mrf.mxu1 }
 0x5b4   : > { %v1525_v12 = vpop.f32.mrf.mxu1 }
 0x5b5   : > { %v1530_v13 = vsel %vm1529_vm7, %v1525_v12, -inf }
 0x5b6   : > { %1531 = vmax.xlane.f32.xlu0 %v1530_v13  ;;  %v3824_v14 = vpop.f32.mrf.mxu1  ;;  %v2571_v13 = vld [vmem:[#allocation2 + $0x78] sm:$0xff] }
 0x5ba   : > { %1780 = vmax.xlane.f32.xlu0 %v1779_v15 }
 0x63f   : > { %v1532_v18 = vpop.xlane.xlu0 %1531 }
 0x640   : > { %v1533_v19 = vmax.f32 %v4946_v54, %v1532_v18 }
 0x642   : > { %v1534_v20 = vsub.f32 %v4946_v54, %v1533_v19  ;;  %v1537_v21 = vsub.f32 %v1525_v12, %v1533_v19 }
 0x643   : > { %v5015_v22 = vpop.xlane.xlu0 %1780 }
 0x644   : > { %v1535_v23 = vmul.f32 1.442695, %v1534_v20  ;;  %v1538_v24 = vmul.f32 1.442695, %v1537_v21  ;;  %v1785_v25 = vsub.f32 %v1775_v8, %v5015_v22  ;;  %v2141_v21 = vpop.permute.xlu1 %2140 }
 0x646   : > { %4117 = vpow2.f32 %v1535_v23  ;;  %v1786_v26 = vmul.f32 1.442695, %v1785_v25 }
 0x647   : > { %4119 = vpow2.f32 %v1538_v24 }
 0x648   : > { %4121 = vpow2.f32 %v1786_v26  ;;  %v2319_v23 = vpop.permute.xlu1 %2318 }
 0x64c   : > { %v2317_v26 = vpop.permute.xlu1 %2316 }
 0x653   : > { %v4118_v30 = vpop.eup %4117 }
 0x654   : > { %v4120_v31 = vpop.eup %4119  ;;  %v1545_v32 = vmul.f32 %v4118_v30, %v1442_v29  ;;  %v1540_v43 = vmul.f32 %v4118_v30, %v1366_v41 }
 0x655   : > { %v4122_v33 = vpop.eup %4121  ;;  %3828 = vmatmul.mubr.msk.f32.vlgmr.msra.gmra.mxu1 %vm1529_vm7, %v4120_v31  ;;  %v1541_v34 = vsel %vm1529_vm7, %v4120_v31, 0.0  ;;  %v2315_v31 = vpop.permute.xlu1 %2314 }
 0x656   : > { %1542 = vadd.xlane.f32.xlu0 %v1541_v34  ;;  %v1789_v35 = vsel %vm1352_vm6, %v4122_v33, 0.0  ;;  %3838 = vmatprep.mubr.msk.f32.mxu1 %vm4406_vm2, %v4405_v4  ;;  %v2058_v34 = vld [vmem:[#allocation10 + $0x20] sm:$0xff] }
 0x657   : > { %1790 = vadd.xlane.f32.xlu1 %v1789_v35  ;;  %3831 = vmatpush3.msra.mxu1 %v1626_v36 }
 0x658   : > { %3832 = vmatprep.subr.mxu1 %v4405_v4 }
 0x659   : > { %3833 = vmatpush3.msra.mxu1 %v1625_v37 }
 0x65a   : > { %3834 = vmatprep.subr.mxu1 %v4405_v4 }
 0x65b   : > { %3835 = vmatpush3.msra.mxu1 %v1624_v38 }
 0x65c   : > { %3836 = vmatprep.subr.mxu1 %v4405_v4 }
 0x65d   : > { %3837 = vmatpush3.msra.mxu1 %v1623_v39 }
 0x65e   : > { %3852 = vmatprep.subr.mxu1 %v4405_v4 }
 0x668   : > { %2228 = vrot.lane.b32.xlu1 %v4937_v51, %s4409_s18 }
 0x66c   : > { %1797 = vrot.lane.b32.xlu0 %v4935_v50, %s4408_s19  ;;  %s5411_s19 = sld [smem:[#allocation32_spill]] }
 0x670   : > { %1881 = vrot.lane.b32.xlu0 %v4930_v48, %s4407_s16 }
 0x6df   : > { %v1543_v42 = vpop.xlane.xlu0 %1542 }
 0x6e0   : > { %v1544_v44 = vadd.f32 %v1543_v42, %v1540_v43 }
 0x6e2   : > { %4123 = vrcp.f32 %v1544_v44 }
 0x6e3   : > { %v1798_v54 = vpop.permute.xlu0 %1797 }
 0x6e7   : > { %v1882_v57 = vpop.permute.xlu0 %1881 }
 0x6ef   : > { %v4124_v52 = vpop.eup %4123 }
 0x715   : > { %v1616_v47 = vpop.f32.mrf.mxu1 }
 0x716   : > { %v1620_v49 = vadd.f32 %v1616_v47, %v1545_v32  ;;  %v2313_v32 = vpop.permute.xlu1 %2312 }
 0x717   : > { %v3829_v48 = vpop.f32.mrf.mxu1 }
 0x718   : > { %v1622_v53 = vmul.f32 %v4124_v52, %v1620_v49 }
 0x71a   : > { %3839 = vmatmul.mubr.msk.f32.vlgmr.msra.gmra.mxu1 %vm1278_vm5, %v1622_v53 }
 0x71b   : > { %3853 = vmatpush3.msra.mxu1 %v1798_v54  ;;  %3856 = vmatprep.mubr.msk.f32.mxu1 %vm4406_vm2, %v4405_v4 }
 0x71c   : > { %3854 = vmatprep.subr.mxu1 %v4405_v4 }
 0x71d   : > { %3855 = vmatpush3.msra.mxu1 %v1796_v45 }
 0x71e   : > { %3859 = vmatprep.subr.mxu1 %v4405_v4  ;;  %3857 = vmatmul.mubr.msk.f32.vlgmr.msra.gmra.mxu1 %vm1352_vm6, %v4122_v33 }
 0x71f   : > { %3860 = vmatpush3.msra.mxu1 %v1886_v46  ;;  %3867 = vmatprep.mubr.msk.f32.mxu1 %vm4406_vm2, %v4405_v4 }
 0x720   : > { %3861 = vmatprep.subr.mxu1 %v4405_v4 }
 0x721   : > { %3862 = vmatpush3.msra.mxu1 %v1884_v55 }
 0x722   : > { %3863 = vmatprep.subr.mxu1 %v4405_v4 }
 0x723   : > { %3864 = vmatpush3.msra.mxu1 %v1882_v57 }
 0x724   : > { %3865 = vmatprep.subr.mxu1 %v4405_v4 }
 0x725   : > { %3866 = vmatpush3.msra.mxu1 %v1880_v56 }
 0x726   : > { %3868 = vmatmul.mubr.msk.f32.vlgmr.msra.gmra.mxu1 %vm1278_vm5, %v4949_v58  ;;  %3870 = vmatprep.subr.mxu1 %v4405_v4  ;;  %v1782_v58 = vsub.f32 -inf, %v5015_v22 }
 0x727   : > { %3871 = vmatpush3.msra.mxu1 %v1979_v59  ;;  %3872 = vmatprep.mubr.msk.f32.mxu1 %vm4406_vm2, %v4405_v4 }
 0x728   : > { %3886 = vmatprep.subr.mxu1 %v4405_v4  ;;  %v1783_v14 = vmul.f32 1.442695, %v1782_v58 }
 0x72a   : > { %4125 = vpow2.f32 %v1783_v14 }
 0x737   : > { %v4126_v24 = vpop.eup %4125 }
 0x738   : > { %v5057_v25 = vmul.f32 0.0, %v4126_v24 }
 0x7da   : > { %v5050_v60 = vpop.f32.mrf.mxu1 }
 0x7dc   : > { %v3840_v61 = vpop.f32.mrf.mxu1 }
 0x7de   : > { %v1870_v8 = vpop.f32.mrf.mxu1 }
 0x7df   : > { %v1874_v27 = vadd.f32 %v1870_v8, %v5057_v25 }
 0x7e0   : > { %v3858_v9 = vpop.f32.mrf.mxu1 }
 0x7e6   : > { %v1957_v10 = vpop.f32.mrf.mxu1 }
 0x7e7   : > { %v1961_v11 = vsel %vm1529_vm7, %v1957_v10, -inf }
 0x7e8   : > { %1962 = vmax.xlane.f32.xlu0 %v1961_v11  ;;  %v3869_v12 = vpop.f32.mrf.mxu1 }
 0x7fe   : > { %2750 = vrot.lane.b32.xlu0 %v2571_v13, %s4407_s16  ;;  %s5410_s16 = sld [smem:[#allocation31_spill]] }
 0x871   : > { %v1963_v15 = vpop.xlane.xlu0 %1962 }
 0x872   : > { %v1964_v16 = vmax.f32 %v5015_v22, %v1963_v15 }
 0x874   : > { %v1965_v17 = vsub.f32 %v5015_v22, %v1964_v16  ;;  %v1968_v18 = vsub.f32 %v1957_v10, %v1964_v16 }
 0x876   : > { %v1966_v19 = vmul.f32 1.442695, %v1965_v17  ;;  %v1969_v20 = vmul.f32 1.442695, %v1968_v18 }
 0x878   : > { %4127 = vpow2.f32 %v1966_v19 }
 0x879   : > { %4129 = vpow2.f32 %v1969_v20 }
 0x885   : > { %v5060_v28 = vpop.eup %4127 }
 0x886   : > { %v4130_v29 = vpop.eup %4129  ;;  %v5063_v30 = vmul.f32 %v5060_v28, %v1874_v27 }
 0x887   : > { %3873 = vmatmul.mubr.msk.f32.vlgmr.msra.gmra.mxu1 %vm1529_vm7, %v4130_v29  ;;  %v1972_v22 = vsel %vm1529_vm7, %v4130_v29, 0.0  ;;  %v2492_v29 = vld [vmem:[#allocation10 + $0x50] sm:$0xff] }
 0x888   : > { %3887 = vmatpush3.msra.mxu1 %v4980_v0  ;;  %1973 = vadd.xlane.f32.xlu0 %v1972_v22  ;;  %v2061_v0 = vld [vmem:[#allocation10 + $0x38] sm:$0xff] }
 0x889   : > { %3888 = vmatprep.subr.mxu1 %v4405_v4  ;;  %3894 = vmatprep.mubr.msk.f32.mxu1 %vm4406_vm2, %v4405_v4 }
 0x88a   : > { %3889 = vmatpush3.msra.mxu1 %v4984_v1  ;;  %v2573_v1 = vpop.permute.xlu1 %2572  ;;  %3876 = vmatpush3.msra.mxu0 %v2061_v0 }
 0x88b   : > { %3890 = vmatprep.subr.mxu1 %v4405_v4  ;;  %3877 = vmatprep.subr.mxu0 %v4405_v4 }
 0x88c   : > { %3891 = vmatpush3.msra.mxu1 %v4988_v2 }
 0x88d   : > { %3892 = vmatprep.subr.mxu1 %v4405_v4 }
 0x88e   : > { %3893 = vmatpush3.msra.mxu1 %v4992_v3  ;;  %v2749_v2 = vpop.permute.xlu1 %2748  ;;  %v2751_v3 = vpop.permute.xlu0 %2750 }
 0x88f   : > { %3895 = vmatmul.mubr.msk.f32.vlgmr.msra.gmra.mxu1 %vm1278_vm5, %v2141_v21  ;;  %3904 = vmatprep.subr.mxu1 %v4405_v4 }
 0x890   : > { %3905 = vmatpush3.msra.mxu1 %v2319_v23  ;;  %3912 = vmatprep.mubr.msk.f32.mxu1 %vm4406_vm2, %v4405_v4 }
 0x891   : > { %3906 = vmatprep.subr.mxu1 %v4405_v4 }
 0x892   : > { %3907 = vmatpush3.msra.mxu1 %v2317_v26  ;;  %v2747_v33 = vpop.permute.xlu1 %2746 }
 0x893   : > { %3908 = vmatprep.subr.mxu1 %v4405_v4 }
 0x894   : > { %3909 = vmatpush3.msra.mxu1 %v2315_v31 }
 0x895   : > { %3910 = vmatprep.subr.mxu1 %v4405_v4 }
 0x896   : > { %3911 = vmatpush3.msra.mxu1 %v2313_v32 }
 0x897   : > { %3913 = vmatmul.mubr.msk.f32.vlgmr.msra.gmra.mxu1 %vm1278_vm5, %v2141_v21  ;;  %3931 = vmatprep.subr.mxu1 %v4405_v4  ;;  %v3451_v21 = vld [vmem:[%s5408_s28] ss:$0 sm:$0xff]  ;;  %s5413_s28 = sld [smem:[#allocation22_spill]] }
 0x898   : > { %3932 = vmatpush3.msra.mxu1 %v2571_v13  ;;  %3939 = vmatprep.mubr.msk.f32.mxu1 %vm4406_vm2, %v4405_v4  ;;  %v1273_v23 = vadd.f32 %v3451_v21, %v4824_v63  ;;  %v2491_v63 = vld [vmem:[#allocation10 + $0x48] sm:$0xff] }
 0x899   : > { %3933 = vmatprep.subr.mxu1 %v4405_v4 }
 0x89a   : > { %3934 = vmatpush3.msra.mxu1 %v4998_v5  ;;  %v2745_v5 = vpop.permute.xlu1 %2744  ;;  %v1700_v24 = vadd.f32 %v5050_v60, %v1273_v23 }
 0x89b   : > { %3935 = vmatprep.subr.mxu1 %v4405_v4 }
 0x89c   : > { %3936 = vmatpush3.msra.mxu1 %v5002_v6  ;;  %v2060_v6 = vld [vmem:[#allocation10 + $0x30] sm:$0xff] }
 0x89d   : > { %3937 = vmatprep.subr.mxu1 %v4405_v4  ;;  %3878 = vmatpush3.msra.mxu0 %v2060_v6  ;;  %p5416_p10 = scmp.ne.s32.totalorder %s5413_s28, 0 }
 0x89e   : > { %3938 = vmatpush3.msra.mxu1 %v5006_v7  ;;  %2230 = vrot.lane.b32.xlu0 %v4935_v50, %s4409_s18  ;;  %v2059_v7 = vld [vmem:[#allocation10 + $0x28] sm:$0xff]  ;;  %v1791_v35 = vpop.xlane.xlu1 %1790 }
 0x89f   : > { %3940 = vmatmul.mubr.msk.f32.vlgmr.msra.gmra.mxu1 %vm1278_vm5, %v2573_v1  ;;  %3949 = vmatprep.subr.mxu1 %v4405_v4  ;;  %v1792_v36 = vadd.f32 %v1791_v35, %v5057_v25 }
 0x8a0   : > { %3950 = vmatpush3.msra.mxu1 %v2751_v3  ;;  %3957 = vmatprep.mubr.msk.f32.mxu1 %vm4406_vm2, %v4405_v4 }
 0x8a1   : > { %3951 = vmatprep.subr.mxu1 %v4405_v4  ;;  %3879 = vmatprep.subr.mxu0 %v4405_v4  ;;  %v1971_v38 = vmul.f32 %v5060_v28, %v1792_v36  ;;  %v2493_v28 = vld [vmem:[#allocation10 + $0x58] sm:$0xff] }
 0x8a2   : > { %3952 = vmatpush3.msra.mxu1 %v2749_v2  ;;  %3880 = vmatpush3.msra.mxu0 %v2059_v7  ;;  %v2229_v46 = vpop.permute.xlu1 %2228 }
 0x8a3   : > { %3953 = vmatprep.subr.mxu1 %v4405_v4  ;;  %3881 = vmatprep.subr.mxu0 %v4405_v4 }
 0x8a4   : > { %3954 = vmatpush3.msra.mxu1 %v2747_v33  ;;  %3882 = vmatpush3.msra.mxu0 %v2058_v34 }
 0x8a5   : > { %3955 = vmatprep.subr.mxu1 %v4405_v4  ;;  %3897 = vmatprep.subr.mxu0 %v4405_v4 }
 0x8a6   : > { %3956 = vmatpush3.msra.mxu1 %v2745_v5 }
 0x8a7   : > { %3958 = vmatmul.mubr.msk.f32.vlgmr.msra.gmra.mxu1 %vm1278_vm5, %v2573_v1 }
 0x8a8   : > { %3142 = vmatprep.mubr.f32.mxu1 %v4405_v4 }
 0x911   : > { %v1974_v37 = vpop.xlane.xlu0 %1973 }
 0x912   : > { %v1975_v39 = vadd.f32 %v1974_v37, %v1971_v38 }
 0x914   : > { %4131 = vrcp.f32 %v1975_v39 }
 0x915   : > { %v2231_v45 = vpop.permute.xlu0 %2230 }
 0x921   : > { %v4132_v42 = vpop.eup %4131 }
 0x947   : > { %v2050_v40 = vpop.f32.mrf.mxu1 }
 0x948   : > { %v2054_v41 = vadd.f32 %v2050_v40, %v5063_v30 }
 0x949   : > { %v3874_v43 = vpop.f32.mrf.mxu1 }
 0x94a   : > { %v2056_v44 = vmul.f32 %v4132_v42, %v2054_v41 }
 0x94c   : > { %3884 = vmatmul.mubr.msk.f32.vlgmr.msra.gmra.mxu0 %vm1278_vm5, %v2056_v44 }
 0x94d   : > { %3898 = vmatpush3.msra.mxu0 %v2231_v45  ;;  %3901 = vmatprep.mubr.msk.f32.mxu0 %vm4406_vm2, %v4405_v4 }
 0x94e   : > { %3899 = vmatprep.subr.mxu0 %v4405_v4 }
 0x94f   : > { %v2210_v47 = vpop.f32.mrf.mxu1  ;;  %3900 = vmatpush3.msra.mxu0 %v2229_v46 }
 0x950   : > { %v2214_v49 = vsel %vm1352_vm6, %v2210_v47, -inf  ;;  %3915 = vmatprep.subr.mxu0 %v4405_v4 }
 0x951   : > { %2215 = vmax.xlane.f32.xlu1 %v2214_v49  ;;  %v3896_v52 = vpop.f32.mrf.mxu1 }
 0x957   : > { %v2390_v48 = vpop.f32.mrf.mxu1 }
 0x958   : > { %v2394_v53 = vsel %vm1529_vm7, %v2390_v48, -inf }
 0x959   : > { %2395 = vmax.xlane.f32.xlu1 %v2394_v53  ;;  %v3914_v54 = vpop.f32.mrf.mxu1 }
 0x95f   : > { %v5118_v55 = vpop.f32.mrf.mxu1 }
 0x960   : > { %v2646_v17 = vsel %vm1352_vm6, %v5118_v55, -inf }
 0x961   : > { %v3941_v56 = vpop.f32.mrf.mxu1 }
 0x967   : > { %v5120_v57 = vpop.f32.mrf.mxu1 }
 0x968   : > { %v2826_v18 = vsel %vm1529_vm7, %v5120_v57, -inf }
 0x969   : > { %v3959_v59 = vpop.f32.mrf.mxu1 }
 0x96a   : > { %2410 = vrot.lane.b32.xlu1 %v4964_v62, %s4409_s18  ;;  %s4289_s18 = scalar_lea.vmem %s3279_s29, 128 }
 0x96b   : > { %p4290_p9 = scmp.ne.s32.totalorder %s3279_s29, %s4289_s18 }
 0x96d   : > { %p4291_p12 = pnand %p4290_p9, %p5416_p10 }
 0x96f   : > { %p4292_p0 = pneg %p4291_p12 }
 0x9da   : > { %v2216_v61 = vpop.xlane.xlu1 %2215 }
 0x9db   : > { %v2220_v8 = vsub.f32 %v2210_v47, %v2216_v61 }
 0x9dd   : > { %v2221_v9 = vmul.f32 1.442695, %v2220_v8  ;;  %v2923_v8 = vld [vmem:[#allocation10 + $0x68] sm:$0xff] }
 0x9df   : > { %4133 = vpow2.f32 %v2221_v9  ;;  %v2922_v9 = vld [vmem:[#allocation10 + $0x60] sm:$0xff] }
 0x9e2   : > { %v2396_v10 = vpop.xlane.xlu1 %2395 }
 0x9e3   : > { %v2397_v11 = vmax.f32 %v2216_v61, %v2396_v10 }
 0x9e5   : > { %v2398_v12 = vsub.f32 %v2216_v61, %v2397_v11  ;;  %v2401_v13 = vsub.f32 %v2390_v48, %v2397_v11 }
 0x9e6   : > { %v2411_v14 = vpop.permute.xlu1 %2410 }
 0x9e7   : > { %v2402_v58 = vmul.f32 1.442695, %v2401_v13 }
 0x9e9   : > { %4135 = vpow2.f32 %v2402_v58 }
 0x9ec   : > { %v4134_v15 = vpop.eup %4133 }
 0x9ed   : > { %3902 = vmatmul.mubr.msk.f32.vlgmr.msra.gmra.mxu0 %vm1352_vm6, %v4134_v15  ;;  %v2224_v16 = vsel %vm1352_vm6, %v4134_v15, 0.0 }
 0x9ee   : > { %2225 = vadd.xlane.f32.xlu0 %v2224_v16  ;;  %3916 = vmatpush3.msra.mxu0 %v2411_v14 }
 0x9ef   : > { %3917 = vmatprep.mubr.msk.f32.mxu0 %vm4406_vm2, %v4405_v4  ;;  %3920 = vmatprep.subr.mxu0 %v4405_v4 }
 0x9f2   : > { %2647 = vmax.xlane.f32.xlu0 %v2646_v17 }
 0x9f6   : > { %2827 = vmax.xlane.f32.xlu0 %v2826_v18  ;;  %v4136_v19 = vpop.eup %4135 }
 0x9f7   : > { %3918 = vmatmul.mubr.msk.f32.vlgmr.msra.gmra.mxu0 %vm1529_vm7, %v4136_v19  ;;  %v2405_v20 = vsel %vm1529_vm7, %v4136_v19, 0.0 }
 0x9f8   : > { %2406 = vadd.xlane.f32.xlu1 %v2405_v20  ;;  %3928 = vmatprep.mubr.msk.f32.mxu0 %vm4406_vm2, %v4405_v4 }
 0x9f9   : > { %3921 = vmatpush3.msra.mxu0 %v2493_v28 }
 0x9fa   : > { %3922 = vmatprep.subr.mxu0 %v4405_v4 }
 0x9fb   : > { %3923 = vmatpush3.msra.mxu0 %v2492_v29 }
 0x9fc   : > { %3924 = vmatprep.subr.mxu0 %v4405_v4 }
 0x9fd   : > { %3925 = vmatpush3.msra.mxu0 %v2491_v63 }
 0x9fe   : > { %3926 = vmatprep.subr.mxu0 %v4405_v4 }
 0xa09   : > { %2662 = vrot.lane.b32.xlu1 %v4935_v50, %s4410_s15  ;;  %v2490_v50 = vld [vmem:[#allocation10 + $0x40] sm:$0xff] }
 0xa0a   : > { %3927 = vmatpush3.msra.mxu0 %v2490_v50 }
 0xa0b   : > { %3942 = vmatprep.subr.mxu0 %v4405_v4 }
 0xa0c   : > { %v2131_v25 = vpop.f32.mrf.mxu0  ;;  %2660 = vrot.lane.b32.xlu0 %v4937_v51, %s4410_s15  ;;  %v2217_v51 = vsub.f32 -inf, %v2216_v61  ;;  %v2924_v61 = vld [vmem:[#allocation10 + $0x70] sm:$0xff] }
 0xa0d   : > { %v5146_v26 = vadd.f32 %v2131_v25, %v1700_v24  ;;  %2842 = vrot.lane.b32.xlu1 %v4964_v62, %s4410_s15  ;;  %v2399_v62 = vmul.f32 1.442695, %v2398_v12  ;;  %s4293_s15 = sshll.u32 %s4411_s21, 4  ;;  %s4294_s15 = int_to_ptr.vmem [resolvable:$false] %s4293_s15 }
 0xa0e   : > { %v3885_v27 = vpop.f32.mrf.mxu0  ;;  %v2218_v60 = vmul.f32 1.442695, %v2217_v51  ;;  %p4296_p6 = scmp.lt.s32.totalorder %s3279_s29, %s4294_s15 }
 0xa10   : > { %4137 = vpow2.f32 %v2218_v60 }
 0xa11   : > { %4139 = vpow2.f32 %v2399_v62 }
 0xa1d   : > { %v4138_v30 = vpop.eup %4137 }
 0xa1e   : > { %v2223_v22 = vmul.f32 0.0, %v4138_v30  ;;  %v4140_v0 = vpop.eup %4139 }
 0xa77   : > { %v2226_v31 = vpop.xlane.xlu0 %2225 }
 0xa78   : > { %v2227_v32 = vadd.f32 %v2226_v31, %v2223_v22  ;;  %v3065_v31 = vld [vmem:[%s5409_s12 + $0xf8] sm:$0xff] }
 0xa79   : > { %3078 = vmatprep.subr.mxu1 %v3065_v31 }
 0xa7a   : > { %v2404_v1 = vmul.f32 %v4140_v0, %v2227_v32  ;;  %v3064_v32 = vld [vmem:[%s5409_s12 + $0xf0] sm:$0xff] }
 0xa7b   : > { %v2648_v2 = vpop.xlane.xlu0 %2647  ;;  %3079 = vmatpush1.msra.mxu1 %v3064_v32 }
 0xa7c   : > { %v2652_v3 = vsub.f32 %v5118_v55, %v2648_v2  ;;  %v2649_v56 = vsub.f32 -inf, %v2648_v2 }
 0xa7e   : > { %v2653_v33 = vmul.f32 1.442695, %v2652_v3  ;;  %v2650_v59 = vmul.f32 1.442695, %v2649_v56  ;;  %v3060_v3 = vld [vmem:[%s5409_s12 + $0xd0] sm:$0xff]  ;;  %v3035_v56 = vld [vmem:[%s5409_s12 + $0x8] sm:$0xff] }
 0xa7f   : > { %v2828_v5 = vpop.xlane.xlu0 %2827 }
 0xa80   : > { %4141 = vpow2.f32 %v2653_v33  ;;  %v2829_v6 = vmax.f32 %v2648_v2, %v2828_v5  ;;  %v3059_v33 = vld [vmem:[%s5409_s12 + $0xc8] sm:$0xff]  ;;  %v3058_v5 = vld [vmem:[%s5409_s12 + $0xc0] sm:$0xff] }
 0xa81   : > { %v2407_v40 = vpop.xlane.xlu1 %2406 }
 0xa82   : > { %v2830_v7 = vsub.f32 %v2648_v2, %v2829_v6  ;;  %v2833_v34 = vsub.f32 %v5120_v57, %v2829_v6  ;;  %v2408_v41 = vadd.f32 %v2407_v40, %v2404_v1  ;;  %v2925_v57 = vld [vmem:[#allocation10 + $0x78] sm:$0xff]  ;;  %v3061_v2 = vld [vmem:[%s5409_s12 + $0xd8] sm:$0xff] }
 0xa83   : > { %v2661_v54 = vpop.permute.xlu0 %2660  ;;  %v3062_v1 = vld [vmem:[%s5409_s12 + $0xe0] sm:$0xff]  ;;  %v3057_v6 = vld [vmem:[%s5409_s12 + $0xb8] sm:$0xff] }
 0xa84   : > { %v2834_v35 = vmul.f32 1.442695, %v2833_v34  ;;  %v2831_v10 = vmul.f32 1.442695, %v2830_v7  ;;  %v3056_v7 = vld [vmem:[%s5409_s12 + $0xb0] sm:$0xff]  ;;  %v3055_v34 = vld [vmem:[%s5409_s12 + $0xa8] sm:$0xff] }
 0xa85   : > { %v2663_v53 = vpop.permute.xlu1 %2662  ;;  %v3049_v40 = vld [vmem:[%s5409_s12 + $0x78] sm:$0xff] }
 0xa86   : > { %4143 = vpow2.f32 %v2834_v35  ;;  %v3054_v35 = vld [vmem:[%s5409_s12 + $0xa0] sm:$0xff] }
 0xa87   : > { %4145 = vrcp.f32 %v2408_v41  ;;  %v3048_v41 = vld [vmem:[%s5409_s12 + $0x70] sm:$0xff] }
 0xa88   : > { %4147 = vpow2.f32 %v2650_v59  ;;  %v3182_v59 = vld [vmem:[#allocation12 + $0xf8] sm:$0xff] }
 0xa89   : > { %v2843_v55 = vpop.permute.xlu1 %2842  ;;  %4149 = vpow2.f32 %v2831_v10  ;;  %v3180_v10 = vld [vmem:[#allocation12 + $0xe8] sm:$0xff] }
 0xa8d   : > { %v4142_v36 = vpop.eup %4141 }
 0xa8e   : > { %v2656_v37 = vsel %vm1352_vm6, %v4142_v36, 0.0 }
 0xa8f   : > { %2657 = vadd.xlane.f32.xlu1 %v2656_v37  ;;  %v3052_v37 = vld [vmem:[%s5409_s12 + $0x90] sm:$0xff] }
 0xa93   : > { %v4144_v38 = vpop.eup %4143 }
 0xa94   : > { %v2837_v39 = vsel %vm1529_vm7, %v4144_v38, 0.0  ;;  %v4146_v49 = vpop.eup %4145 }
 0xa95   : > { %2838 = vadd.xlane.f32.xlu0 %v2837_v39  ;;  %v4148_v11 = vpop.eup %4147  ;;  %v3050_v39 = vld [vmem:[%s5409_s12 + $0x80] sm:$0xff] }
 0xa96   : > { %v2655_v12 = vmul.f32 0.0, %v4148_v11  ;;  %v4150_v14 = vpop.eup %4149  ;;  %v3164_v11 = vld [vmem:[#allocation12 + $0x68] sm:$0xff] }
 0xaad   : > { %v2303_v42 = vpop.f32.mrf.mxu0 }
 0xaae   : > { %v2307_v43 = vadd.f32 %v2303_v42, %v2223_v22  ;;  %v3047_v42 = vld [vmem:[%s5409_s12 + $0x68] sm:$0xff] }
 0xaaf   : > { %v3903_v44 = vpop.f32.mrf.mxu0 }
 0xab0   : > { %v2409_v45 = vmul.f32 %v4140_v0, %v2307_v43  ;;  %v3063_v0 = vld [vmem:[%s5409_s12 + $0xe8] sm:$0xff]  ;;  %v3046_v43 = vld [vmem:[%s5409_s12 + $0x60] sm:$0xff]  ;;  %v3045_v44 = vld [vmem:[%s5409_s12 + $0x58] sm:$0xff] }
 0xab1   : > { %3080 = vmatprep.subr.mxu1 %v3063_v0  ;;  %v3472_v0 = vld [vmem:[%s5410_s16] ss:$0 sm:$0xff] }
 0xab2   : > { %3081 = vmatpush1.msra.mxu1 %v3062_v1 }
 0xab3   : > { %3082 = vmatprep.subr.mxu1 %v3061_v2 }
 0xab4   : > { %3083 = vmatpush1.msra.mxu1 %v3060_v3  ;;  %v3473_v3 = vld [vmem:[%s5411_s19] ss:$0 sm:$0xff]  ;;  %s3276_s19 = scalar_lea.hbm %s5415_s24, %s3477_s3 }
 0xab5   : > { %3084 = vmatprep.subr.mxu1 %v3059_v33 }
 0xab6   : > { %3085 = vmatpush1.msra.mxu1 %v3058_v5 }
 0xab7   : > { %v2482_v46 = vpop.f32.mrf.mxu0  ;;  %3086 = vmatprep.subr.mxu1 %v3057_v6  ;;  %v3170_v6 = vld [vmem:[#allocation12 + $0x98] sm:$0xff] }
 0xab8   : > { %v2486_v47 = vadd.f32 %v2482_v46, %v2409_v45  ;;  %3087 = vmatpush1.msra.mxu1 %v3056_v7  ;;  %v3044_v45 = vld [vmem:[%s5409_s12 + $0x50] sm:$0xff]  ;;  %v3043_v46 = vld [vmem:[%s5409_s12 + $0x48] sm:$0xff]  ;;  %v3154_v7 = vld [vmem:[#allocation12 + $0x18] sm:$0xff] }
 0xab9   : > { %v3919_v52 = vpop.f32.mrf.mxu0  ;;  %3088 = vmatprep.subr.mxu1 %v3055_v34  ;;  %v3169_v34 = vld [vmem:[#allocation12 + $0x90] sm:$0xff] }
 0xaba   : > { %v2488_v48 = vmul.f32 %v4146_v49, %v2486_v47  ;;  %3089 = vmatpush1.msra.mxu1 %v3054_v35  ;;  %v3042_v47 = vld [vmem:[%s5409_s12 + $0x40] sm:$0xff]  ;;  %v3041_v49 = vld [vmem:[%s5409_s12 + $0x38] sm:$0xff]  ;;  %v3040_v52 = vld [vmem:[%s5409_s12 + $0x30] sm:$0xff] }
 0xabb   : > { %v3153_v35 = vld [vmem:[#allocation12 + $0x10] sm:$0xff] }
 0xabc   : > { %3929 = vmatmul.mubr.msk.f32.vlgmr.msra.gmra.mxu0 %vm1278_vm5, %v2488_v48  ;;  %v3039_v48 = vld [vmem:[%s5409_s12 + $0x28] sm:$0xff] }
 0xabd   : > { %3943 = vmatpush3.msra.mxu0 %v2663_v53  ;;  %3946 = vmatprep.mubr.msk.f32.mxu0 %vm4406_vm2, %v4405_v4  ;;  %v3038_v53 = vld [vmem:[%s5409_s12 + $0x20] sm:$0xff] }
 0xabe   : > { %3944 = vmatprep.subr.mxu0 %v4405_v4 }
 0xabf   : > { %3945 = vmatpush3.msra.mxu0 %v2661_v54  ;;  %v3037_v54 = vld [vmem:[%s5409_s12 + $0x18] sm:$0xff] }
 0xac0   : > { %3960 = vmatprep.subr.mxu0 %v4405_v4  ;;  %3947 = vmatmul.mubr.msk.f32.vlgmr.msra.gmra.mxu0 %vm1352_vm6, %v4142_v36  ;;  %v3053_v36 = vld [vmem:[%s5409_s12 + $0x98] sm:$0xff] }
 0xac1   : > { %3961 = vmatpush3.msra.mxu0 %v2843_v55  ;;  %3962 = vmatprep.mubr.msk.f32.mxu0 %vm4406_vm2, %v4405_v4  ;;  %v3036_v55 = vld [vmem:[%s5409_s12 + $0x10] sm:$0xff] }
 0xac2   : > { %3965 = vmatprep.subr.mxu0 %v4405_v4  ;;  %3090 = vmatprep.subr.mxu1 %v3053_v36  ;;  %v3168_v36 = vld [vmem:[#allocation12 + $0x88] sm:$0xff] }
 0xac3   : > { %3091 = vmatpush1.msra.mxu1 %v3052_v37  ;;  %v3152_v37 = vld [vmem:[#allocation12 + $0x8] sm:$0xff] }
 0xac4   : > { %3963 = vmatmul.mubr.msk.f32.vlgmr.msra.gmra.mxu0 %vm1529_vm7, %v4144_v38  ;;  %v3051_v38 = vld [vmem:[%s5409_s12 + $0x88] sm:$0xff] }
 0xac5   : > { %3973 = vmatprep.mubr.msk.f32.mxu0 %vm4406_vm2, %v4405_v4  ;;  %3966 = vmatpush3.msra.mxu0 %v2925_v57  ;;  %v3034_v57 = vld [vmem:[%s5409_s12] sm:$0xff] }
 0xac6   : > { %3967 = vmatprep.subr.mxu0 %v4405_v4  ;;  %3092 = vmatprep.subr.mxu1 %v3051_v38  ;;  %v3151_v38 = vld [vmem:[#allocation12] sm:$0xff] }
 0xac7   : > { %3968 = vmatpush3.msra.mxu0 %v2924_v61  ;;  %3093 = vmatpush1.msra.mxu1 %v3050_v39  ;;  %v3166_v61 = vld [vmem:[#allocation12 + $0x78] sm:$0xff]  ;;  %v3068_v39 = vlaneseq }
 0xac8   : > { %3969 = vmatprep.subr.mxu0 %v4405_v4  ;;  %3094 = vmatprep.subr.mxu1 %v3049_v40 }
 0xac9   : > { %3970 = vmatpush3.msra.mxu0 %v2923_v8  ;;  %3095 = vmatpush1.msra.mxu1 %v3048_v41  ;;  %v3181_v8 = vld [vmem:[#allocation12 + $0xf0] sm:$0xff]  ;;  %v3069_v40 = vshrl.u32 %v3068_v39, 7 }
 0xaca   : > { %3971 = vmatprep.subr.mxu0 %v4405_v4  ;;  %3096 = vmatprep.subr.mxu1 %v3047_v42  ;;  %v3066_v42 = vld [vmem:[%s5412_s9] sm:$0x3]  ;;  %s4295_s9 = scalar_lea.vmem %s4294_s15, 256 }
 0xacb   : > { %3972 = vmatpush3.msra.mxu0 %v2922_v9  ;;  %3097 = vmatpush1.msra.mxu1 %v3046_v43  ;;  %v3165_v9 = vld [vmem:[#allocation12 + $0x70] sm:$0xff]  ;;  %v3070_v41 = vsub.s32 0, %v3069_v40  ;;  %v3074_v43 = vsub.s32 1, %v3069_v40  ;;  %p4297_p2 = scmp.lt.s32.totalorder %s4295_s9, %s4289_s18 }
 0xacc   : > { %3098 = vmatprep.subr.mxu1 %v3045_v44  ;;  %3629 = vmatprep.subr.mxu0 %v3182_v59 }
 0xacd   : > { %3099 = vmatpush1.msra.mxu1 %v3044_v45  ;;  %v3071_v44 = vrot.slane %v3066_v42, %v3070_v41  ;;  %v3075_v45 = vrot.slane %v3066_v42, %v3074_v43  ;;  %p4298_p4 = por %p4297_p2, %p4296_p6 }
 0xace   : > { %3100 = vmatprep.subr.mxu1 %v3043_v46 }
 0xacf   : > { %3101 = vmatpush1.msra.mxu1 %v3042_v47  ;;  %p4299_p7 = pnand %p4298_p4, %p4292_p0 }
 0xad0   : > { %3102 = vmatprep.subr.mxu1 %v3041_v49 }
 0xad1   : > { %3103 = vmatpush1.msra.mxu1 %v3040_v52 }
 0xad2   : > { %3104 = vmatprep.subr.mxu1 %v3039_v48 }
 0xad3   : > { %3105 = vmatpush1.msra.mxu1 %v3038_v53 }
 0xad4   : > { %3106 = vmatprep.subr.mxu1 %v3037_v54 }
 0xad5   : > { %3107 = vmatpush1.msra.mxu1 %v3036_v55  ;;  %v3474_v55 = vld [vmem:[%s5414_s27] ss:$0 sm:$0xff] }
 0xad6   : > { %3108 = vmatprep.subr.mxu1 %v3035_v56 }
 0xad7   : > { %3109 = vmatpush1.msra.mxu1 %v3034_v57 }
 0xb18   : > { %v2658_v13 = vpop.xlane.xlu1 %2657 }
 0xb19   : > { %v2659_v58 = vadd.f32 %v2658_v13, %v2655_v12  ;;  %v3163_v13 = vld [vmem:[#allocation12 + $0x60] sm:$0xff] }
 0xb1b   : > { %v2836_v15 = vmul.f32 %v4150_v14, %v2659_v58  ;;  %v3178_v58 = vld [vmem:[#allocation12 + $0xd8] sm:$0xff] }
 0xb1e   : > { %v2839_v16 = vpop.xlane.xlu0 %2838 }
 0xb1f   : > { %v2840_v17 = vadd.f32 %v2839_v16, %v2836_v15  ;;  %v3177_v15 = vld [vmem:[#allocation12 + $0xd0] sm:$0xff] }
 0xb20   : > { %v3161_v16 = vld [vmem:[#allocation12 + $0x50] sm:$0xff] }
 0xb21   : > { %4151 = vrcp.f32 %v2840_v17  ;;  %v3176_v17 = vld [vmem:[#allocation12 + $0xc8] sm:$0xff] }
 0xb2e   : > { %v4152_v28 = vpop.eup %4151 }
 0xb7c   : > { %v2563_v18 = vpop.f32.mrf.mxu0 }
 0xb7d   : > { %v2567_v19 = vadd.f32 %v2563_v18, %v5146_v26  ;;  %v3160_v18 = vld [vmem:[#allocation12 + $0x48] sm:$0xff] }
 0xb7e   : > { %v3930_v20 = vpop.f32.mrf.mxu0 }
 0xb7f   : > { %v3159_v20 = vld [vmem:[#allocation12 + $0x40] sm:$0xff] }
 0xb80   : > { %v2735_v21 = vpop.f32.mrf.mxu0 }
 0xb81   : > { %v2739_v23 = vadd.f32 %v2735_v21, %v2655_v12  ;;  %v3179_v12 = vld [vmem:[#allocation12 + $0xe0] sm:$0xff]  ;;  %v3174_v21 = vld [vmem:[#allocation12 + $0xb8] sm:$0xff] }
 0xb82   : > { %v3948_v4 = vpop.f32.mrf.mxu0 }
 0xb83   : > { %v2841_v24 = vmul.f32 %v4150_v14, %v2739_v23  ;;  %v3162_v14 = vld [vmem:[#allocation12 + $0x58] sm:$0xff]  ;;  %v3173_v4 = vld [vmem:[#allocation12 + $0xb0] sm:$0xff] }
 0xb84   : > { %v2914_v25 = vpop.f32.mrf.mxu0  ;;  %v3158_v23 = vld [vmem:[#allocation12 + $0x38] sm:$0xff] }
 0xb85   : > { %v2918_v27 = vadd.f32 %v2914_v25, %v2841_v24  ;;  %v3157_v24 = vld [vmem:[#allocation12 + $0x30] sm:$0xff]  ;;  %v3172_v25 = vld [vmem:[#allocation12 + $0xa8] sm:$0xff] }
 0xb86   : > { %v3964_v29 = vpop.f32.mrf.mxu0 }
 0xb87   : > { %v2920_v63 = vmul.f32 %v4152_v28, %v2918_v27  ;;  %v3156_v27 = vld [vmem:[#allocation12 + $0x28] sm:$0xff]  ;;  %v3171_v28 = vld [vmem:[#allocation12 + $0xa0] sm:$0xff] }
 0xb88   : > { %v3155_v29 = vld [vmem:[#allocation12 + $0x20] sm:$0xff] }
 0xb89   : > { %3974 = vmatmul.mubr.msk.f32.vlgmr.msra.gmra.mxu0 %vm1278_vm5, %v2920_v63 }
 0xb8a   : > { %3630 = vmatpush3.msra.mxu0 %v3166_v61 }
 0xb8b   : > { %3631 = vmatprep.subr.mxu0 %v3181_v8 }
 0xb8c   : > { %3632 = vmatpush3.msra.mxu0 %v3165_v9 }
 0xb8d   : > { %3633 = vmatprep.subr.mxu0 %v3180_v10 }
 0xb8e   : > { %3634 = vmatpush3.msra.mxu0 %v3164_v11 }
 0xb8f   : > { %3635 = vmatprep.subr.mxu0 %v3179_v12 }
 0xb90   : > { %3636 = vmatpush3.msra.mxu0 %v3163_v13 }
 0xb91   : > { %3637 = vmatprep.subr.mxu0 %v3178_v58 }
 0xb92   : > { %3638 = vmatpush3.msra.mxu0 %v3162_v14 }
 0xb93   : > { %3639 = vmatprep.subr.mxu0 %v3177_v15 }
 0xb94   : > { %3640 = vmatpush3.msra.mxu0 %v3161_v16 }
 0xb95   : > { %3641 = vmatprep.subr.mxu0 %v3176_v17 }
 0xb96   : > { %3642 = vmatpush3.msra.mxu0 %v3160_v18 }
 0xc49   : > { %v2995_v50 = vpop.f32.mrf.mxu0 }
 0xc4a   : > { %v5175_v51 = vadd.f32 %v2995_v50, %v2567_v19  ;;  %v3175_v19 = vld [vmem:[#allocation12 + $0xc0] sm:$0xff] }
 0xc4b   : > { %v3975_v60 = vpop.f32.mrf.mxu0  ;;  %3643 = vmatprep.subr.mxu0 %v3175_v19 }
 0xc4c   : > { %3002 = vadd.xlane.f32.xlu0 %v5175_v51  ;;  %3644 = vmatpush3.msra.mxu0 %v3159_v20 }
 0xc4d   : > { %3645 = vmatprep.subr.mxu0 %v3174_v21 }
 0xc4e   : > { %3646 = vmatpush3.msra.mxu0 %v3158_v23 }
 0xc4f   : > { %3647 = vmatprep.subr.mxu0 %v3173_v4 }
 0xc50   : > { %3648 = vmatpush3.msra.mxu0 %v3157_v24 }
 0xc51   : > { %3649 = vmatprep.subr.mxu0 %v3172_v25 }
 0xc52   : > { %3650 = vmatpush3.msra.mxu0 %v3156_v27 }
 0xc53   : > { %3651 = vmatprep.subr.mxu0 %v3171_v28 }
 0xc54   : > { %3652 = vmatpush3.msra.mxu0 %v3155_v29 }
 0xc55   : > { %3653 = vmatprep.subr.mxu0 %v3170_v6 }
 0xc56   : > { %3654 = vmatpush3.msra.mxu0 %v3154_v7 }
 0xc57   : > { %3655 = vmatprep.subr.mxu0 %v3169_v34 }
 0xc58   : > { %3656 = vmatpush3.msra.mxu0 %v3153_v35 }
 0xc59   : > { %3657 = vmatprep.subr.mxu0 %v3168_v36 }
 0xc5a   : > { %3658 = vmatpush3.msra.mxu0 %v3152_v37 }
 0xcd5   : > { %v3003_v62 = vpop.xlane.xlu0 %3002 }
 0xcd6   : > { %v3004_v26 = vmul.f32 0.0078125, %v3003_v62 }
 0xcd8   : > { %v5179_v30 = vsub.f32 %v5175_v51, %v3004_v26 }
 0xcda   : > { %v3006_v22 = vmul.f32 %v5179_v30, %v5179_v30  ;;  %v3025_v1 = vmul.f32 %v3472_v0, %v5179_v30  ;;  %v3167_v30 = vld [vmem:[#allocation12 + $0x80] sm:$0xff] }
 0xcdb   : > { %3659 = vmatprep.subr.mxu0 %v3167_v30 }
 0xcdc   : > { %3007 = vadd.xlane.f32.xlu1 %v3006_v22  ;;  %3660 = vmatpush3.msra.mxu0 %v3151_v38 }
 0xd65   : > { %v3008_v63 = vpop.xlane.xlu1 %3007 }
 0xd66   : > { %v3009_v50 = vmul.f32 0.007874016, %v3008_v63 }
 0xd68   : > { %4153 = vrsqrt.f32 %v3009_v50  ;;  %vm3012_vm8 = vcmp.eq.f32.partialorder %v3009_v50, inf  ;;  %v3015_v26 = vand.u32 2147483648, %v3009_v50  ;;  %vm3014_vm9 = vcmp.eq.f32.partialorder %v3009_v50, 0.0 }
 0xd75   : > { %v4154_v60 = vpop.eup %4153 }
 0xd76   : > { %v3011_v62 = vmul.f32 %v4154_v60, %v3009_v50 }
 0xd78   : > { %v3013_v22 = vsel %vm3012_vm8, %v3009_v50, %v3011_v62 }
 0xd79   : > { %v3016_v31 = vsel %vm3014_vm9, %v3015_v26, %v3013_v22 }
 0xd7a   : > { %v3017_v32 = vadd.f32 1e-06, %v3016_v31 }
 0xd7c   : > { %4155 = vrcp.f32 %v3017_v32 }
 0xd89   : > { %v4156_v2 = vpop.eup %4155 }
 0xd8a   : > { %v3026_v33 = vmul.f32 %v4156_v2, %v3025_v1 }
 0xd8c   : > { %v3033_v5 = vadd.f32 %v3473_v3, %v3026_v33 }
 0xd8e   : > { %3143 = vmatmul.mubr.f32.vlgmr.msra.gmra.mxu1 %v3033_v5 }
 0xe4e   : > { %v3144_v46 = vpop.f32.mrf.mxu1 }
 0xe4f   : > { %v3145_v47 = vadd.f32 %v3144_v46, %v3071_v44 }
 0xe50   : > { %v3146_v49 = vpop.f32.mrf.mxu1 }
 0xe51   : > { %v3147_v52 = vadd.f32 %v3146_v49, %v3075_v45  ;;  %v3149_v53 = vmax.f32 %v3145_v47, 0.0 }
 0xe53   : > { %v3150_v48 = vmax.f32 %v3147_v52, 0.0 }
 0xe55   : > { %3254 = vmatprep.mubr.f32.mxu0 %v3150_v48 }
 0xe56   : > { %3255 = vmatmul.mubr.f32.vlgmr.msra.gmra.mxu0 %v3149_v53 }
 0xf16   : > { %v3661_v54 = vpop.f32.mrf.mxu0 }
 0xf18   : > { %v3662_v56 = vpop.f32.mrf.mxu0 }
 0xf19   : > { %v3663_v57 = vadd.f32 %v3662_v56, %v3661_v54 }
 0xf1b   : > { %v3257_v59 = vadd.f32 %v3663_v57, %v3474_v55 }
 0xf1d   : > { %v3260_v61 = vadd.f32 %v3257_v59, %v5175_v51 }
 0xf1f   : > { %3261 = vst [vmem:[%s4710_s17] sm:$0xff] %v3260_v61 }
 0xf20   : > { %4302 = shalt.err (!%p4299_p7)
}
 0xf21   : > { %s4303_s25 = scalar_lea.hbm %s3276_s19, 128  ;;  %s4307_s0 = scalar_lea.hbm %s5415_s24, 512 }
 0xf22   : > { %p4304_p8 = scmp.ne.s32.totalorder %s3276_s19, %s4303_s25  ;;  %p4308_p13 = scmp.lt.s32.totalorder %s3276_s19, %s5415_s24 }
 0xf23   : > { %p4309_p3 = scmp.lt.s32.totalorder %s4307_s0, %s4303_s25 }
 0xf24   : > { %p4305_p5 = pnand %p4304_p8, %p5416_p10 }
 0xf25   : > { %p4310_p1 = por %p4309_p3, %p4308_p13 }
 0xf26   : > { %p4306_p11 = pneg %p4305_p5 }
 0xf28   : > { %p4311_p9 = pnand %p4310_p1, %p4306_p11 }
 0xf2a   : > { %4314 = shalt.err (!%p4311_p9)
}
 0xf2b   : > { %3995 = dma.vmem_to_hbm [thread:$0]  (%p5416_p10), %s3279_s29, 128, %s3276_s19, %s3263_s1  }
 0xf2c PF: > { %s5417_s27 = sld [smem:[#allocation18_spill]]  ;;  %p4027_p12 = scmp.ge.s32.totalorder %s4393_s23, 2 }
 0xf2d   : > { %p5418_p0 = scmp.ne.s32.totalorder %s5402_s26, 0 }
 0xf2f   : > { %p4015_p6 = pnand %p4027_p12, %p5418_p0 }
 0xf31   : > { %p4016_p2 = pneg %p4015_p6 }
 0xf32   : > { %s3290_s3 = sand.u32 1, %s5417_s27  }
 0xf33   : > { %s3291_s16 = scalar_lea.sflag [#allocation6], %s3290_s3 }
 0xf34   : > { %4360 = dma.done.wait (%p4016_p2), %s3291_s16, 128  }
 0xf35   : > { %4362 = vsyncadd (%p4016_p2), %s3291_s16, 4294967168  ;;  %s37_s23 = sadd.s32 1, %s4393_s23   ;;  %s5419_s1 = sld [smem:[#allocation19_spill]] }
 0xf36   : > { %p34_p4 = scmp.ge.s32.totalorder %s37_s23, 6   ;;  %s5420_s28 = sld [smem:[#allocation20_spill]] }
 0xf37   : > { %s5421_s2 = sld [smem:[#allocation21_spill]]  ;;  %s5422_s0 = smov %s4369_s30 }
 0xf38   : > { %s5423_s30 = smov %s4373_s20  ;;  %s5424_s20 = smov %s4660_s11 }
 0xf39   : > { %s5425_s21 = smov %s4385_s22  ;;  %36 = sbr.rel (!%p34_p4) target bundleno = 25 (0x19), region = 170 }
 0xf3c   : > { %s5426_s22 = smov %s5420_s28 }
 0xf3e   :  { %3296 = vsyncpa [#allocation5], 1 }
 0xf3f   :  { %3298 = vsyncpa [#allocation5 + $0x1], 1 }
 0xf40   :  { %3299 = vsyncpa [#allocation8], 1 }
 0xf41   :  { %3300 = vsyncpa [#allocation11], 1 }
 0xf42   :  { %3301 = vsyncpa [#allocation6], 1 }
 0xf43   :  { %3303 = vsyncpa [#allocation6 + $0x1], 1 }

// kernel: tpu_custom_call.1
= control target key start
LH: loop header
LB: loop body
LE: loop exit
PB: predicated region body
PF: predicated region fallthrough
CT: control target
= control target key end

     0   :  { %s5341_s0 = inlined_call_operand.hbm [shape: f32[2,16,128], index: 0, kind: input, shape index: {}]   ;;  %s5342_s1 = inlined_call_operand.vmem [shape: f32[2,24,128], index: 1, kind: input, shape index: {}]   ;;  %s5343_s2 = inlined_call_operand.vmem [shape: f32[2,128,24], index: 2, kind: input, shape index: {}]   ;;  %s5344_s3 = inlined_call_operand.vmem [shape: f32[1,128], index: 3, kind: input, shape index: {}]   ;;  %s5345_s4 = inlined_call_operand.vmem [shape: f32[1,128], index: 4, kind: input, shape index: {}]   ;;  %s5346_s5 = inlined_call_operand.vmem [shape: f32[128,128], index: 5, kind: input, shape index: {}]   ;;  %s5347_s6 = inlined_call_operand.vmem [shape: f32[1,128], index: 6, kind: input, shape index: {}]   ;;  %s5348_s7 = inlined_call_operand.hbm [shape: f32[128,128], index: 7, kind: input, shape index: {}]   ;;  %s5349_s8 = inlined_call_operand.vmem [shape: f32[128,1], index: 8, kind: input, shape index: {}]   ;;  %s5350_s9 = inlined_call_operand.hbm [shape: f32[128,128], index: 9, kind: input, shape index: {}]   ;;  %s5351_s10 = inlined_call_operand.vmem [shape: f32[1,128], index: 10, kind: input, shape index: {}]   ;;  %s5352_s11 = inlined_call_operand.hbm [shape: f32[4,32,128], index: 11, kind: input, shape index: {}]   ;;  %s5353_s12 = inlined_call_operand.vmem [shape: f32[1,128], index: 12, kind: input, shape index: {}]   ;;  %s5354_s13 = inlined_call_operand.vmem [shape: f32[1,128], index: 13, kind: input, shape index: {}]   ;;  %s5355_s14 = inlined_call_operand.vmem [shape: f32[1,128], index: 14, kind: input, shape index: {}]   ;;  %s5356_s15 = inlined_call_operand.vmem [shape: f32[128,256], index: 15, kind: input, shape index: {}]   ;;  %s5357_s16 = inlined_call_operand.vmem [shape: f32[1,256], index: 16, kind: input, shape index: {}]   ;;  %s5358_s17 = inlined_call_operand.hbm [shape: f32[256,128], index: 17, kind: input, shape index: {}]   ;;  %s5359_s18 = inlined_call_operand.vmem [shape: f32[1,128], index: 18, kind: input, shape index: {}]   ;;  %s5360_s19 = inlined_call_operand.hbm [shape: f32[2,16,128], index: 19, kind: output, shape index: {}]  }
   0x1   :  { %5371 = sst [smem:[#allocation23_spill]] %s5341_s0 }
   0x2   :  { %5372 = sst [smem:[#allocation24_spill]] %s5342_s1 }
   0x3   :  { %5373 = sst [smem:[#allocation25_spill]] %s5343_s2 }
   0x4   :  { %5374 = sst [smem:[#allocation26_spill]] %s5344_s3 }
   0x5   :  { %5375 = sst [smem:[#allocation27_spill]] %s5348_s7 }
   0x6   :  { %5376 = sst [smem:[#allocation28_spill]] %s5350_s9 }
   0x7   :  { %5377 = sst [smem:[#allocation29_spill]] %s5352_s11 }
   0x8   :  { %5378 = sst [smem:[#allocation30_spill]] %s5353_s12 }
   0x9   :  { %5379 = sst [smem:[#allocation31_spill]] %s5354_s13 }
   0xa   :  { %5380 = sst [smem:[#allocation32_spill]] %s5355_s14 }
   0xb   :  { %5381 = sst [smem:[#allocation33_spill]] %s5356_s15 }
   0xc   :  { %5382 = sst [smem:[#allocation34_spill]] %s5357_s16 }
   0xd   :  { %5383 = sst [smem:[#allocation35_spill]] %s5358_s17 }
   0xe   :  { %5384 = sst [smem:[#allocation36_spill]] %s5359_s18 }
   0xf   :  { %5385 = sst [smem:[#allocation37_spill]] %s5360_s19 }
  0x10   :  { %24 = vsyncpa [#allocation5], 0 }
  0x11   :  { %26 = vsyncpa [#allocation5 + $0x1], 0 }
  0x12   :  { %27 = vsyncpa [#allocation8], 0 }
  0x13   :  { %28 = vsyncpa [#allocation11], 0 }
  0x14   :  { %29 = vsyncpa [#allocation6], 0 }
  0x15   :  { %31 = vsyncpa [#allocation6 + $0x1], 0  ;;  %s4512_s0 = smov 0   ;;  %s4514_s30 = smov 0  }
  0x16   :  { %s4516_s20 = smov 0   ;;  %s4518_s21 = smov 0  }
  0x17   :  { %s4520_s1 = smov 0   ;;  %s4522_s22 = smov 0  }
  0x18   :  { %s4524_s2 = smov 0   ;;  %s4526_s23 = smov 0  }
  0x19 LB: > { %5386 = sst [smem:[#allocation18_spill]] %s4365_s0  ;;  %s5361_s24 = sadd.s32 4294967295, %s4393_s23   ;;  %s4393_s23 = sphi %s4526_s23, %s37_s23   ;;  %s4389_s2 = sphi %s4524_s2, %s5421_s2   ;;  %s4385_s22 = sphi %s4522_s22, %s5426_s22   ;;  %s4381_s1 = sphi %s4520_s1, %s5419_s1   ;;  %s4377_s21 = sphi %s4518_s21, %s5425_s21   ;;  %s4373_s20 = sphi %s4516_s20, %s5424_s20   ;;  %s4369_s30 = sphi %s4514_s30, %s5423_s30   ;;  %s4365_s0 = sphi %s4512_s0, %s5422_s0  }
  0x1a   : > { %5387 = sst [smem:[#allocation19_spill]] %s4389_s2  ;;  %p3427_p0 = scmp.ge.s32.totalorder %s4393_s23, 1 }
  0x1b   : > { %p4556_p1 = scmp.eq.s32.totalorder %s5361_s24, 0  ;;  %p498_p2 = scmp.lt.s32.totalorder %s4393_s23, 5 }
  0x1c   : > { %s4395_s26 = smov [#allocation7]   ;;  %s4396_s29 = smov [#allocation10]  }
  0x1d   : > { %p4561_p3 = pnand %p3427_p0, %p498_p2  ;;  %s522_s27 = sshll.u32 %s4395_s26, 4  ;;  %s523_s27 = int_to_ptr.vmem [resolvable:$true] %s522_s27 }
  0x1e   : > { %s554_s24 = sshll.u32 %s4396_s29, 4  ;;  %s4397_s19 = smov [#allocation9]   ;;  %s555_s24 = int_to_ptr.vmem [resolvable:$true] %s554_s24 }
  0x1f   : > { %p3997_p4 = pneg %p4561_p3  ;;  %s538_s18 = sshll.u32 %s4397_s19, 4  ;;  %s539_s18 = int_to_ptr.vmem [resolvable:$true] %s538_s18 }
  0x20   : > { %s4168_s16 = scalar_lea.vmem %s523_s27, 2048  ;;  %p4176_p10 = scmp.lt.s32.totalorder %s523_s27, %s523_s27 }
  0x21   : > { %p4569_p5 = pnand %p3997_p4, %p4556_p1  ;;  %p4169_p7 = scmp.ne.s32.totalorder %s523_s27, %s4168_s16 }
  0x22   : > { %p4177_p11 = scmp.lt.s32.totalorder %s4168_s16, %s4168_s16 }
  0x23   : > { %p4159_p6 = pneg %p4569_p5 }
  0x24   : > { %p4178_p12 = por %p4177_p11, %p4176_p10 }
  0x25   : > { %p4171_p8 = pnand %p4169_p7, %p4159_p6 }
  0x27   : > { %p4172_p9 = pneg %p4171_p8 }
  0x29   : > { %p4179_p13 = pnand %p4178_p12, %p4172_p9 }
  0x2b   : > { %4182 = shalt.err (!%p4179_p13)
}
  0x2c   : > { %s4398_s26 = smov 128   ;;  %s4399_s29 = smov 8  }
  0x2d   : > { %s5391_s7 = sld [smem:[#allocation27_spill]]  ;;  %s4194_s13 = scalar_lea.vmem %s555_s24, 2048 }
  0x2e   : > { %p4195_p0 = scmp.ne.s32.totalorder %s555_s24, %s4194_s13  ;;  %p4202_p7 = scmp.lt.s32.totalorder %s555_s24, %s555_s24 }
  0x2f   : > { %p4203_p8 = scmp.lt.s32.totalorder %s4194_s13, %s4194_s13 }
  0x30   : > { %p4197_p2 = pnand %p4195_p0, %p4159_p6 }
  0x31   : > { %p4204_p9 = por %p4203_p8, %p4202_p7 }
  0x32   : > { %p4198_p4 = pneg %p4197_p2 }
  0x33   : > { %4000 = dma.hbm_to_vmem [thread:$0]  (!%p4569_p5), %s5391_s7, 2048, %s523_s27, [#allocation8], %s4398_s26, %s4398_s26, %s4399_s29  }
  0x34   : > { %p4205_p10 = pnand %p4204_p9, %p4198_p4 }
  0x36   : > { %4208 = shalt.err (!%p4205_p10)
}
  0x37   : > { %s5392_s11 = sld [smem:[#allocation29_spill]]  ;;  %s4220_s14 = scalar_lea.vmem %s539_s18, 2048 }
  0x38   : > { %p4221_p11 = scmp.ne.s32.totalorder %s539_s18, %s4220_s14  ;;  %p4228_p0 = scmp.lt.s32.totalorder %s539_s18, %s539_s18 }
  0x39   : > { %p4229_p2 = scmp.lt.s32.totalorder %s4220_s14, %s4220_s14 }
  0x3a   : > { %p4223_p12 = pnand %p4221_p11, %p4159_p6 }
  0x3b   : > { %p4230_p4 = por %p4229_p2, %p4228_p0 }
  0x3c   : > { %p4224_p13 = pneg %p4223_p12 }
  0x3d   : > { %4006 = dma.hbm_to_vmem [thread:$0]  (!%p4569_p5), %s5392_s11, 2048, %s555_s24, [#allocation11], %s4398_s26, %s4398_s26, %s4399_s29  }
  0x3e   : > { %p4231_p7 = pnand %p4230_p4, %p4224_p13 }
  0x40   : > { %4234 = shalt.err (!%p4231_p7)
}
  0x41   : > { %s5393_s9 = sld [smem:[#allocation28_spill]]  ;;  %s4400_s24 = smov [#allocation12]  }
  0x42   : > { %s582_s27 = sshll.u32 %s4400_s24, 4  ;;  %s583_s27 = int_to_ptr.vmem [resolvable:$true] %s582_s27 }
  0x43   : > { %s4246_s19 = scalar_lea.vmem %s583_s27, 4096  ;;  %p4254_p11 = scmp.lt.s32.totalorder %s583_s27, %s583_s27 }
  0x44   : > { %p4247_p8 = scmp.ne.s32.totalorder %s583_s27, %s4246_s19  ;;  %p4255_p12 = scmp.lt.s32.totalorder %s4246_s19, %s4246_s19 }
  0x46   : > { %p4249_p9 = pnand %p4247_p8, %p4159_p6  ;;  %p4256_p13 = por %p4255_p12, %p4254_p11 }
  0x47   : > { %4003 = dma.hbm_to_vmem [thread:$0]  (!%p4569_p5), %s5393_s9, 2048, %s539_s18, [#allocation8], %s4398_s26, %s4398_s26, %s4399_s29  }
  0x48   : > { %p4250_p10 = pneg %p4249_p9 }
  0x4a   : > { %p4257_p0 = pnand %p4256_p13, %p4250_p10 }
  0x4c   : > { %4260 = shalt.err (!%p4257_p0)
}
  0x4d   : > { %s5394_s17 = sld [smem:[#allocation35_spill]]  ;;  %s46_s28 = sadd.s32 1, %s4385_s22 }
  0x4e   : > { %p47_p6 = scmp.ge.s32.totalorder %s46_s28, 2  ;;  %s49_s14 = sadd.s32 1, %s4389_s2 }
  0x4f   : > { %s3426_s13 = sadd.s32 4294967294, %s4393_s23   ;;  %s58_s15 = sadd.s32 1, %s4373_s20 }
  0x50   : > { %s5428_s28 = smov (%p47_p6, %s46_s28), 0  ;;  %s5430_s14 = smov (!%p47_p6, %s49_s14), %s4389_s2 }
  0x51   : > { %5395 = sst [smem:[#allocation20_spill]] %s5428_s28  ;;  %s54_s24 = ssub.s32 %s4385_s22, %s5428_s28 }
  0x52   : > { %p65_p2 = scmp.ne.s32.totalorder %s4373_s20, %s4369_s30  ;;  %p51_p4 = scmp.ge.s32.totalorder %s5430_s14, 2 }
  0x53   : > { %4009 = dma.hbm_to_vmem [thread:$0]  (!%p4569_p5), %s5394_s17, 4096, %s583_s27, [#allocation11], %s4398_s26, %s4398_s26, %s4399_s29  }
  0x54   : > { %p71_p7 = scmp.ne.s32.totalorder %s4369_s30, %s4365_s0  ;;  %p66_p8 = scmp.eq.s32.totalorder %s4393_s23, 0 }
  0x55   : > { %s5396_s26 = sadd.s32 4294967295, %s4393_s23   ;;  %s5432_s14 = smov (%p51_p4, %s5430_s14), 0 }
  0x56   : > { %p485_p5 = scmp.eq.s32.totalorder %s5396_s26, 3  ;;  %5397 = sst [smem:[#allocation21_spill]] %s5432_s14 }
  0x57   : > { %p4639_p9 = por %p4556_p1, %p71_p7  ;;  %s53_s19 = ssub.s32 %s4389_s2, %s5432_s14 }
  0x58   : > { %p4643_p10 = por %p485_p5, %p65_p2  ;;  %p491_p11 = scmp.eq.s32.totalorder %s3426_s13, 3 }
  0x59   : > { %s55_s18 = sor.u32 %s54_s24, %s53_s19  ;;  %p4649_p12 = por %p66_p8, %p65_p2 }
  0x5a   : > { %s5399_s27 = scalar_select %p4643_p10, 1, 0 }
  0x5b   : > { %p56_p13 = scmp.eq.s32.totalorder %s55_s18, 0  ;;  %p4653_p0 = por %p491_p11, %p71_p7 }
  0x5c   : > { %5400 = sst [smem:[#allocation22_spill]] %s5399_s27  ;;  %s599_s7 = sand.u32 1, %s4373_s20  }
  0x5d   : > { %s5402_s26 = scalar_select %p4653_p0, 1, 0 }
  0x5e   : > { %s3434_s9 = sshll.u32 %s4389_s2, 1  ;;  %p4022_p6 = scmp.lt.s32.totalorder %s4393_s23, 4 }
  0x5f   : > { %s4660_s11 = scalar_select %p56_p13, %s4373_s20, %s58_s15  }
  0x60   : > { %s3433_s17 = sshll.u32 %s599_s7, 3  ;;  %s608_s28 = sadd.s32 %s4385_s22, %s3434_s9 }
  0x61   : > { %s3435_s14 = sshll.u32 %s608_s28, 7  ;;  %s603_s13 = scalar_lea.vmem [#allocation4], %s3433_s17 }
  0x62   : > { %s612_s24 = sshll.u32 %s603_s13, 4  ;;  %s5403_s27 = sld [smem:[#allocation23_spill]]  ;;  %s613_s24 = int_to_ptr.vmem [resolvable:$true] %s612_s24 }
  0x63   : > { %p4669_p2 = pnand %p4022_p6, %p4649_p12  ;;  %s600_s2 = scalar_lea.sflag [#allocation5], %s599_s7 }
  0x64   : > { %s4274_s15 = scalar_lea.vmem %s613_s24, 128  ;;  %s4401_s9 = smov [#allocation4]  }
  0x65   : > { %p4263_p4 = pneg %p4669_p2  ;;  %p4275_p7 = scmp.ne.s32.totalorder %s613_s24, %s4274_s15 }
  0x66   : > { %s4279_s17 = sshll.u32 %s4401_s9, 4  ;;  %s4280_s17 = int_to_ptr.vmem [resolvable:$false] %s4279_s17 }
  0x67   : > { %p4277_p8 = pnand %p4275_p7, %p4263_p4  ;;  %s4281_s28 = scalar_lea.vmem %s4280_s17, 256 }
  0x68   : > { %s610_s12 = scalar_lea.hbm %s5403_s27, %s3435_s14  ;;  %p4282_p11 = scmp.lt.s32.totalorder %s613_s24, %s4280_s17 }
  0x69   : > { %p4278_p5 = pneg %p4277_p8  ;;  %p4283_p13 = scmp.lt.s32.totalorder %s4281_s28, %s4274_s15 }
  0x6b   : > { %p4284_p0 = por %p4283_p13, %p4282_p11 }
  0x6d   : > { %p4285_p10 = pnand %p4284_p0, %p4278_p5 }
  0x6f   : > { %4288 = shalt.err (!%p4285_p10)
}
  0x70   : > { %4013 = dma.hbm_to_vmem [thread:$0]  (!%p4669_p2), %s610_s12, 128, %s613_s24, %s600_s2  }
  0x71   : > { %637 = sbr.rel (%p4561_p3) target bundleno = 3884 (0xf2c), region = 96  ;;  %s4680_s7 = sand.u32 (!%p4561_p3), 1, %s4369_s30  }
  0x72   : > { %s3437_s0 = sshll.u32 (!%p4561_p3), %s4680_s7, 3  ;;  %s640_s14 = scalar_lea.sflag (!%p4561_p3), [#allocation5], %s4680_s7 }
  0x73   : > { %s4684_s27 = scalar_lea.vmem (!%p4561_p3), [#allocation4], %s3437_s0 }
  0x76   : > { %4348 = dma.done.wait (%p4639_p9), %s640_s14, 128  }
  0x77   : > { %4350 = vsyncadd (%p4639_p9), %s640_s14, 4294967168 }
  0x78   : > { %4352 = dma.done.wait (%p4556_p1), [#allocation8], 4096  }
  0x79   : > { %4354 = vsyncadd (%p4556_p1), [#allocation8], 4294963200 }
  0x7a   : > { %4356 = dma.done.wait (%p4556_p1), [#allocation11], 6144  }
  0x7b   : > { %4358 = vsyncadd (%p4556_p1), [#allocation11], 4294961152  ;;  %p724_p3 = scmp.lt.s32.totalorder %s4381_s1, 1  ;;  %s5405_s13 = sld [smem:[#allocation25_spill]] }
  0x7c   : > { %s5406_s15 = sld [smem:[#allocation24_spill]]  ;;  %s4710_s17 = scalar_lea.vmem [#allocation13], %s3437_s0 }
  0x7d   : > { %s725_s12 = scalar_select %p724_p3, %s4381_s1, 1 }
  0x7e   : > { %p3446_p1 = scmp.ne.s32.totalorder %s4377_s21, 0 }
  0x7f   : > { %s3976_s2 = smul.u32 24, %s725_s12  ;;  %s3480_s3 = sshll.u32 %s725_s12, 7 }
  0x80   : > { %737 = sbr.rel (%p3446_p1) target bundleno = 392 (0x188), region = 120 }
  0x81   : > { %s4703_s24 = scalar_lea.vmem %s5405_s13, %s3480_s3 }
  0x82   : > { %s4708_s9 = scalar_lea.vmem %s5406_s15, %s3976_s2 }
  0x85   : > { %v769_v0 = vld [vmem:[%s4703_s24 + $0x78] sm:$0xff]  ;;  %v768_v1 = vld [vmem:[%s4703_s24 + $0x70] sm:$0xff]  ;;  %v4402_v2 = vmov 0.0   ;;  %v767_v3 = vld [vmem:[%s4703_s24 + $0x68] sm:$0xff]  ;;  %vm4403_vm0 = vmmov 0   ;;  %v4404_v5 = vmov 0  }
  0x86   : > { %3664 = vmatprep.subr.mxu0 %v769_v0  ;;  %3720 = vmatprep.subr.mxu1 %v4402_v2  ;;  %v1046_v4 = vld [vmem:[#allocation9 + $0x78] sm:$0xff]  ;;  %v1045_v7 = vld [vmem:[#allocation9 + $0x70] sm:$0xff]  ;;  %v1044_v8 = vld [vmem:[#allocation9 + $0x68] sm:$0xff]  ;;  %vm1011_vm1 = vcmask 195584  }
  0x87   : > { %3665 = vmatpush3.msra.mxu0 %v769_v0  ;;  %3752 = vmatprep.mubr.msk.f32.mxu1 %vm4403_vm0, %v4402_v2  ;;  %v766_v6 = vld [vmem:[%s4703_s24 + $0x60] sm:$0xff]  ;;  %v765_v9 = vld [vmem:[%s4703_s24 + $0x58] sm:$0xff]  ;;  %v1043_v10 = vld [vmem:[#allocation9 + $0x60] sm:$0xff] }
  0x88   : > { %3666 = vmatprep.subr.mxu0 %v768_v1  ;;  %4108 = vset.pattern.permute.xlu1 %v4404_v5  ;;  %v764_v11 = vld [vmem:[%s4703_s24 + $0x50] sm:$0xff]  ;;  %v1042_v12 = vld [vmem:[#allocation9 + $0x58] sm:$0xff]  ;;  %v763_v13 = vld [vmem:[%s4703_s24 + $0x48] sm:$0xff] }
  0x89   : > { %3667 = vmatpush3.msra.mxu0 %v768_v1  ;;  %3721 = vmatpush3.msra.mxu1 %v1046_v4  ;;  %v738_v14 = vld [vmem:[#allocation7] sm:$0xff]  ;;  %v762_v15 = vld [vmem:[%s4703_s24 + $0x40] sm:$0xff]  ;;  %v1041_v16 = vld [vmem:[#allocation9 + $0x50] sm:$0xff] }
  0x8a   : > { %3668 = vmatprep.subr.mxu0 %v767_v3  ;;  %3722 = vmatprep.subr.mxu1 %v4402_v2  ;;  %v761_v17 = vld [vmem:[%s4703_s24 + $0x38] sm:$0xff]  ;;  %v1040_v18 = vld [vmem:[#allocation9 + $0x48] sm:$0xff]  ;;  %v1039_v20 = vld [vmem:[#allocation9 + $0x40] sm:$0xff] }
  0x8b   : > { %3669 = vmatpush3.msra.mxu0 %v767_v3  ;;  %3723 = vmatpush3.msra.mxu1 %v1045_v7  ;;  %v760_v19 = vld [vmem:[%s4703_s24 + $0x30] sm:$0xff]  ;;  %v759_v21 = vld [vmem:[%s4703_s24 + $0x28] sm:$0xff]  ;;  %v1038_v22 = vld [vmem:[#allocation9 + $0x38] sm:$0xff] }
  0x8c   : > { %3670 = vmatprep.subr.mxu0 %v766_v6  ;;  %3724 = vmatprep.subr.mxu1 %v4402_v2  ;;  %v758_v23 = vld [vmem:[%s4703_s24 + $0x20] sm:$0xff]  ;;  %v1037_v24 = vld [vmem:[#allocation9 + $0x30] sm:$0xff]  ;;  %v1036_v26 = vld [vmem:[#allocation9 + $0x28] sm:$0xff] }
  0x8d   : > { %3671 = vmatpush3.msra.mxu0 %v766_v6  ;;  %3725 = vmatpush3.msra.mxu1 %v1044_v8  ;;  %v757_v25 = vld [vmem:[%s4703_s24 + $0x18] sm:$0xff]  ;;  %v756_v27 = vld [vmem:[%s4703_s24 + $0x10] sm:$0xff]  ;;  %v1035_v28 = vld [vmem:[#allocation9 + $0x20] sm:$0xff] }
  0x8e   : > { %3672 = vmatprep.subr.mxu0 %v765_v9  ;;  %3726 = vmatprep.subr.mxu1 %v4402_v2  ;;  %v755_v29 = vld [vmem:[%s4703_s24 + $0x8] sm:$0xff]  ;;  %v1034_v30 = vld [vmem:[#allocation9 + $0x18] sm:$0xff]  ;;  %v1033_v32 = vld [vmem:[#allocation9 + $0x10] sm:$0xff] }
  0x8f   : > { %3673 = vmatpush3.msra.mxu0 %v765_v9  ;;  %3727 = vmatpush3.msra.mxu1 %v1043_v10  ;;  %v754_v31 = vld [vmem:[%s4703_s24] sm:$0xff]  ;;  %v739_v33 = vld [vmem:[#allocation7 + $0x8] sm:$0xff]  ;;  %v740_v35 = vld [vmem:[#allocation7 + $0x10] sm:$0xff] }
  0x90   : > { %3674 = vmatprep.subr.mxu0 %v764_v11  ;;  %3728 = vmatprep.subr.mxu1 %v4402_v2  ;;  %v1032_v34 = vld [vmem:[#allocation9 + $0x8] sm:$0xff]  ;;  %v1031_v36 = vld [vmem:[#allocation9] sm:$0xff]  ;;  %v1028_v37 = vld [vmem:[%s4708_s9] sm:$0xff] }
  0x91   : > { %3675 = vmatpush3.msra.mxu0 %v764_v11  ;;  %3729 = vmatpush3.msra.mxu1 %v1042_v12  ;;  %v772_v38 = vld [vmem:[%s5349_s8 + $0x10] sm:$0xff]  ;;  %v741_v39 = vld [vmem:[#allocation7 + $0x18] sm:$0xff]  ;;  %v742_v40 = vld [vmem:[#allocation7 + $0x20] sm:$0xff] }
  0x92   : > { %3676 = vmatprep.subr.mxu0 %v763_v13  ;;  %3730 = vmatprep.subr.mxu1 %v4402_v2  ;;  %v770_v41 = vld [vmem:[%s5349_s8] sm:$0xff]  ;;  %v1029_v42 = vld [vmem:[%s4708_s9 + $0x8] sm:$0xff]  ;;  %v773_v43 = vld [vmem:[%s5349_s8 + $0x18] sm:$0xff] }
  0x93   : > { %3677 = vmatpush3.msra.mxu0 %v763_v13  ;;  %3696 = vmatprep.mubr.f32.mxu0 %v738_v14  ;;  %v743_v44 = vld [vmem:[#allocation7 + $0x28] sm:$0xff]  ;;  %v744_v45 = vld [vmem:[#allocation7 + $0x30] sm:$0xff]  ;;  %v771_v46 = vld [vmem:[%s5349_s8 + $0x8] sm:$0xff] }
  0x94   : > { %3678 = vmatprep.subr.mxu0 %v762_v15  ;;  %3731 = vmatpush3.msra.mxu1 %v1041_v16  ;;  %v1030_v47 = vld [vmem:[%s4708_s9 + $0x10] sm:$0xff]  ;;  %v775_v48 = vld [vmem:[%s5349_s8 + $0x28] sm:$0xff]  ;;  %v745_v49 = vld [vmem:[#allocation7 + $0x38] sm:$0xff] }
  0x95   : > { %3679 = vmatpush3.msra.mxu0 %v762_v15  ;;  %3732 = vmatprep.subr.mxu1 %v4402_v2  ;;  %v746_v50 = vld [vmem:[#allocation7 + $0x40] sm:$0xff]  ;;  %v774_v51 = vld [vmem:[%s5349_s8 + $0x20] sm:$0xff]  ;;  %v777_v52 = vld [vmem:[%s5349_s8 + $0x38] sm:$0xff] }
  0x96   : > { %3680 = vmatprep.subr.mxu0 %v761_v17  ;;  %3733 = vmatpush3.msra.mxu1 %v1040_v18  ;;  %v747_v53 = vld [vmem:[#allocation7 + $0x48] sm:$0xff]  ;;  %v748_v54 = vld [vmem:[#allocation7 + $0x50] sm:$0xff]  ;;  %v779_v56 = vld [vmem:[%s5349_s8 + $0x48] sm:$0xff] }
  0x97   : > { %3681 = vmatpush3.msra.mxu0 %v761_v17  ;;  %3734 = vmatprep.subr.mxu1 %v4402_v2  ;;  %v776_v55 = vld [vmem:[%s5349_s8 + $0x30] sm:$0xff]  ;;  %v749_v57 = vld [vmem:[#allocation7 + $0x58] sm:$0xff]  ;;  %v750_v58 = vld [vmem:[#allocation7 + $0x60] sm:$0xff] }
  0x98   : > { %3682 = vmatprep.subr.mxu0 %v760_v19  ;;  %3735 = vmatpush3.msra.mxu1 %v1039_v20  ;;  %v778_v59 = vld [vmem:[%s5349_s8 + $0x40] sm:$0xff]  ;;  %v781_v60 = vld [vmem:[%s5349_s8 + $0x58] sm:$0xff]  ;;  %v751_v61 = vld [vmem:[#allocation7 + $0x68] sm:$0xff] }
  0x99   : > { %3683 = vmatpush3.msra.mxu0 %v760_v19  ;;  %3736 = vmatprep.subr.mxu1 %v4402_v2  ;;  %v752_v62 = vld [vmem:[#allocation7 + $0x70] sm:$0xff]  ;;  %v780_v63 = vld [vmem:[%s5349_s8 + $0x50] sm:$0xff]  ;;  %v783_v0 = vld [vmem:[%s5349_s8 + $0x68] sm:$0xff] }
  0x9a   : > { %3684 = vmatprep.subr.mxu0 %v759_v21  ;;  %3737 = vmatpush3.msra.mxu1 %v1038_v22  ;;  %v753_v1 = vld [vmem:[#allocation7 + $0x78] sm:$0xff]  ;;  %v785_v3 = vld [vmem:[%s5349_s8 + $0x78] sm:$0xff]  ;;  %v784_v4 = vld [vmem:[%s5349_s8 + $0x70] sm:$0xff] }
  0x9b   : > { %3685 = vmatpush3.msra.mxu0 %v759_v21  ;;  %3738 = vmatprep.subr.mxu1 %v4402_v2  ;;  %v3447_v13 = vld [vmem:[%s5351_s10] ss:$0 sm:$0xff] }
  0x9c   : > { %3686 = vmatprep.subr.mxu0 %v758_v23  ;;  %3739 = vmatpush3.msra.mxu1 %v1037_v24 }
  0x9d   : > { %3687 = vmatpush3.msra.mxu0 %v758_v23  ;;  %3740 = vmatprep.subr.mxu1 %v4402_v2 }
  0x9e   : > { %3688 = vmatprep.subr.mxu0 %v757_v25  ;;  %3741 = vmatpush3.msra.mxu1 %v1036_v26 }
  0x9f   : > { %3689 = vmatpush3.msra.mxu0 %v757_v25  ;;  %3742 = vmatprep.subr.mxu1 %v4402_v2 }
  0xa0   : > { %3690 = vmatprep.subr.mxu0 %v756_v27  ;;  %3743 = vmatpush3.msra.mxu1 %v1035_v28 }
  0xa1   : > { %3691 = vmatpush3.msra.mxu0 %v756_v27  ;;  %3744 = vmatprep.subr.mxu1 %v4402_v2 }
  0xa2   : > { %3692 = vmatprep.subr.mxu0 %v755_v29  ;;  %3745 = vmatpush3.msra.mxu1 %v1034_v30 }
  0xa3   : > { %3693 = vmatpush3.msra.mxu0 %v755_v29  ;;  %3746 = vmatprep.subr.mxu1 %v4402_v2 }
  0xa4   : > { %3694 = vmatprep.subr.mxu0 %v754_v31  ;;  %3747 = vmatpush3.msra.mxu1 %v1033_v32 }
  0xa5   : > { %3695 = vmatpush3.msra.mxu0 %v754_v31  ;;  %3748 = vmatprep.subr.mxu1 %v4402_v2 }
  0xa6   : > { %3697 = vmatmul.mubr.f32.vlgmr.msra.gmra.mxu0 %v739_v33  ;;  %3749 = vmatpush3.msra.mxu1 %v1032_v34 }
  0xa7   : > { %3699 = vmatprep.mubr.f32.mxu0 %v740_v35  ;;  %3750 = vmatprep.subr.mxu1 %v4402_v2 }
  0xa8   : > { %3751 = vmatpush3.msra.mxu1 %v1031_v36  ;;  %4107 = vset.pattern.permute.xlu0 %v4404_v5 }
  0xa9   : > { %3753 = vmatmul.mubr.f32.vlgmr.msra.gmra.mxu1 %v1028_v37  ;;  %798 = vperm.xlu1 %4108, %v772_v38  }
  0xaa   : > { %3700 = vmatmul.mubr.f32.gmra.mxu0 %v741_v39  ;;  %3755 = vmatprep.mubr.msk.f32.mxu1 %vm4403_vm0, %v4402_v2 }
  0xab   : > { %3702 = vmatprep.mubr.f32.mxu0 %v742_v40  ;;  %788 = vperm.xlu0 %4107, %v770_v41  }
  0xad   : > { %3756 = vmatmul.mubr.f32.gmra.mxu1 %v1029_v42  ;;  %803 = vperm.xlu1 %4108, %v773_v43  }
  0xae   : > { %3703 = vmatmul.mubr.f32.gmra.mxu0 %v743_v44  ;;  %3758 = vmatprep.mubr.msk.f32.mxu1 %vm4403_vm0, %v4402_v2  ;;  %v782_v2 = vld [vmem:[%s5349_s8 + $0x60] sm:$0xff] }
  0xaf   : > { %3705 = vmatprep.mubr.f32.mxu0 %v744_v45  ;;  %793 = vperm.xlu0 %4107, %v771_v46  }
  0xb1   : > { %3759 = vmatmul.mubr.f32.gmra.mxu1 %v1030_v47  ;;  %813 = vperm.xlu1 %4108, %v775_v48  }
  0xb2   : > { %3706 = vmatmul.mubr.f32.gmra.mxu0 %v745_v49 }
  0xb3   : > { %3708 = vmatprep.mubr.f32.mxu0 %v746_v50  ;;  %808 = vperm.xlu0 %4107, %v774_v51  }
  0xb5   : > { %823 = vperm.xlu1 %4108, %v777_v52  }
  0xb6   : > { %3709 = vmatmul.mubr.f32.gmra.mxu0 %v747_v53 }
  0xb7   : > { %3711 = vmatprep.mubr.f32.mxu0 %v748_v54  ;;  %818 = vperm.xlu0 %4107, %v776_v55  }
  0xb9   : > { %833 = vperm.xlu1 %4108, %v779_v56  }
  0xba   : > { %3712 = vmatmul.mubr.f32.gmra.mxu0 %v749_v57 }
  0xbb   : > { %3714 = vmatprep.mubr.f32.mxu0 %v750_v58  ;;  %828 = vperm.xlu0 %4107, %v778_v59  }
  0xbd   : > { %843 = vperm.xlu1 %4108, %v781_v60  }
  0xbe   : > { %3715 = vmatmul.mubr.f32.gmra.mxu0 %v751_v61 }
  0xbf   : > { %3717 = vmatprep.mubr.f32.mxu0 %v752_v62  ;;  %838 = vperm.xlu0 %4107, %v780_v63  }
  0xc1   : > { %853 = vperm.xlu1 %4108, %v783_v0  }
  0xc2   : > { %3718 = vmatmul.mubr.f32.gmra.mxu0 %v753_v1 }
  0xc3   : > { %848 = vperm.xlu0 %4107, %v782_v2  }
  0xc5   : > { %863 = vperm.xlu1 %4108, %v785_v3  }
  0xc7   : > { %858 = vperm.xlu0 %4107, %v784_v4  }
 0x124   : > { %v799_v5 = vpop.permute.xlu1 %798 }
 0x126   : > { %v789_v6 = vpop.permute.xlu0 %788 }
 0x128   : > { %v804_v7 = vpop.permute.xlu1 %803 }
 0x12a   : > { %v794_v8 = vpop.permute.xlu0 %793 }
 0x12c   : > { %v814_v9 = vpop.permute.xlu1 %813 }
 0x12e   : > { %v809_v10 = vpop.permute.xlu0 %808 }
 0x130   : > { %v824_v17 = vpop.permute.xlu1 %823 }
 0x132   : > { %v819_v22 = vpop.permute.xlu0 %818 }
 0x134   : > { %v834_v30 = vpop.permute.xlu1 %833 }
 0x136   : > { %v829_v34 = vpop.permute.xlu0 %828 }
 0x138   : > { %v844_v41 = vpop.permute.xlu1 %843 }
 0x13a   : > { %v839_v44 = vpop.permute.xlu0 %838 }
 0x13c   : > { %v854_v49 = vpop.permute.xlu1 %853 }
 0x13e   : > { %v849_v52 = vpop.permute.xlu0 %848 }
 0x140   : > { %v864_v57 = vpop.permute.xlu1 %863 }
 0x142   : > { %v859_v60 = vpop.permute.xlu0 %858 }
 0x166   : > { %v3698_v11 = vpop.f32.mrf.mxu0 }
 0x167   : > { %v938_v12 = vadd.f32 %v3698_v11, %v794_v8 }
 0x168   : > { %v932_v14 = vpop.f32.mrf.mxu0 }
 0x169   : > { %1013 = vst.msk [vmem:[#allocation2 + $0x8] sm:$0xff] %vm1011_vm1, %v938_v12  ;;  %v933_v15 = vadd.f32 %v932_v14, %v789_v6  ;;  %v1120_v16 = vpop.f32.mrf.mxu1 }
 0x16a   : > { %v3701_v18 = vpop.f32.mrf.mxu0  ;;  %v1121_v19 = vadd.f32 %v3447_v13, %v1120_v16 }
 0x16b   : > { %1012 = vst.msk [vmem:[#allocation2] sm:$0xff] %vm1011_vm1, %v933_v15  ;;  %v948_v20 = vadd.f32 %v3701_v18, %v804_v7  ;;  %v3754_v21 = vpop.f32.mrf.mxu1 }
 0x16c   : > { %v942_v23 = vpop.f32.mrf.mxu0  ;;  %1134 = vst [vmem:[#allocation3 + $0x10] sm:$0xff] %v1121_v19 }
 0x16d   : > { %1015 = vst.msk [vmem:[#allocation2 + $0x18] sm:$0xff] %vm1011_vm1, %v948_v20  ;;  %v943_v24 = vadd.f32 %v942_v23, %v799_v5  ;;  %v1125_v25 = vpop.f32.mrf.mxu1 }
 0x16e   : > { %v3704_v26 = vpop.f32.mrf.mxu0  ;;  %v1126_v27 = vadd.f32 %v3447_v13, %v1125_v25 }
 0x16f   : > { %1014 = vst.msk [vmem:[#allocation2 + $0x10] sm:$0xff] %vm1011_vm1, %v943_v24  ;;  %v958_v28 = vadd.f32 %v3704_v26, %v814_v9  ;;  %v3757_v29 = vpop.f32.mrf.mxu1 }
 0x170   : > { %v952_v31 = vpop.f32.mrf.mxu0  ;;  %1135 = vst [vmem:[#allocation3] sm:$0xff] %v1126_v27 }
 0x171   : > { %1017 = vst.msk [vmem:[#allocation2 + $0x28] sm:$0xff] %vm1011_vm1, %v958_v28  ;;  %v953_v32 = vadd.f32 %v952_v31, %v809_v10  ;;  %v1130_v33 = vpop.f32.mrf.mxu1 }
 0x172   : > { %v3707_v35 = vpop.f32.mrf.mxu0  ;;  %v1131_v36 = vadd.f32 %v3447_v13, %v1130_v33 }
 0x173   : > { %1016 = vst.msk [vmem:[#allocation2 + $0x20] sm:$0xff] %vm1011_vm1, %v953_v32  ;;  %v968_v37 = vadd.f32 %v3707_v35, %v824_v17  ;;  %v3760_v38 = vpop.f32.mrf.mxu1 }
 0x174   : > { %v962_v39 = vpop.f32.mrf.mxu0  ;;  %1136 = vst [vmem:[#allocation3 + $0x8] sm:$0xff] %v1131_v36 }
 0x175   : > { %1019 = vst.msk [vmem:[#allocation2 + $0x38] sm:$0xff] %vm1011_vm1, %v968_v37  ;;  %v963_v40 = vadd.f32 %v962_v39, %v819_v22 }
 0x176   : > { %v3710_v42 = vpop.f32.mrf.mxu0 }
 0x177   : > { %1018 = vst.msk [vmem:[#allocation2 + $0x30] sm:$0xff] %vm1011_vm1, %v963_v40  ;;  %v978_v43 = vadd.f32 %v3710_v42, %v834_v30 }
 0x178   : > { %v972_v45 = vpop.f32.mrf.mxu0 }
 0x179   : > { %1021 = vst.msk [vmem:[#allocation2 + $0x48] sm:$0xff] %vm1011_vm1, %v978_v43  ;;  %v973_v46 = vadd.f32 %v972_v45, %v829_v34 }
 0x17a   : > { %v3713_v47 = vpop.f32.mrf.mxu0 }
 0x17b   : > { %1020 = vst.msk [vmem:[#allocation2 + $0x40] sm:$0xff] %vm1011_vm1, %v973_v46  ;;  %v988_v48 = vadd.f32 %v3713_v47, %v844_v41 }
 0x17c   : > { %v982_v50 = vpop.f32.mrf.mxu0 }
 0x17d   : > { %1023 = vst.msk [vmem:[#allocation2 + $0x58] sm:$0xff] %vm1011_vm1, %v988_v48  ;;  %v983_v51 = vadd.f32 %v982_v50, %v839_v44 }
 0x17e   : > { %v3716_v53 = vpop.f32.mrf.mxu0 }
 0x17f   : > { %1022 = vst.msk [vmem:[#allocation2 + $0x50] sm:$0xff] %vm1011_vm1, %v983_v51  ;;  %v998_v54 = vadd.f32 %v3716_v53, %v854_v49 }
 0x180   : > { %v992_v55 = vpop.f32.mrf.mxu0 }
 0x181   : > { %1025 = vst.msk [vmem:[#allocation2 + $0x68] sm:$0xff] %vm1011_vm1, %v998_v54  ;;  %v993_v56 = vadd.f32 %v992_v55, %v849_v52 }
 0x182   : > { %v3719_v58 = vpop.f32.mrf.mxu0 }
 0x183   : > { %1024 = vst.msk [vmem:[#allocation2 + $0x60] sm:$0xff] %vm1011_vm1, %v993_v56  ;;  %v1008_v59 = vadd.f32 %v3719_v58, %v864_v57 }
 0x184   : > { %v1002_v61 = vpop.f32.mrf.mxu0 }
 0x185   : > { %1027 = vst.msk [vmem:[#allocation2 + $0x78] sm:$0xff] %vm1011_vm1, %v1008_v59  ;;  %v1003_v62 = vadd.f32 %v1002_v61, %v859_v60 }
 0x187   : > { %1026 = vst.msk [vmem:[#allocation2 + $0x70] sm:$0xff] %vm1011_vm1, %v1003_v62 }
 0x188 PF: > { %v4824_v63 = vld [vmem:[%s4684_s27] sm:$0xff]  ;;  %v4405_v4 = vmov 0.0   ;;  %v1187_v6 = vld [vmem:[%s5346_s5 + $0x70] sm:$0xff]  ;;  %v1186_v7 = vld [vmem:[%s5346_s5 + $0x68] sm:$0xff]  ;;  %vm4406_vm2 = vmmov 0   ;;  %s5407_s27 = sld [smem:[#allocation26_spill]] }
 0x189   : > { %1140 = vadd.xlane.f32.xlu0 %v4824_v63  ;;  %3761 = vmatprep.subr.mxu0 %v4405_v4  ;;  %v1188_v5 = vld [vmem:[%s5346_s5 + $0x78] sm:$0xff]  ;;  %v1185_v8 = vld [vmem:[%s5346_s5 + $0x60] sm:$0xff]  ;;  %v1183_v10 = vld [vmem:[%s5346_s5 + $0x50] sm:$0xff]  ;;  %s4407_s16 = smov 112   ;;  %vm1278_vm5 = vcmask 261120   ;;  %vm1352_vm6 = vcmask 130048  }
 0x18a   : > { %3796 = vmatprep.subr.mxu1 %v4405_v4  ;;  %3762 = vmatpush3.msra.mxu0 %v1188_v5  ;;  %v1184_v9 = vld [vmem:[%s5346_s5 + $0x58] sm:$0xff]  ;;  %v1182_v11 = vld [vmem:[%s5346_s5 + $0x48] sm:$0xff]  ;;  %v1181_v12 = vld [vmem:[%s5346_s5 + $0x40] sm:$0xff]  ;;  %s4408_s19 = smov 96   ;;  %s4409_s18 = smov 64   ;;  %vm1529_vm7 = vcmask 64512  }
 0x18b   : > { %3763 = vmatprep.subr.mxu0 %v4405_v4  ;;  %3793 = vmatprep.mubr.msk.f32.mxu0 %vm4406_vm2, %v4405_v4  ;;  %v1180_v13 = vld [vmem:[%s5346_s5 + $0x38] sm:$0xff]  ;;  %v1179_v14 = vld [vmem:[%s5346_s5 + $0x30] sm:$0xff]  ;;  %v1178_v15 = vld [vmem:[%s5346_s5 + $0x28] sm:$0xff]  ;;  %s4410_s15 = smov 32   ;;  %s5408_s28 = sld [smem:[#allocation30_spill]] }
 0x18c   : > { %3764 = vmatpush3.msra.mxu0 %v1187_v6  ;;  %3804 = vmatprep.mubr.msk.f32.mxu1 %vm4406_vm2, %v4405_v4  ;;  %v1177_v16 = vld [vmem:[%s5346_s5 + $0x20] sm:$0xff]  ;;  %v1176_v17 = vld [vmem:[%s5346_s5 + $0x18] sm:$0xff]  ;;  %v1175_v18 = vld [vmem:[%s5346_s5 + $0x10] sm:$0xff]  ;;  %s5409_s12 = sld [smem:[#allocation33_spill]]  ;;  %s3476_s25 = sshll.u32 %s4381_s1, 1 }
 0x18d   : > { %3765 = vmatprep.subr.mxu0 %v4405_v4  ;;  %v1174_v19 = vld [vmem:[%s5346_s5 + $0x8] sm:$0xff]  ;;  %v1173_v20 = vld [vmem:[%s5346_s5] sm:$0xff]  ;;  %v1277_v21 = vld [vmem:[#allocation2 + $0x18] sm:$0xff]  ;;  %s5412_s9 = sld [smem:[#allocation34_spill]]  ;;  %s3274_s0 = sadd.s32 %s4377_s21, %s3476_s25 }
 0x18e   : > { %3766 = vmatpush3.msra.mxu0 %v1186_v7  ;;  %v1276_v22 = vld [vmem:[#allocation2 + $0x10] sm:$0xff]  ;;  %3797 = vmatpush3.msra.mxu1 %v1277_v21  ;;  %v3448_v31 = vld [vmem:[%s5407_s27] ss:$0 sm:$0xff]  ;;  %v1275_v37 = vld [vmem:[#allocation2 + $0x8] sm:$0xff]  ;;  %s5414_s27 = sld [smem:[#allocation36_spill]]  ;;  %s3477_s3 = sshll.u32 %s3274_s0, 7 }
 0x18f   : > { %3767 = vmatprep.subr.mxu0 %v4405_v4  ;;  %3798 = vmatprep.subr.mxu1 %v4405_v4  ;;  %v3449_v34 = vld [vmem:[%s5345_s4] ss:$0 sm:$0xff]  ;;  %v1704_v46 = vld [vmem:[#allocation2 + $0x38] sm:$0xff]  ;;  %v1703_v47 = vld [vmem:[#allocation2 + $0x30] sm:$0xff]  ;;  %s3278_s29 = sshll.u32 %s4710_s17, 4  ;;  %s5415_s24 = sld [smem:[#allocation37_spill]]  ;;  %s3279_s29 = int_to_ptr.vmem [resolvable:$true] %s3278_s29 }
 0x190   : > { %3768 = vmatpush3.msra.mxu0 %v1185_v8  ;;  %3799 = vmatpush3.msra.mxu1 %v1276_v22  ;;  %v1274_v38 = vld [vmem:[#allocation2] sm:$0xff]  ;;  %v4930_v48 = vld [vmem:[#allocation2 + $0x28] sm:$0xff]  ;;  %v4937_v51 = vld [vmem:[#allocation3 + $0x10] sm:$0xff]  ;;  %s3263_s1 = scalar_lea.sflag [#allocation6], %s4680_s7  ;;  %s4411_s21 = smov [#allocation13]  }
 0x191   : > { %3769 = vmatprep.subr.mxu0 %v4405_v4  ;;  %3800 = vmatprep.subr.mxu1 %v4405_v4  ;;  %v3450_v39 = vld [vmem:[%s5347_s6] ss:$0 sm:$0xff]  ;;  %v4964_v62 = vld [vmem:[#allocation3 + $0x8] sm:$0xff]  ;;  %v4998_v5 = vld [vmem:[#allocation2 + $0x70] sm:$0xff] }
 0x192   : > { %3770 = vmatpush3.msra.mxu0 %v1184_v9  ;;  %3801 = vmatpush3.msra.mxu1 %v1275_v37  ;;  %v1701_v49 = vld [vmem:[#allocation2 + $0x20] sm:$0xff]  ;;  %v5002_v6 = vld [vmem:[#allocation2 + $0x68] sm:$0xff] }
 0x193   : > { %3771 = vmatprep.subr.mxu0 %v4405_v4  ;;  %3802 = vmatprep.subr.mxu1 %v4405_v4  ;;  %v4935_v50 = vld [vmem:[#allocation3] sm:$0xff] }
 0x194   : > { %3772 = vmatpush3.msra.mxu0 %v1183_v10  ;;  %3803 = vmatpush3.msra.mxu1 %v1274_v38  ;;  %v5006_v7 = vld [vmem:[#allocation2 + $0x60] sm:$0xff] }
 0x195   : > { %3773 = vmatprep.subr.mxu0 %v4405_v4  ;;  %3807 = vmatprep.subr.mxu1 %v4405_v4 }
 0x196   : > { %3774 = vmatpush3.msra.mxu0 %v1182_v11  ;;  %1453 = vrot.lane.b32.xlu1 %v1277_v21, %s4407_s16 }
 0x197   : > { %3775 = vmatprep.subr.mxu0 %v4405_v4 }
 0x198   : > { %3776 = vmatpush3.msra.mxu0 %v1181_v12 }
 0x199   : > { %3777 = vmatprep.subr.mxu0 %v4405_v4 }
 0x19a   : > { %3778 = vmatpush3.msra.mxu0 %v1180_v13  ;;  %1449 = vrot.lane.b32.xlu1 %v1275_v37, %s4407_s16  ;;  %v1625_v37 = vld [vmem:[#allocation10 + $0x10] sm:$0xff] }
 0x19b   : > { %3779 = vmatprep.subr.mxu0 %v4405_v4 }
 0x19c   : > { %3780 = vmatpush3.msra.mxu0 %v1179_v14 }
 0x19d   : > { %3781 = vmatprep.subr.mxu0 %v4405_v4 }
 0x19e   : > { %3782 = vmatpush3.msra.mxu0 %v1178_v15 }
 0x19f   : > { %3783 = vmatprep.subr.mxu0 %v4405_v4 }
 0x1a0   : > { %3784 = vmatpush3.msra.mxu0 %v1177_v16 }
 0x1a1   : > { %3785 = vmatprep.subr.mxu0 %v4405_v4 }
 0x1a2   : > { %3786 = vmatpush3.msra.mxu0 %v1176_v17 }
 0x1a3   : > { %3787 = vmatprep.subr.mxu0 %v4405_v4 }
 0x1a4   : > { %3788 = vmatpush3.msra.mxu0 %v1175_v18 }
 0x1a5   : > { %3789 = vmatprep.subr.mxu0 %v4405_v4 }
 0x1a6   : > { %3790 = vmatpush3.msra.mxu0 %v1174_v19 }
 0x1a7   : > { %3791 = vmatprep.subr.mxu0 %v4405_v4 }
 0x1a8   : > { %3792 = vmatpush3.msra.mxu0 %v1173_v20 }
 0x1a9   : > { %3841 = vmatprep.subr.mxu0 %v4405_v4 }
 0x208   : > { %v1454_v52 = vpop.permute.xlu1 %1453 }
 0x20c   : > { %v1450_v53 = vpop.permute.xlu1 %1449 }
 0x212   : > { %v1141_v0 = vpop.xlane.xlu0 %1140 }
 0x213   : > { %v1143_v1 = vmul.f32 0.0078125, %v1141_v0  ;;  %v4980_v0 = vld [vmem:[#allocation2 + $0x58] sm:$0xff] }
 0x215   : > { %v4828_v2 = vsub.f32 %v4824_v63, %v1143_v1  ;;  %v4984_v1 = vld [vmem:[#allocation2 + $0x50] sm:$0xff] }
 0x217   : > { %v1145_v3 = vmul.f32 %v4828_v2, %v4828_v2  ;;  %v1164_v32 = vmul.f32 %v3448_v31, %v4828_v2  ;;  %v4988_v2 = vld [vmem:[#allocation2 + $0x48] sm:$0xff] }
 0x219   : > { %1146 = vadd.xlane.f32.xlu0 %v1145_v3  ;;  %v4992_v3 = vld [vmem:[#allocation2 + $0x40] sm:$0xff] }
 0x22f   : > { %1451 = vrot.lane.b32.xlu0 %v1276_v22, %s4407_s16 }
 0x2a2   : > { %v1147_v23 = vpop.xlane.xlu0 %1146 }
 0x2a3   : > { %v1148_v24 = vmul.f32 0.007874016, %v1147_v23 }
 0x2a5   : > { %4109 = vrsqrt.f32 %v1148_v24  ;;  %vm1151_vm3 = vcmp.eq.f32.partialorder %v1148_v24, inf  ;;  %v1154_v27 = vand.u32 2147483648, %v1148_v24  ;;  %vm1153_vm4 = vcmp.eq.f32.partialorder %v1148_v24, 0.0 }
 0x2a6   : > { %v1452_v61 = vpop.permute.xlu0 %1451 }
 0x2b2   : > { %v4110_v25 = vpop.eup %4109 }
 0x2b3   : > { %v1150_v26 = vmul.f32 %v4110_v25, %v1148_v24 }
 0x2b5   : > { %v1152_v28 = vsel %vm1151_vm3, %v1148_v24, %v1150_v26 }
 0x2b6   : > { %v1155_v29 = vsel %vm1153_vm4, %v1154_v27, %v1152_v28 }
 0x2b7   : > { %v1156_v30 = vadd.f32 1e-06, %v1155_v29 }
 0x2b9   : > { %4111 = vrcp.f32 %v1156_v30 }
 0x2c6   : > { %v4112_v33 = vpop.eup %4111 }
 0x2c7   : > { %v1165_v35 = vmul.f32 %v4112_v33, %v1164_v32 }
 0x2c9   : > { %v1172_v36 = vadd.f32 %v3449_v34, %v1165_v35 }
 0x2cb   : > { %3794 = vmatmul.mubr.f32.vlgmr.msra.gmra.mxu0 %v1172_v36  ;;  %v1626_v36 = vld [vmem:[#allocation10 + $0x18] sm:$0xff] }
 0x2cc   : > { %3849 = vmatprep.mubr.msk.f32.mxu0 %vm4406_vm2, %v4405_v4  ;;  %3842 = vmatpush3.msra.mxu0 %v1704_v46 }
 0x2cd   : > { %3843 = vmatprep.subr.mxu0 %v4405_v4 }
 0x2ce   : > { %3844 = vmatpush3.msra.mxu0 %v1703_v47 }
 0x2cf   : > { %3845 = vmatprep.subr.mxu0 %v4405_v4 }
 0x2d0   : > { %3846 = vmatpush3.msra.mxu0 %v4930_v48 }
 0x2d1   : > { %3847 = vmatprep.subr.mxu0 %v4405_v4 }
 0x2d2   : > { %3848 = vmatpush3.msra.mxu0 %v1701_v49 }
 0x2d3   : > { %3875 = vmatprep.subr.mxu0 %v4405_v4 }
 0x38b   : > { %v1262_v40 = vpop.f32.mrf.mxu0 }
 0x38c   : > { %v4921_v41 = vadd.f32 %v3450_v39, %v1262_v40  ;;  %v1623_v39 = vld [vmem:[#allocation10] sm:$0xff] }
 0x38d   : > { %v3795_v42 = vpop.f32.mrf.mxu0 }
 0x38e   : > { %3805 = vmatmul.mubr.msk.f32.vlgmr.msra.gmra.mxu1 %vm1278_vm5, %v4921_v41 }
 0x38f   : > { %3811 = vmatprep.mubr.msk.f32.mxu1 %vm4406_vm2, %v4405_v4  ;;  %3808 = vmatpush3.msra.mxu1 %v4935_v50 }
 0x390   : > { %3809 = vmatprep.subr.mxu1 %v4405_v4 }
 0x391   : > { %3810 = vmatpush3.msra.mxu1 %v4937_v51 }
 0x392   : > { %3814 = vmatprep.subr.mxu1 %v4405_v4 }
 0x44e   : > { %v1348_v43 = vpop.f32.mrf.mxu1 }
 0x44f   : > { %v1353_v44 = vsel %vm1352_vm6, %v1348_v43, -inf }
 0x450   : > { %1354 = vmax.xlane.f32.xlu1 %v1353_v44  ;;  %v3806_v45 = vpop.f32.mrf.mxu1 }
 0x461   : > { %1447 = vrot.lane.b32.xlu1 %v1274_v38, %s4407_s16  ;;  %v1624_v38 = vld [vmem:[#allocation10 + $0x8] sm:$0xff] }
 0x465   : > { %1705 = vrot.lane.b32.xlu1 %v4921_v41, %s4408_s19 }
 0x4d9   : > { %v4946_v54 = vpop.xlane.xlu1 %1354 }
 0x4da   : > { %v1359_v55 = vsub.f32 %v1348_v43, %v4946_v54  ;;  %v1356_v16 = vsub.f32 -inf, %v4946_v54 }
 0x4dc   : > { %v1360_v56 = vmul.f32 1.442695, %v1359_v55  ;;  %v1357_v17 = vmul.f32 1.442695, %v1356_v16 }
 0x4dd   : > { %v1448_v57 = vpop.permute.xlu1 %1447 }
 0x4de   : > { %4113 = vpow2.f32 %v1360_v56 }
 0x4df   : > { %4115 = vpow2.f32 %v1357_v17 }
 0x4e1   : > { %v4949_v58 = vpop.permute.xlu1 %1705 }
 0x4e2   : > { %3850 = vmatmul.mubr.msk.f32.vlgmr.msra.gmra.mxu0 %vm1278_vm5, %v4949_v58 }
 0x4e3   : > { %3883 = vmatprep.mubr.msk.f32.mxu0 %vm4406_vm2, %v4405_v4 }
 0x4eb   : > { %v4114_v59 = vpop.eup %4113 }
 0x4ec   : > { %3812 = vmatmul.mubr.msk.f32.vlgmr.msra.gmra.mxu1 %vm1352_vm6, %v4114_v59  ;;  %v1363_v60 = vsel %vm1352_vm6, %v4114_v59, 0.0  ;;  %v4116_v27 = vpop.eup %4115 }
 0x4ed   : > { %3815 = vmatpush3.msra.mxu1 %v1454_v52  ;;  %1364 = vadd.xlane.f32.xlu1 %v1363_v60  ;;  %v1362_v28 = vmul.f32 0.0, %v4116_v27 }
 0x4ee   : > { %3816 = vmatprep.subr.mxu1 %v4405_v4  ;;  %3822 = vmatprep.mubr.msk.f32.mxu1 %vm4406_vm2, %v4405_v4 }
 0x4ef   : > { %3817 = vmatpush3.msra.mxu1 %v1452_v61 }
 0x4f0   : > { %3818 = vmatprep.subr.mxu1 %v4405_v4 }
 0x4f1   : > { %3819 = vmatpush3.msra.mxu1 %v1450_v53 }
 0x4f2   : > { %3820 = vmatprep.subr.mxu1 %v4405_v4 }
 0x4f3   : > { %3821 = vmatpush3.msra.mxu1 %v1448_v57 }
 0x4f4   : > { %3823 = vmatmul.mubr.msk.f32.vlgmr.msra.gmra.mxu1 %vm1278_vm5, %v4921_v41  ;;  %3825 = vmatprep.subr.mxu1 %v4405_v4 }
 0x4f5   : > { %3826 = vmatpush3.msra.mxu1 %v4964_v62  ;;  %3827 = vmatprep.mubr.msk.f32.mxu1 %vm4406_vm2, %v4405_v4 }
 0x4f6   : > { %3830 = vmatprep.subr.mxu1 %v4405_v4 }
 0x4fe   : > { %1795 = vrot.lane.b32.xlu1 %v4937_v51, %s4408_s19 }
 0x502   : > { %1885 = vrot.lane.b32.xlu1 %v1704_v46, %s4407_s16 }
 0x506   : > { %1883 = vrot.lane.b32.xlu1 %v1703_v47, %s4407_s16 }
 0x50a   : > { %1879 = vrot.lane.b32.xlu1 %v1701_v49, %s4407_s16 }
 0x50e   : > { %1978 = vrot.lane.b32.xlu1 %v4964_v62, %s4408_s19 }
 0x512   : > { %2140 = vrot.lane.b32.xlu1 %v4921_v41, %s4409_s18 }
 0x516   : > { %2318 = vrot.lane.b32.xlu1 %v4980_v0, %s4407_s16 }
 0x51a   : > { %2316 = vrot.lane.b32.xlu1 %v4984_v1, %s4407_s16 }
 0x51e   : > { %2314 = vrot.lane.b32.xlu1 %v4988_v2, %s4407_s16 }
 0x522   : > { %2312 = vrot.lane.b32.xlu1 %v4992_v3, %s4407_s16 }
 0x526   : > { %2572 = vrot.lane.b32.xlu1 %v4921_v41, %s4410_s15 }
 0x52a   : > { %2748 = vrot.lane.b32.xlu1 %v4998_v5, %s4407_s16 }
 0x52e   : > { %2746 = vrot.lane.b32.xlu1 %v5002_v6, %s4407_s16 }
 0x532   : > { %2744 = vrot.lane.b32.xlu1 %v5006_v7, %s4407_s16 }
 0x576   : > { %v1365_v40 = vpop.xlane.xlu1 %1364 }
 0x577   : > { %v1366_v41 = vadd.f32 %v1365_v40, %v1362_v28 }
 0x57a   : > { %v1796_v45 = vpop.permute.xlu1 %1795 }
 0x57e   : > { %v1886_v46 = vpop.permute.xlu1 %1885 }
 0x582   : > { %v1884_v55 = vpop.permute.xlu1 %1883 }
 0x586   : > { %v1880_v56 = vpop.permute.xlu1 %1879 }
 0x58a   : > { %v1979_v59 = vpop.permute.xlu1 %1978 }
 0x5a2   : > { %v1775_v8 = vpop.f32.mrf.mxu0 }
 0x5a3   : > { %v1779_v15 = vsel %vm1352_vm6, %v1775_v8, -inf }
 0x5a4   : > { %v3851_v9 = vpop.f32.mrf.mxu0 }
 0x5ac   : > { %v1438_v10 = vpop.f32.mrf.mxu1 }
 0x5ad   : > { %v1442_v29 = vadd.f32 %v1438_v10, %v1362_v28 }
 0x5ae   : > { %v3813_v11 = vpop.f32.mrf.mxu1 }
 0x5b4   : > { %v1525_v12 = vpop.f32.mrf.mxu1 }
 0x5b5   : > { %v1530_v13 = vsel %vm1529_vm7, %v1525_v12, -inf }
 0x5b6   : > { %1531 = vmax.xlane.f32.xlu0 %v1530_v13  ;;  %v3824_v14 = vpop.f32.mrf.mxu1  ;;  %v2571_v13 = vld [vmem:[#allocation2 + $0x78] sm:$0xff] }
 0x5ba   : > { %1780 = vmax.xlane.f32.xlu0 %v1779_v15 }
 0x63f   : > { %v1532_v18 = vpop.xlane.xlu0 %1531 }
 0x640   : > { %v1533_v19 = vmax.f32 %v4946_v54, %v1532_v18 }
 0x642   : > { %v1534_v20 = vsub.f32 %v4946_v54, %v1533_v19  ;;  %v1537_v21 = vsub.f32 %v1525_v12, %v1533_v19 }
 0x643   : > { %v5015_v22 = vpop.xlane.xlu0 %1780 }
 0x644   : > { %v1535_v23 = vmul.f32 1.442695, %v1534_v20  ;;  %v1538_v24 = vmul.f32 1.442695, %v1537_v21  ;;  %v1785_v25 = vsub.f32 %v1775_v8, %v5015_v22  ;;  %v2141_v21 = vpop.permute.xlu1 %2140 }
 0x646   : > { %4117 = vpow2.f32 %v1535_v23  ;;  %v1786_v26 = vmul.f32 1.442695, %v1785_v25 }
 0x647   : > { %4119 = vpow2.f32 %v1538_v24 }
 0x648   : > { %4121 = vpow2.f32 %v1786_v26  ;;  %v2319_v23 = vpop.permute.xlu1 %2318 }
 0x64c   : > { %v2317_v26 = vpop.permute.xlu1 %2316 }
 0x653   : > { %v4118_v30 = vpop.eup %4117 }
 0x654   : > { %v4120_v31 = vpop.eup %4119  ;;  %v1545_v32 = vmul.f32 %v4118_v30, %v1442_v29  ;;  %v1540_v43 = vmul.f32 %v4118_v30, %v1366_v41 }
 0x655   : > { %v4122_v33 = vpop.eup %4121  ;;  %3828 = vmatmul.mubr.msk.f32.vlgmr.msra.gmra.mxu1 %vm1529_vm7, %v4120_v31  ;;  %v1541_v34 = vsel %vm1529_vm7, %v4120_v31, 0.0  ;;  %v2315_v31 = vpop.permute.xlu1 %2314 }
 0x656   : > { %1542 = vadd.xlane.f32.xlu0 %v1541_v34  ;;  %v1789_v35 = vsel %vm1352_vm6, %v4122_v33, 0.0  ;;  %3838 = vmatprep.mubr.msk.f32.mxu1 %vm4406_vm2, %v4405_v4  ;;  %v2058_v34 = vld [vmem:[#allocation10 + $0x20] sm:$0xff] }
 0x657   : > { %1790 = vadd.xlane.f32.xlu1 %v1789_v35  ;;  %3831 = vmatpush3.msra.mxu1 %v1626_v36 }
 0x658   : > { %3832 = vmatprep.subr.mxu1 %v4405_v4 }
 0x659   : > { %3833 = vmatpush3.msra.mxu1 %v1625_v37 }
 0x65a   : > { %3834 = vmatprep.subr.mxu1 %v4405_v4 }
 0x65b   : > { %3835 = vmatpush3.msra.mxu1 %v1624_v38 }
 0x65c   : > { %3836 = vmatprep.subr.mxu1 %v4405_v4 }
 0x65d   : > { %3837 = vmatpush3.msra.mxu1 %v1623_v39 }
 0x65e   : > { %3852 = vmatprep.subr.mxu1 %v4405_v4 }
 0x668   : > { %2228 = vrot.lane.b32.xlu1 %v4937_v51, %s4409_s18 }
 0x66c   : > { %1797 = vrot.lane.b32.xlu0 %v4935_v50, %s4408_s19  ;;  %s5411_s19 = sld [smem:[#allocation32_spill]] }
 0x670   : > { %1881 = vrot.lane.b32.xlu0 %v4930_v48, %s4407_s16 }
 0x6df   : > { %v1543_v42 = vpop.xlane.xlu0 %1542 }
 0x6e0   : > { %v1544_v44 = vadd.f32 %v1543_v42, %v1540_v43 }
 0x6e2   : > { %4123 = vrcp.f32 %v1544_v44 }
 0x6e3   : > { %v1798_v54 = vpop.permute.xlu0 %1797 }
 0x6e7   : > { %v1882_v57 = vpop.permute.xlu0 %1881 }
 0x6ef   : > { %v4124_v52 = vpop.eup %4123 }
 0x715   : > { %v1616_v47 = vpop.f32.mrf.mxu1 }
 0x716   : > { %v1620_v49 = vadd.f32 %v1616_v47, %v1545_v32  ;;  %v2313_v32 = vpop.permute.xlu1 %2312 }
 0x717   : > { %v3829_v48 = vpop.f32.mrf.mxu1 }
 0x718   : > { %v1622_v53 = vmul.f32 %v4124_v52, %v1620_v49 }
 0x71a   : > { %3839 = vmatmul.mubr.msk.f32.vlgmr.msra.gmra.mxu1 %vm1278_vm5, %v1622_v53 }
 0x71b   : > { %3853 = vmatpush3.msra.mxu1 %v1798_v54  ;;  %3856 = vmatprep.mubr.msk.f32.mxu1 %vm4406_vm2, %v4405_v4 }
 0x71c   : > { %3854 = vmatprep.subr.mxu1 %v4405_v4 }
 0x71d   : > { %3855 = vmatpush3.msra.mxu1 %v1796_v45 }
 0x71e   : > { %3859 = vmatprep.subr.mxu1 %v4405_v4  ;;  %3857 = vmatmul.mubr.msk.f32.vlgmr.msra.gmra.mxu1 %vm1352_vm6, %v4122_v33 }
 0x71f   : > { %3860 = vmatpush3.msra.mxu1 %v1886_v46  ;;  %3867 = vmatprep.mubr.msk.f32.mxu1 %vm4406_vm2, %v4405_v4 }
 0x720   : > { %3861 = vmatprep.subr.mxu1 %v4405_v4 }
 0x721   : > { %3862 = vmatpush3.msra.mxu1 %v1884_v55 }
 0x722   : > { %3863 = vmatprep.subr.mxu1 %v4405_v4 }
 0x723   : > { %3864 = vmatpush3.msra.mxu1 %v1882_v57 }
 0x724   : > { %3865 = vmatprep.subr.mxu1 %v4405_v4 }
 0x725   : > { %3866 = vmatpush3.msra.mxu1 %v1880_v56 }
 0x726   : > { %3868 = vmatmul.mubr.msk.f32.vlgmr.msra.gmra.mxu1 %vm1278_vm5, %v4949_v58  ;;  %3870 = vmatprep.subr.mxu1 %v4405_v4  ;;  %v1782_v58 = vsub.f32 -inf, %v5015_v22 }
 0x727   : > { %3871 = vmatpush3.msra.mxu1 %v1979_v59  ;;  %3872 = vmatprep.mubr.msk.f32.mxu1 %vm4406_vm2, %v4405_v4 }
 0x728   : > { %3886 = vmatprep.subr.mxu1 %v4405_v4  ;;  %v1783_v14 = vmul.f32 1.442695, %v1782_v58 }
 0x72a   : > { %4125 = vpow2.f32 %v1783_v14 }
 0x737   : > { %v4126_v24 = vpop.eup %4125 }
 0x738   : > { %v5057_v25 = vmul.f32 0.0, %v4126_v24 }
 0x7da   : > { %v5050_v60 = vpop.f32.mrf.mxu1 }
 0x7dc   : > { %v3840_v61 = vpop.f32.mrf.mxu1 }
 0x7de   : > { %v1870_v8 = vpop.f32.mrf.mxu1 }
 0x7df   : > { %v1874_v27 = vadd.f32 %v1870_v8, %v5057_v25 }
 0x7e0   : > { %v3858_v9 = vpop.f32.mrf.mxu1 }
 0x7e6   : > { %v1957_v10 = vpop.f32.mrf.mxu1 }
 0x7e7   : > { %v1961_v11 = vsel %vm1529_vm7, %v1957_v10, -inf }
 0x7e8   : > { %1962 = vmax.xlane.f32.xlu0 %v1961_v11  ;;  %v3869_v12 = vpop.f32.mrf.mxu1 }
 0x7fe   : > { %2750 = vrot.lane.b32.xlu0 %v2571_v13, %s4407_s16  ;;  %s5410_s16 = sld [smem:[#allocation31_spill]] }
 0x871   : > { %v1963_v15 = vpop.xlane.xlu0 %1962 }
 0x872   : > { %v1964_v16 = vmax.f32 %v5015_v22, %v1963_v15 }
 0x874   : > { %v1965_v17 = vsub.f32 %v5015_v22, %v1964_v16  ;;  %v1968_v18 = vsub.f32 %v1957_v10, %v1964_v16 }
 0x876   : > { %v1966_v19 = vmul.f32 1.442695, %v1965_v17  ;;  %v1969_v20 = vmul.f32 1.442695, %v1968_v18 }
 0x878   : > { %4127 = vpow2.f32 %v1966_v19 }
 0x879   : > { %4129 = vpow2.f32 %v1969_v20 }
 0x885   : > { %v5060_v28 = vpop.eup %4127 }
 0x886   : > { %v4130_v29 = vpop.eup %4129  ;;  %v5063_v30 = vmul.f32 %v5060_v28, %v1874_v27 }
 0x887   : > { %3873 = vmatmul.mubr.msk.f32.vlgmr.msra.gmra.mxu1 %vm1529_vm7, %v4130_v29  ;;  %v1972_v22 = vsel %vm1529_vm7, %v4130_v29, 0.0  ;;  %v2492_v29 = vld [vmem:[#allocation10 + $0x50] sm:$0xff] }
 0x888   : > { %3887 = vmatpush3.msra.mxu1 %v4980_v0  ;;  %1973 = vadd.xlane.f32.xlu0 %v1972_v22  ;;  %v2061_v0 = vld [vmem:[#allocation10 + $0x38] sm:$0xff] }
 0x889   : > { %3888 = vmatprep.subr.mxu1 %v4405_v4  ;;  %3894 = vmatprep.mubr.msk.f32.mxu1 %vm4406_vm2, %v4405_v4 }
 0x88a   : > { %3889 = vmatpush3.msra.mxu1 %v4984_v1  ;;  %v2573_v1 = vpop.permute.xlu1 %2572  ;;  %3876 = vmatpush3.msra.mxu0 %v2061_v0 }
 0x88b   : > { %3890 = vmatprep.subr.mxu1 %v4405_v4  ;;  %3877 = vmatprep.subr.mxu0 %v4405_v4 }
 0x88c   : > { %3891 = vmatpush3.msra.mxu1 %v4988_v2 }
 0x88d   : > { %3892 = vmatprep.subr.mxu1 %v4405_v4 }
 0x88e   : > { %3893 = vmatpush3.msra.mxu1 %v4992_v3  ;;  %v2749_v2 = vpop.permute.xlu1 %2748  ;;  %v2751_v3 = vpop.permute.xlu0 %2750 }
 0x88f   : > { %3895 = vmatmul.mubr.msk.f32.vlgmr.msra.gmra.mxu1 %vm1278_vm5, %v2141_v21  ;;  %3904 = vmatprep.subr.mxu1 %v4405_v4 }
 0x890   : > { %3905 = vmatpush3.msra.mxu1 %v2319_v23  ;;  %3912 = vmatprep.mubr.msk.f32.mxu1 %vm4406_vm2, %v4405_v4 }
 0x891   : > { %3906 = vmatprep.subr.mxu1 %v4405_v4 }
 0x892   : > { %3907 = vmatpush3.msra.mxu1 %v2317_v26  ;;  %v2747_v33 = vpop.permute.xlu1 %2746 }
 0x893   : > { %3908 = vmatprep.subr.mxu1 %v4405_v4 }
 0x894   : > { %3909 = vmatpush3.msra.mxu1 %v2315_v31 }
 0x895   : > { %3910 = vmatprep.subr.mxu1 %v4405_v4 }
 0x896   : > { %3911 = vmatpush3.msra.mxu1 %v2313_v32 }
 0x897   : > { %3913 = vmatmul.mubr.msk.f32.vlgmr.msra.gmra.mxu1 %vm1278_vm5, %v2141_v21  ;;  %3931 = vmatprep.subr.mxu1 %v4405_v4  ;;  %v3451_v21 = vld [vmem:[%s5408_s28] ss:$0 sm:$0xff]  ;;  %s5413_s28 = sld [smem:[#allocation22_spill]] }
 0x898   : > { %3932 = vmatpush3.msra.mxu1 %v2571_v13  ;;  %3939 = vmatprep.mubr.msk.f32.mxu1 %vm4406_vm2, %v4405_v4  ;;  %v1273_v23 = vadd.f32 %v3451_v21, %v4824_v63  ;;  %v2491_v63 = vld [vmem:[#allocation10 + $0x48] sm:$0xff] }
 0x899   : > { %3933 = vmatprep.subr.mxu1 %v4405_v4 }
 0x89a   : > { %3934 = vmatpush3.msra.mxu1 %v4998_v5  ;;  %v2745_v5 = vpop.permute.xlu1 %2744  ;;  %v1700_v24 = vadd.f32 %v5050_v60, %v1273_v23 }
 0x89b   : > { %3935 = vmatprep.subr.mxu1 %v4405_v4 }
 0x89c   : > { %3936 = vmatpush3.msra.mxu1 %v5002_v6  ;;  %v2060_v6 = vld [vmem:[#allocation10 + $0x30] sm:$0xff] }
 0x89d   : > { %3937 = vmatprep.subr.mxu1 %v4405_v4  ;;  %3878 = vmatpush3.msra.mxu0 %v2060_v6  ;;  %p5416_p10 = scmp.ne.s32.totalorder %s5413_s28, 0 }
 0x89e   : > { %3938 = vmatpush3.msra.mxu1 %v5006_v7  ;;  %2230 = vrot.lane.b32.xlu0 %v4935_v50, %s4409_s18  ;;  %v2059_v7 = vld [vmem:[#allocation10 + $0x28] sm:$0xff]  ;;  %v1791_v35 = vpop.xlane.xlu1 %1790 }
 0x89f   : > { %3940 = vmatmul.mubr.msk.f32.vlgmr.msra.gmra.mxu1 %vm1278_vm5, %v2573_v1  ;;  %3949 = vmatprep.subr.mxu1 %v4405_v4  ;;  %v1792_v36 = vadd.f32 %v1791_v35, %v5057_v25 }
 0x8a0   : > { %3950 = vmatpush3.msra.mxu1 %v2751_v3  ;;  %3957 = vmatprep.mubr.msk.f32.mxu1 %vm4406_vm2, %v4405_v4 }
 0x8a1   : > { %3951 = vmatprep.subr.mxu1 %v4405_v4  ;;  %3879 = vmatprep.subr.mxu0 %v4405_v4  ;;  %v1971_v38 = vmul.f32 %v5060_v28, %v1792_v36  ;;  %v2493_v28 = vld [vmem:[#allocation10 + $0x58] sm:$0xff] }
 0x8a2   : > { %3952 = vmatpush3.msra.mxu1 %v2749_v2  ;;  %3880 = vmatpush3.msra.mxu0 %v2059_v7  ;;  %v2229_v46 = vpop.permute.xlu1 %2228 }
 0x8a3   : > { %3953 = vmatprep.subr.mxu1 %v4405_v4  ;;  %3881 = vmatprep.subr.mxu0 %v4405_v4 }
 0x8a4   : > { %3954 = vmatpush3.msra.mxu1 %v2747_v33  ;;  %3882 = vmatpush3.msra.mxu0 %v2058_v34 }
 0x8a5   : > { %3955 = vmatprep.subr.mxu1 %v4405_v4  ;;  %3897 = vmatprep.subr.mxu0 %v4405_v4 }
 0x8a6   : > { %3956 = vmatpush3.msra.mxu1 %v2745_v5 }
 0x8a7   : > { %3958 = vmatmul.mubr.msk.f32.vlgmr.msra.gmra.mxu1 %vm1278_vm5, %v2573_v1 }
 0x8a8   : > { %3142 = vmatprep.mubr.f32.mxu1 %v4405_v4 }
 0x911   : > { %v1974_v37 = vpop.xlane.xlu0 %1973 }
 0x912   : > { %v1975_v39 = vadd.f32 %v1974_v37, %v1971_v38 }
 0x914   : > { %4131 = vrcp.f32 %v1975_v39 }
 0x915   : > { %v2231_v45 = vpop.permute.xlu0 %2230 }
 0x921   : > { %v4132_v42 = vpop.eup %4131 }
 0x947   : > { %v2050_v40 = vpop.f32.mrf.mxu1 }
 0x948   : > { %v2054_v41 = vadd.f32 %v2050_v40, %v5063_v30 }
 0x949   : > { %v3874_v43 = vpop.f32.mrf.mxu1 }
 0x94a   : > { %v2056_v44 = vmul.f32 %v4132_v42, %v2054_v41 }
 0x94c   : > { %3884 = vmatmul.mubr.msk.f32.vlgmr.msra.gmra.mxu0 %vm1278_vm5, %v2056_v44 }
 0x94d   : > { %3898 = vmatpush3.msra.mxu0 %v2231_v45  ;;  %3901 = vmatprep.mubr.msk.f32.mxu0 %vm4406_vm2, %v4405_v4 }
 0x94e   : > { %3899 = vmatprep.subr.mxu0 %v4405_v4 }
 0x94f   : > { %v2210_v47 = vpop.f32.mrf.mxu1  ;;  %3900 = vmatpush3.msra.mxu0 %v2229_v46 }
 0x950   : > { %v2214_v49 = vsel %vm1352_vm6, %v2210_v47, -inf  ;;  %3915 = vmatprep.subr.mxu0 %v4405_v4 }
 0x951   : > { %2215 = vmax.xlane.f32.xlu1 %v2214_v49  ;;  %v3896_v52 = vpop.f32.mrf.mxu1 }
 0x957   : > { %v2390_v48 = vpop.f32.mrf.mxu1 }
 0x958   : > { %v2394_v53 = vsel %vm1529_vm7, %v2390_v48, -inf }
 0x959   : > { %2395 = vmax.xlane.f32.xlu1 %v2394_v53  ;;  %v3914_v54 = vpop.f32.mrf.mxu1 }
 0x95f   : > { %v5118_v55 = vpop.f32.mrf.mxu1 }
 0x960   : > { %v2646_v17 = vsel %vm1352_vm6, %v5118_v55, -inf }
 0x961   : > { %v3941_v56 = vpop.f32.mrf.mxu1 }
 0x967   : > { %v5120_v57 = vpop.f32.mrf.mxu1 }
 0x968   : > { %v2826_v18 = vsel %vm1529_vm7, %v5120_v57, -inf }
 0x969   : > { %v3959_v59 = vpop.f32.mrf.mxu1 }
 0x96a   : > { %2410 = vrot.lane.b32.xlu1 %v4964_v62, %s4409_s18  ;;  %s4289_s18 = scalar_lea.vmem %s3279_s29, 128 }
 0x96b   : > { %p4290_p9 = scmp.ne.s32.totalorder %s3279_s29, %s4289_s18 }
 0x96d   : > { %p4291_p12 = pnand %p4290_p9, %p5416_p10 }
 0x96f   : > { %p4292_p0 = pneg %p4291_p12 }
 0x9da   : > { %v2216_v61 = vpop.xlane.xlu1 %2215 }
 0x9db   : > { %v2220_v8 = vsub.f32 %v2210_v47, %v2216_v61 }
 0x9dd   : > { %v2221_v9 = vmul.f32 1.442695, %v2220_v8  ;;  %v2923_v8 = vld [vmem:[#allocation10 + $0x68] sm:$0xff] }
 0x9df   : > { %4133 = vpow2.f32 %v2221_v9  ;;  %v2922_v9 = vld [vmem:[#allocation10 + $0x60] sm:$0xff] }
 0x9e2   : > { %v2396_v10 = vpop.xlane.xlu1 %2395 }
 0x9e3   : > { %v2397_v11 = vmax.f32 %v2216_v61, %v2396_v10 }
 0x9e5   : > { %v2398_v12 = vsub.f32 %v2216_v61, %v2397_v11  ;;  %v2401_v13 = vsub.f32 %v2390_v48, %v2397_v11 }
 0x9e6   : > { %v2411_v14 = vpop.permute.xlu1 %2410 }
 0x9e7   : > { %v2402_v58 = vmul.f32 1.442695, %v2401_v13 }
 0x9e9   : > { %4135 = vpow2.f32 %v2402_v58 }
 0x9ec   : > { %v4134_v15 = vpop.eup %4133 }
 0x9ed   : > { %3902 = vmatmul.mubr.msk.f32.vlgmr.msra.gmra.mxu0 %vm1352_vm6, %v4134_v15  ;;  %v2224_v16 = vsel %vm1352_vm6, %v4134_v15, 0.0 }
 0x9ee   : > { %2225 = vadd.xlane.f32.xlu0 %v2224_v16  ;;  %3916 = vmatpush3.msra.mxu0 %v2411_v14 }
 0x9ef   : > { %3917 = vmatprep.mubr.msk.f32.mxu0 %vm4406_vm2, %v4405_v4  ;;  %3920 = vmatprep.subr.mxu0 %v4405_v4 }
 0x9f2   : > { %2647 = vmax.xlane.f32.xlu0 %v2646_v17 }
 0x9f6   : > { %2827 = vmax.xlane.f32.xlu0 %v2826_v18  ;;  %v4136_v19 = vpop.eup %4135 }
 0x9f7   : > { %3918 = vmatmul.mubr.msk.f32.vlgmr.msra.gmra.mxu0 %vm1529_vm7, %v4136_v19  ;;  %v2405_v20 = vsel %vm1529_vm7, %v4136_v19, 0.0 }
 0x9f8   : > { %2406 = vadd.xlane.f32.xlu1 %v2405_v20  ;;  %3928 = vmatprep.mubr.msk.f32.mxu0 %vm4406_vm2, %v4405_v4 }
 0x9f9   : > { %3921 = vmatpush3.msra.mxu0 %v2493_v28 }
 0x9fa   : > { %3922 = vmatprep.subr.mxu0 %v4405_v4 }
 0x9fb   : > { %3923 = vmatpush3.msra.mxu0 %v2492_v29 }
 0x9fc   : > { %3924 = vmatprep.subr.mxu0 %v4405_v4 }
 0x9fd   : > { %3925 = vmatpush3.msra.mxu0 %v2491_v63 }
 0x9fe   : > { %3926 = vmatprep.subr.mxu0 %v4405_v4 }
 0xa09   : > { %2662 = vrot.lane.b32.xlu1 %v4935_v50, %s4410_s15  ;;  %v2490_v50 = vld [vmem:[#allocation10 + $0x40] sm:$0xff] }
 0xa0a   : > { %3927 = vmatpush3.msra.mxu0 %v2490_v50 }
 0xa0b   : > { %3942 = vmatprep.subr.mxu0 %v4405_v4 }
 0xa0c   : > { %v2131_v25 = vpop.f32.mrf.mxu0  ;;  %2660 = vrot.lane.b32.xlu0 %v4937_v51, %s4410_s15  ;;  %v2217_v51 = vsub.f32 -inf, %v2216_v61  ;;  %v2924_v61 = vld [vmem:[#allocation10 + $0x70] sm:$0xff] }
 0xa0d   : > { %v5146_v26 = vadd.f32 %v2131_v25, %v1700_v24  ;;  %2842 = vrot.lane.b32.xlu1 %v4964_v62, %s4410_s15  ;;  %v2399_v62 = vmul.f32 1.442695, %v2398_v12  ;;  %s4293_s15 = sshll.u32 %s4411_s21, 4  ;;  %s4294_s15 = int_to_ptr.vmem [resolvable:$false] %s4293_s15 }
 0xa0e   : > { %v3885_v27 = vpop.f32.mrf.mxu0  ;;  %v2218_v60 = vmul.f32 1.442695, %v2217_v51  ;;  %p4296_p6 = scmp.lt.s32.totalorder %s3279_s29, %s4294_s15 }
 0xa10   : > { %4137 = vpow2.f32 %v2218_v60 }
 0xa11   : > { %4139 = vpow2.f32 %v2399_v62 }
 0xa1d   : > { %v4138_v30 = vpop.eup %4137 }
 0xa1e   : > { %v2223_v22 = vmul.f32 0.0, %v4138_v30  ;;  %v4140_v0 = vpop.eup %4139 }
 0xa77   : > { %v2226_v31 = vpop.xlane.xlu0 %2225 }
 0xa78   : > { %v2227_v32 = vadd.f32 %v2226_v31, %v2223_v22  ;;  %v3065_v31 = vld [vmem:[%s5409_s12 + $0xf8] sm:$0xff] }
 0xa79   : > { %3078 = vmatprep.subr.mxu1 %v3065_v31 }
 0xa7a   : > { %v2404_v1 = vmul.f32 %v4140_v0, %v2227_v32  ;;  %v3064_v32 = vld [vmem:[%s5409_s12 + $0xf0] sm:$0xff] }
 0xa7b   : > { %v2648_v2 = vpop.xlane.xlu0 %2647  ;;  %3079 = vmatpush1.msra.mxu1 %v3064_v32 }
 0xa7c   : > { %v2652_v3 = vsub.f32 %v5118_v55, %v2648_v2  ;;  %v2649_v56 = vsub.f32 -inf, %v2648_v2 }
 0xa7e   : > { %v2653_v33 = vmul.f32 1.442695, %v2652_v3  ;;  %v2650_v59 = vmul.f32 1.442695, %v2649_v56  ;;  %v3060_v3 = vld [vmem:[%s5409_s12 + $0xd0] sm:$0xff]  ;;  %v3035_v56 = vld [vmem:[%s5409_s12 + $0x8] sm:$0xff] }
 0xa7f   : > { %v2828_v5 = vpop.xlane.xlu0 %2827 }
 0xa80   : > { %4141 = vpow2.f32 %v2653_v33  ;;  %v2829_v6 = vmax.f32 %v2648_v2, %v2828_v5  ;;  %v3059_v33 = vld [vmem:[%s5409_s12 + $0xc8] sm:$0xff]  ;;  %v3058_v5 = vld [vmem:[%s5409_s12 + $0xc0] sm:$0xff] }
 0xa81   : > { %v2407_v40 = vpop.xlane.xlu1 %2406 }
 0xa82   : > { %v2830_v7 = vsub.f32 %v2648_v2, %v2829_v6  ;;  %v2833_v34 = vsub.f32 %v5120_v57, %v2829_v6  ;;  %v2408_v41 = vadd.f32 %v2407_v40, %v2404_v1  ;;  %v2925_v57 = vld [vmem:[#allocation10 + $0x78] sm:$0xff]  ;;  %v3061_v2 = vld [vmem:[%s5409_s12 + $0xd8] sm:$0xff] }
 0xa83   : > { %v2661_v54 = vpop.permute.xlu0 %2660  ;;  %v3062_v1 = vld [vmem:[%s5409_s12 + $0xe0] sm:$0xff]  ;;  %v3057_v6 = vld [vmem:[%s5409_s12 + $0xb8] sm:$0xff] }
 0xa84   : > { %v2834_v35 = vmul.f32 1.442695, %v2833_v34  ;;  %v2831_v10 = vmul.f32 1.442695, %v2830_v7  ;;  %v3056_v7 = vld [vmem:[%s5409_s12 + $0xb0] sm:$0xff]  ;;  %v3055_v34 = vld [vmem:[%s5409_s12 + $0xa8] sm:$0xff] }
 0xa85   : > { %v2663_v53 = vpop.permute.xlu1 %2662  ;;  %v3049_v40 = vld [vmem:[%s5409_s12 + $0x78] sm:$0xff] }
 0xa86   : > { %4143 = vpow2.f32 %v2834_v35  ;;  %v3054_v35 = vld [vmem:[%s5409_s12 + $0xa0] sm:$0xff] }
 0xa87   : > { %4145 = vrcp.f32 %v2408_v41  ;;  %v3048_v41 = vld [vmem:[%s5409_s12 + $0x70] sm:$0xff] }
 0xa88   : > { %4147 = vpow2.f32 %v2650_v59  ;;  %v3182_v59 = vld [vmem:[#allocation12 + $0xf8] sm:$0xff] }
 0xa89   : > { %v2843_v55 = vpop.permute.xlu1 %2842  ;;  %4149 = vpow2.f32 %v2831_v10  ;;  %v3180_v10 = vld [vmem:[#allocation12 + $0xe8] sm:$0xff] }
 0xa8d   : > { %v4142_v36 = vpop.eup %4141 }
 0xa8e   : > { %v2656_v37 = vsel %vm1352_vm6, %v4142_v36, 0.0 }
 0xa8f   : > { %2657 = vadd.xlane.f32.xlu1 %v2656_v37  ;;  %v3052_v37 = vld [vmem:[%s5409_s12 + $0x90] sm:$0xff] }
 0xa93   : > { %v4144_v38 = vpop.eup %4143 }
 0xa94   : > { %v2837_v39 = vsel %vm1529_vm7, %v4144_v38, 0.0  ;;  %v4146_v49 = vpop.eup %4145 }
 0xa95   : > { %2838 = vadd.xlane.f32.xlu0 %v2837_v39  ;;  %v4148_v11 = vpop.eup %4147  ;;  %v3050_v39 = vld [vmem:[%s5409_s12 + $0x80] sm:$0xff] }
 0xa96   : > { %v2655_v12 = vmul.f32 0.0, %v4148_v11  ;;  %v4150_v14 = vpop.eup %4149  ;;  %v3164_v11 = vld [vmem:[#allocation12 + $0x68] sm:$0xff] }
 0xaad   : > { %v2303_v42 = vpop.f32.mrf.mxu0 }
 0xaae   : > { %v2307_v43 = vadd.f32 %v2303_v42, %v2223_v22  ;;  %v3047_v42 = vld [vmem:[%s5409_s12 + $0x68] sm:$0xff] }
 0xaaf   : > { %v3903_v44 = vpop.f32.mrf.mxu0 }
 0xab0   : > { %v2409_v45 = vmul.f32 %v4140_v0, %v2307_v43  ;;  %v3063_v0 = vld [vmem:[%s5409_s12 + $0xe8] sm:$0xff]  ;;  %v3046_v43 = vld [vmem:[%s5409_s12 + $0x60] sm:$0xff]  ;;  %v3045_v44 = vld [vmem:[%s5409_s12 + $0x58] sm:$0xff] }
 0xab1   : > { %3080 = vmatprep.subr.mxu1 %v3063_v0  ;;  %v3472_v0 = vld [vmem:[%s5410_s16] ss:$0 sm:$0xff] }
 0xab2   : > { %3081 = vmatpush1.msra.mxu1 %v3062_v1 }
 0xab3   : > { %3082 = vmatprep.subr.mxu1 %v3061_v2 }
 0xab4   : > { %3083 = vmatpush1.msra.mxu1 %v3060_v3  ;;  %v3473_v3 = vld [vmem:[%s5411_s19] ss:$0 sm:$0xff]  ;;  %s3276_s19 = scalar_lea.hbm %s5415_s24, %s3477_s3 }
 0xab5   : > { %3084 = vmatprep.subr.mxu1 %v3059_v33 }
 0xab6   : > { %3085 = vmatpush1.msra.mxu1 %v3058_v5 }
 0xab7   : > { %v2482_v46 = vpop.f32.mrf.mxu0  ;;  %3086 = vmatprep.subr.mxu1 %v3057_v6  ;;  %v3170_v6 = vld [vmem:[#allocation12 + $0x98] sm:$0xff] }
 0xab8   : > { %v2486_v47 = vadd.f32 %v2482_v46, %v2409_v45  ;;  %3087 = vmatpush1.msra.mxu1 %v3056_v7  ;;  %v3044_v45 = vld [vmem:[%s5409_s12 + $0x50] sm:$0xff]  ;;  %v3043_v46 = vld [vmem:[%s5409_s12 + $0x48] sm:$0xff]  ;;  %v3154_v7 = vld [vmem:[#allocation12 + $0x18] sm:$0xff] }
 0xab9   : > { %v3919_v52 = vpop.f32.mrf.mxu0  ;;  %3088 = vmatprep.subr.mxu1 %v3055_v34  ;;  %v3169_v34 = vld [vmem:[#allocation12 + $0x90] sm:$0xff] }
 0xaba   : > { %v2488_v48 = vmul.f32 %v4146_v49, %v2486_v47  ;;  %3089 = vmatpush1.msra.mxu1 %v3054_v35  ;;  %v3042_v47 = vld [vmem:[%s5409_s12 + $0x40] sm:$0xff]  ;;  %v3041_v49 = vld [vmem:[%s5409_s12 + $0x38] sm:$0xff]  ;;  %v3040_v52 = vld [vmem:[%s5409_s12 + $0x30] sm:$0xff] }
 0xabb   : > { %v3153_v35 = vld [vmem:[#allocation12 + $0x10] sm:$0xff] }
 0xabc   : > { %3929 = vmatmul.mubr.msk.f32.vlgmr.msra.gmra.mxu0 %vm1278_vm5, %v2488_v48  ;;  %v3039_v48 = vld [vmem:[%s5409_s12 + $0x28] sm:$0xff] }
 0xabd   : > { %3943 = vmatpush3.msra.mxu0 %v2663_v53  ;;  %3946 = vmatprep.mubr.msk.f32.mxu0 %vm4406_vm2, %v4405_v4  ;;  %v3038_v53 = vld [vmem:[%s5409_s12 + $0x20] sm:$0xff] }
 0xabe   : > { %3944 = vmatprep.subr.mxu0 %v4405_v4 }
 0xabf   : > { %3945 = vmatpush3.msra.mxu0 %v2661_v54  ;;  %v3037_v54 = vld [vmem:[%s5409_s12 + $0x18] sm:$0xff] }
 0xac0   : > { %3960 = vmatprep.subr.mxu0 %v4405_v4  ;;  %3947 = vmatmul.mubr.msk.f32.vlgmr.msra.gmra.mxu0 %vm1352_vm6, %v4142_v36  ;;  %v3053_v36 = vld [vmem:[%s5409_s12 + $0x98] sm:$0xff] }
 0xac1   : > { %3961 = vmatpush3.msra.mxu0 %v2843_v55  ;;  %3962 = vmatprep.mubr.msk.f32.mxu0 %vm4406_vm2, %v4405_v4  ;;  %v3036_v55 = vld [vmem:[%s5409_s12 + $0x10] sm:$0xff] }
 0xac2   : > { %3965 = vmatprep.subr.mxu0 %v4405_v4  ;;  %3090 = vmatprep.subr.mxu1 %v3053_v36  ;;  %v3168_v36 = vld [vmem:[#allocation12 + $0x88] sm:$0xff] }
 0xac3   : > { %3091 = vmatpush1.msra.mxu1 %v3052_v37  ;;  %v3152_v37 = vld [vmem:[#allocation12 + $0x8] sm:$0xff] }
 0xac4   : > { %3963 = vmatmul.mubr.msk.f32.vlgmr.msra.gmra.mxu0 %vm1529_vm7, %v4144_v38  ;;  %v3051_v38 = vld [vmem:[%s5409_s12 + $0x88] sm:$0xff] }
 0xac5   : > { %3973 = vmatprep.mubr.msk.f32.mxu0 %vm4406_vm2, %v4405_v4  ;;  %3966 = vmatpush3.msra.mxu0 %v2925_v57  ;;  %v3034_v57 = vld [vmem:[%s5409_s12] sm:$0xff] }
 0xac6   : > { %3967 = vmatprep.subr.mxu0 %v4405_v4  ;;  %3092 = vmatprep.subr.mxu1 %v3051_v38  ;;  %v3151_v38 = vld [vmem:[#allocation12] sm:$0xff] }
 0xac7   : > { %3968 = vmatpush3.msra.mxu0 %v2924_v61  ;;  %3093 = vmatpush1.msra.mxu1 %v3050_v39  ;;  %v3166_v61 = vld [vmem:[#allocation12 + $0x78] sm:$0xff]  ;;  %v3068_v39 = vlaneseq }
 0xac8   : > { %3969 = vmatprep.subr.mxu0 %v4405_v4  ;;  %3094 = vmatprep.subr.mxu1 %v3049_v40 }
 0xac9   : > { %3970 = vmatpush3.msra.mxu0 %v2923_v8  ;;  %3095 = vmatpush1.msra.mxu1 %v3048_v41  ;;  %v3181_v8 = vld [vmem:[#allocation12 + $0xf0] sm:$0xff]  ;;  %v3069_v40 = vshrl.u32 %v3068_v39, 7 }
 0xaca   : > { %3971 = vmatprep.subr.mxu0 %v4405_v4  ;;  %3096 = vmatprep.subr.mxu1 %v3047_v42  ;;  %v3066_v42 = vld [vmem:[%s5412_s9] sm:$0x3]  ;;  %s4295_s9 = scalar_lea.vmem %s4294_s15, 256 }
 0xacb   : > { %3972 = vmatpush3.msra.mxu0 %v2922_v9  ;;  %3097 = vmatpush1.msra.mxu1 %v3046_v43  ;;  %v3165_v9 = vld [vmem:[#allocation12 + $0x70] sm:$0xff]  ;;  %v3070_v41 = vsub.s32 0, %v3069_v40  ;;  %v3074_v43 = vsub.s32 1, %v3069_v40  ;;  %p4297_p2 = scmp.lt.s32.totalorder %s4295_s9, %s4289_s18 }
 0xacc   : > { %3098 = vmatprep.subr.mxu1 %v3045_v44  ;;  %3629 = vmatprep.subr.mxu0 %v3182_v59 }
 0xacd   : > { %3099 = vmatpush1.msra.mxu1 %v3044_v45  ;;  %v3071_v44 = vrot.slane %v3066_v42, %v3070_v41  ;;  %v3075_v45 = vrot.slane %v3066_v42, %v3074_v43  ;;  %p4298_p4 = por %p4297_p2, %p4296_p6 }
 0xace   : > { %3100 = vmatprep.subr.mxu1 %v3043_v46 }
 0xacf   : > { %3101 = vmatpush1.msra.mxu1 %v3042_v47  ;;  %p4299_p7 = pnand %p4298_p4, %p4292_p0 }
 0xad0   : > { %3102 = vmatprep.subr.mxu1 %v3041_v49 }
 0xad1   : > { %3103 = vmatpush1.msra.mxu1 %v3040_v52 }
 0xad2   : > { %3104 = vmatprep.subr.mxu1 %v3039_v48 }
 0xad3   : > { %3105 = vmatpush1.msra.mxu1 %v3038_v53 }
 0xad4   : > { %3106 = vmatprep.subr.mxu1 %v3037_v54 }
 0xad5   : > { %3107 = vmatpush1.msra.mxu1 %v3036_v55  ;;  %v3474_v55 = vld [vmem:[%s5414_s27] ss:$0 sm:$0xff] }
 0xad6   : > { %3108 = vmatprep.subr.mxu1 %v3035_v56 }
 0xad7   : > { %3109 = vmatpush1.msra.mxu1 %v3034_v57 }
 0xb18   : > { %v2658_v13 = vpop.xlane.xlu1 %2657 }
 0xb19   : > { %v2659_v58 = vadd.f32 %v2658_v13, %v2655_v12  ;;  %v3163_v13 = vld [vmem:[#allocation12 + $0x60] sm:$0xff] }
 0xb1b   : > { %v2836_v15 = vmul.f32 %v4150_v14, %v2659_v58  ;;  %v3178_v58 = vld [vmem:[#allocation12 + $0xd8] sm:$0xff] }
 0xb1e   : > { %v2839_v16 = vpop.xlane.xlu0 %2838 }
 0xb1f   : > { %v2840_v17 = vadd.f32 %v2839_v16, %v2836_v15  ;;  %v3177_v15 = vld [vmem:[#allocation12 + $0xd0] sm:$0xff] }
 0xb20   : > { %v3161_v16 = vld [vmem:[#allocation12 + $0x50] sm:$0xff] }
 0xb21   : > { %4151 = vrcp.f32 %v2840_v17  ;;  %v3176_v17 = vld [vmem:[#allocation12 + $0xc8] sm:$0xff] }
 0xb2e   : > { %v4152_v28 = vpop.eup %4151 }
 0xb7c   : > { %v2563_v18 = vpop.f32.mrf.mxu0 }
 0xb7d   : > { %v2567_v19 = vadd.f32 %v2563_v18, %v5146_v26  ;;  %v3160_v18 = vld [vmem:[#allocation12 + $0x48] sm:$0xff] }
 0xb7e   : > { %v3930_v20 = vpop.f32.mrf.mxu0 }
 0xb7f   : > { %v3159_v20 = vld [vmem:[#allocation12 + $0x40] sm:$0xff] }
 0xb80   : > { %v2735_v21 = vpop.f32.mrf.mxu0 }
 0xb81   : > { %v2739_v23 = vadd.f32 %v2735_v21, %v2655_v12  ;;  %v3179_v12 = vld [vmem:[#allocation12 + $0xe0] sm:$0xff]  ;;  %v3174_v21 = vld [vmem:[#allocation12 + $0xb8] sm:$0xff] }
 0xb82   : > { %v3948_v4 = vpop.f32.mrf.mxu0 }
 0xb83   : > { %v2841_v24 = vmul.f32 %v4150_v14, %v2739_v23  ;;  %v3162_v14 = vld [vmem:[#allocation12 + $0x58] sm:$0xff]  ;;  %v3173_v4 = vld [vmem:[#allocation12 + $0xb0] sm:$0xff] }
 0xb84   : > { %v2914_v25 = vpop.f32.mrf.mxu0  ;;  %v3158_v23 = vld [vmem:[#allocation12 + $0x38] sm:$0xff] }
 0xb85   : > { %v2918_v27 = vadd.f32 %v2914_v25, %v2841_v24  ;;  %v3157_v24 = vld [vmem:[#allocation12 + $0x30] sm:$0xff]  ;;  %v3172_v25 = vld [vmem:[#allocation12 + $0xa8] sm:$0xff] }
 0xb86   : > { %v3964_v29 = vpop.f32.mrf.mxu0 }
 0xb87   : > { %v2920_v63 = vmul.f32 %v4152_v28, %v2918_v27  ;;  %v3156_v27 = vld [vmem:[#allocation12 + $0x28] sm:$0xff]  ;;  %v3171_v28 = vld [vmem:[#allocation12 + $0xa0] sm:$0xff] }
 0xb88   : > { %v3155_v29 = vld [vmem:[#allocation12 + $0x20] sm:$0xff] }
 0xb89   : > { %3974 = vmatmul.mubr.msk.f32.vlgmr.msra.gmra.mxu0 %vm1278_vm5, %v2920_v63 }
 0xb8a   : > { %3630 = vmatpush3.msra.mxu0 %v3166_v61 }
 0xb8b   : > { %3631 = vmatprep.subr.mxu0 %v3181_v8 }
 0xb8c   : > { %3632 = vmatpush3.msra.mxu0 %v3165_v9 }
 0xb8d   : > { %3633 = vmatprep.subr.mxu0 %v3180_v10 }
 0xb8e   : > { %3634 = vmatpush3.msra.mxu0 %v3164_v11 }
 0xb8f   : > { %3635 = vmatprep.subr.mxu0 %v3179_v12 }
 0xb90   : > { %3636 = vmatpush3.msra.mxu0 %v3163_v13 }
 0xb91   : > { %3637 = vmatprep.subr.mxu0 %v3178_v58 }
 0xb92   : > { %3638 = vmatpush3.msra.mxu0 %v3162_v14 }
 0xb93   : > { %3639 = vmatprep.subr.mxu0 %v3177_v15 }
 0xb94   : > { %3640 = vmatpush3.msra.mxu0 %v3161_v16 }
 0xb95   : > { %3641 = vmatprep.subr.mxu0 %v3176_v17 }
 0xb96   : > { %3642 = vmatpush3.msra.mxu0 %v3160_v18 }
 0xc49   : > { %v2995_v50 = vpop.f32.mrf.mxu0 }
 0xc4a   : > { %v5175_v51 = vadd.f32 %v2995_v50, %v2567_v19  ;;  %v3175_v19 = vld [vmem:[#allocation12 + $0xc0] sm:$0xff] }
 0xc4b   : > { %v3975_v60 = vpop.f32.mrf.mxu0  ;;  %3643 = vmatprep.subr.mxu0 %v3175_v19 }
 0xc4c   : > { %3002 = vadd.xlane.f32.xlu0 %v5175_v51  ;;  %3644 = vmatpush3.msra.mxu0 %v3159_v20 }
 0xc4d   : > { %3645 = vmatprep.subr.mxu0 %v3174_v21 }
 0xc4e   : > { %3646 = vmatpush3.msra.mxu0 %v3158_v23 }
 0xc4f   : > { %3647 = vmatprep.subr.mxu0 %v3173_v4 }
 0xc50   : > { %3648 = vmatpush3.msra.mxu0 %v3157_v24 }
 0xc51   : > { %3649 = vmatprep.subr.mxu0 %v3172_v25 }
 0xc52   : > { %3650 = vmatpush3.msra.mxu0 %v3156_v27 }
 0xc53   : > { %3651 = vmatprep.subr.mxu0 %v3171_v28 }
 0xc54   : > { %3652 = vmatpush3.msra.mxu0 %v3155_v29 }
 0xc55   : > { %3653 = vmatprep.subr.mxu0 %v3170_v6 }
 0xc56   : > { %3654 = vmatpush3.msra.mxu0 %v3154_v7 }
 0xc57   : > { %3655 = vmatprep.subr.mxu0 %v3169_v34 }
 0xc58   : > { %3656 = vmatpush3.msra.mxu0 %v3153_v35 }
 0xc59   : > { %3657 = vmatprep.subr.mxu0 %v3168_v36 }
 0xc5a   : > { %3658 = vmatpush3.msra.mxu0 %v3152_v37 }
 0xcd5   : > { %v3003_v62 = vpop.xlane.xlu0 %3002 }
 0xcd6   : > { %v3004_v26 = vmul.f32 0.0078125, %v3003_v62 }
 0xcd8   : > { %v5179_v30 = vsub.f32 %v5175_v51, %v3004_v26 }
 0xcda   : > { %v3006_v22 = vmul.f32 %v5179_v30, %v5179_v30  ;;  %v3025_v1 = vmul.f32 %v3472_v0, %v5179_v30  ;;  %v3167_v30 = vld [vmem:[#allocation12 + $0x80] sm:$0xff] }
 0xcdb   : > { %3659 = vmatprep.subr.mxu0 %v3167_v30 }
 0xcdc   : > { %3007 = vadd.xlane.f32.xlu1 %v3006_v22  ;;  %3660 = vmatpush3.msra.mxu0 %v3151_v38 }
 0xd65   : > { %v3008_v63 = vpop.xlane.xlu1 %3007 }
 0xd66   : > { %v3009_v50 = vmul.f32 0.007874016, %v3008_v63 }
 0xd68   : > { %4153 = vrsqrt.f32 %v3009_v50  ;;  %vm3012_vm8 = vcmp.eq.f32.partialorder %v3009_v50, inf  ;;  %v3015_v26 = vand.u32 2147483648, %v3009_v50  ;;  %vm3014_vm9 = vcmp.eq.f32.partialorder %v3009_v50, 0.0 }
 0xd75   : > { %v4154_v60 = vpop.eup %4153 }
 0xd76   : > { %v3011_v62 = vmul.f32 %v4154_v60, %v3009_v50 }
 0xd78   : > { %v3013_v22 = vsel %vm3012_vm8, %v3009_v50, %v3011_v62 }
 0xd79   : > { %v3016_v31 = vsel %vm3014_vm9, %v3015_v26, %v3013_v22 }
 0xd7a   : > { %v3017_v32 = vadd.f32 1e-06, %v3016_v31 }
 0xd7c   : > { %4155 = vrcp.f32 %v3017_v32 }
 0xd89   : > { %v4156_v2 = vpop.eup %4155 }
 0xd8a   : > { %v3026_v33 = vmul.f32 %v4156_v2, %v3025_v1 }
 0xd8c   : > { %v3033_v5 = vadd.f32 %v3473_v3, %v3026_v33 }
 0xd8e   : > { %3143 = vmatmul.mubr.f32.vlgmr.msra.gmra.mxu1 %v3033_v5 }
 0xe4e   : > { %v3144_v46 = vpop.f32.mrf.mxu1 }
 0xe4f   : > { %v3145_v47 = vadd.f32 %v3144_v46, %v3071_v44 }
 0xe50   : > { %v3146_v49 = vpop.f32.mrf.mxu1 }
 0xe51   : > { %v3147_v52 = vadd.f32 %v3146_v49, %v3075_v45  ;;  %v3149_v53 = vmax.f32 %v3145_v47, 0.0 }
 0xe53   : > { %v3150_v48 = vmax.f32 %v3147_v52, 0.0 }
 0xe55   : > { %3254 = vmatprep.mubr.f32.mxu0 %v3150_v48 }
 0xe56   : > { %3255 = vmatmul.mubr.f32.vlgmr.msra.gmra.mxu0 %v3149_v53 }
 0xf16   : > { %v3661_v54 = vpop.f32.mrf.mxu0 }
 0xf18   : > { %v3662_v56 = vpop.f32.mrf.mxu0 }
 0xf19   : > { %v3663_v57 = vadd.f32 %v3662_v56, %v3661_v54 }
 0xf1b   : > { %v3257_v59 = vadd.f32 %v3663_v57, %v3474_v55 }
 0xf1d   : > { %v3260_v61 = vadd.f32 %v3257_v59, %v5175_v51 }
 0xf1f   : > { %3261 = vst [vmem:[%s4710_s17] sm:$0xff] %v3260_v61 }
 0xf20   : > { %4302 = shalt.err (!%p4299_p7)
}
 0xf21   : > { %s4303_s25 = scalar_lea.hbm %s3276_s19, 128  ;;  %s4307_s0 = scalar_lea.hbm %s5415_s24, 512 }
 0xf22   : > { %p4304_p8 = scmp.ne.s32.totalorder %s3276_s19, %s4303_s25  ;;  %p4308_p13 = scmp.lt.s32.totalorder %s3276_s19, %s5415_s24 }
 0xf23   : > { %p4309_p3 = scmp.lt.s32.totalorder %s4307_s0, %s4303_s25 }
 0xf24   : > { %p4305_p5 = pnand %p4304_p8, %p5416_p10 }
 0xf25   : > { %p4310_p1 = por %p4309_p3, %p4308_p13 }
 0xf26   : > { %p4306_p11 = pneg %p4305_p5 }
 0xf28   : > { %p4311_p9 = pnand %p4310_p1, %p4306_p11 }
 0xf2a   : > { %4314 = shalt.err (!%p4311_p9)
}
 0xf2b   : > { %3995 = dma.vmem_to_hbm [thread:$0]  (%p5416_p10), %s3279_s29, 128, %s3276_s19, %s3263_s1  }
 0xf2c PF: > { %s5417_s27 = sld [smem:[#allocation18_spill]]  ;;  %p4027_p12 = scmp.ge.s32.totalorder %s4393_s23, 2 }
 0xf2d   : > { %p5418_p0 = scmp.ne.s32.totalorder %s5402_s26, 0 }
 0xf2f   : > { %p4015_p6 = pnand %p4027_p12, %p5418_p0 }
 0xf31   : > { %p4016_p2 = pneg %p4015_p6 }
 0xf32   : > { %s3290_s3 = sand.u32 1, %s5417_s27  }
 0xf33   : > { %s3291_s16 = scalar_lea.sflag [#allocation6], %s3290_s3 }
 0xf34   : > { %4360 = dma.done.wait (%p4016_p2), %s3291_s16, 128  }
 0xf35   : > { %4362 = vsyncadd (%p4016_p2), %s3291_s16, 4294967168  ;;  %s37_s23 = sadd.s32 1, %s4393_s23   ;;  %s5419_s1 = sld [smem:[#allocation19_spill]] }
 0xf36   : > { %p34_p4 = scmp.ge.s32.totalorder %s37_s23, 6   ;;  %s5420_s28 = sld [smem:[#allocation20_spill]] }
 0xf37   : > { %s5421_s2 = sld [smem:[#allocation21_spill]]  ;;  %s5422_s0 = smov %s4369_s30 }
 0xf38   : > { %s5423_s30 = smov %s4373_s20  ;;  %s5424_s20 = smov %s4660_s11 }
 0xf39   : > { %s5425_s21 = smov %s4385_s22  ;;  %36 = sbr.rel (!%p34_p4) target bundleno = 25 (0x19), region = 170 }
 0xf3c   : > { %s5426_s22 = smov %s5420_s28 }
 0xf3e   :  { %3296 = vsyncpa [#allocation5], 1 }
 0xf3f   :  { %3298 = vsyncpa [#allocation5 + $0x1], 1 }
 0xf40   :  { %3299 = vsyncpa [#allocation8], 1 }
 0xf41   :  { %3300 = vsyncpa [#allocation11], 1 }
 0xf42   :  { %3301 = vsyncpa [#allocation6], 1 }
 0xf43   :  { %3303 = vsyncpa [#allocation6 + $0x1], 1 }

</bundles_post_ra>
